<compile_context>
chip_gen: v6e
topology: v6e:2x2x1
jax: 0.10.0
libtpu: 0.0.40
codegen_flags: <defaults>
</compile_context>

<pallas_src>
import jax
import jax.numpy as jnp
from jax.experimental import pallas as pl
from jax.experimental.pallas import tpu as pltpu

EPS = 1e-5          # nn.BatchNorm3d default eps
LANE = 128          # lane-dense channel padding
TILE_M = 512        # rows per grid step (~85% of HBM roofline per Pallas data)


# ----------------------------- Pallas kernels ------------------------------

def matmul_stats_kernel(p_ref, w_ref, y_ref, sum_ref, sq_ref):
    """One M-tile of (patches @ weights); stream per-channel sum / sum-sq."""
    @pl.when(pl.program_id(0) == 0)
    def _init():
        sum_ref[...] = jnp.zeros_like(sum_ref)
        sq_ref[...] = jnp.zeros_like(sq_ref)

    y = jnp.dot(p_ref[...], w_ref[...], preferred_element_type=jnp.float32)
    y_ref[...] = y
    sum_ref[...] += jnp.sum(y, axis=0, keepdims=True)
    sq_ref[...] += jnp.sum(y * y, axis=0, keepdims=True)


def bn_relu_kernel(y_ref, scale_ref, shift_ref, o_ref):
    """Apply folded BN affine (scale/shift) + ReLU on one M-tile."""
    z = y_ref[...] * scale_ref[...] + shift_ref[...]
    o_ref[...] = jnp.maximum(z, 0.0).astype(o_ref.dtype)


def bn_add_relu_kernel(y_ref, scale_ref, shift_ref, o_ref):
    """Apply two folded BNs (conv2 half + shortcut half), add, ReLU."""
    z = y_ref[...] * scale_ref[...] + shift_ref[...]
    half = o_ref.shape[-1]                 # lane-aligned split (multiple of 128)
    o_ref[...] = jnp.maximum(z[:, :half] + z[:, half:], 0.0).astype(o_ref.dtype)


# ------------------------------ call wrappers -------------------------------

def _matmul_stats(p, w, tile_m):
    m_pad, k = p.shape
    c = w.shape[1]
    nt = m_pad // tile_m
    cost = pl.CostEstimate(
        flops=2 * m_pad * k * c,
        transcendentals=0,
        bytes_accessed=int(p.size * p.dtype.itemsize + w.size * w.dtype.itemsize
                           + m_pad * c * 4 + 2 * c * 4))
    return pl.pallas_call(
        matmul_stats_kernel,
        out_shape=(jax.ShapeDtypeStruct((m_pad, c), jnp.float32),   # conv out
                   jax.ShapeDtypeStruct((1, c), jnp.float32),       # sum
                   jax.ShapeDtypeStruct((1, c), jnp.float32)),      # sum of sq
        grid=(nt,),
        in_specs=[pl.BlockSpec((tile_m, k), lambda i: (i, 0)),
                  pl.BlockSpec((k, c), lambda i: (0, 0))],
        out_specs=(pl.BlockSpec((tile_m, c), lambda i: (i, 0)),
                   pl.BlockSpec((1, c), lambda i: (0, 0)),          # resident
                   pl.BlockSpec((1, c), lambda i: (0, 0))),         # resident
        compiler_params=pltpu.CompilerParams(
            dimension_semantics=("arbitrary",)),   # BN reduction axis
        cost_estimate=cost,
    )(p, w)


def _bn_apply(kernel, y, scale, shift, out_cols, out_dtype, tile_m):
    m_pad, c = y.shape
    nt = m_pad // tile_m
    out_bytes = m_pad * out_cols * jnp.dtype(out_dtype).itemsize
    cost = pl.CostEstimate(flops=4 * m_pad * c, transcendentals=0,
                           bytes_accessed=int(m_pad * c * 4 + 2 * c * 4 + out_bytes))
    return pl.pallas_call(
        kernel,
        out_shape=jax.ShapeDtypeStruct((m_pad, out_cols), out_dtype),
        grid=(nt,),
        in_specs=[pl.BlockSpec((tile_m, c), lambda i: (i, 0)),
                  pl.BlockSpec((1, c), lambda i: (0, 0)),
                  pl.BlockSpec((1, c), lambda i: (0, 0))],
        out_specs=pl.BlockSpec((tile_m, out_cols), lambda i: (i, 0)),
        compiler_params=pltpu.CompilerParams(
            dimension_semantics=("parallel",)),    # independent tiles -> 2 TCs
        cost_estimate=cost,
    )(y, scale, shift)


# --------------------------------- glue ------------------------------------

def _round_up(x, m):
    return (x + m - 1) // m * m


def _pad_cols(a, cols):
    return jnp.pad(a, ((0, 0), (0, cols - a.shape[1])))


def _pad_rows(a, rows):
    return jnp.pad(a, ((0, rows - a.shape[0]), (0, 0)))


def _bn_scale_shift(s, q, m_true, gamma, beta):
    """Fold training-mode BN (biased var, like PyTorch forward) into affine."""
    mean = s / m_true
    var = jnp.maximum(q / m_true - mean * mean, 0.0)
    scale = gamma * jax.lax.rsqrt(var + EPS)
    shift = beta - mean * scale
    return scale, shift


def _im2col_3x3x3(x_ndhwc, stride):
    """Extract 3x3x3 patches (padding=1) -> (N*Do*Ho*Wo, 27*C)."""
    n, d, h, w, c = x_ndhwc.shape
    sd, sh, sw = stride
    xp = jnp.pad(x_ndhwc, ((0, 0), (1, 1), (1, 1), (1, 1), (0, 0)))
    do = (d + 2 - 3) // sd + 1
    ho = (h + 2 - 3) // sh + 1
    wo = (w + 2 - 3) // sw + 1
    cols = []
    for kd in range(3):
        for kh in range(3):
            for kw in range(3):
                win = xp[:, kd:kd + (do - 1) * sd + 1:sd,
                            kh:kh + (ho - 1) * sh + 1:sh,
                            kw:kw + (wo - 1) * sw + 1:sw, :]
                cols.append(win.reshape(n * do * ho * wo, c))
    return jnp.concatenate(cols, axis=1), (n, do, ho, wo)


def init_params(key, cin, cout):
    k1, k2, k3 = jax.random.split(key, 3)
    w1 = jax.random.normal(k1, (3, 3, 3, cin, cout), jnp.float32) / jnp.sqrt(27.0 * cin)
    w2 = jax.random.normal(k2, (3, 3, 3, cout, cout), jnp.float32) / jnp.sqrt(27.0 * cout)
    wsc = jax.random.normal(k3, (cin, cout), jnp.float32) / jnp.sqrt(1.0 * cin)
    ones = jnp.ones((1, cout), jnp.float32)    # BN weight default = 1
    zeros = jnp.zeros((1, cout), jnp.float32)  # BN bias default = 0
    return dict(w1=w1, w2=w2, wsc=wsc,
                g1=ones, b1=zeros, g2=ones, b2=zeros, gsc=ones, bsc=zeros)


def residual_block3d_pallas(x_ncdhw, params, stride=(1, 1, 1)):
    # NCDHW -> NDHWC, bf16 MXU operands (BN / accumulation stay f32).
    x = jnp.transpose(x_ncdhw, (0, 2, 3, 4, 1)).astype(jnp.bfloat16)
    n, d, h, w, cin = x.shape
    cout = params["w1"].shape[-1]
    cp = _round_up(cout, LANE)                       # lane-dense channel pad

    # ---------------- stage 1: conv1 (3x3x3) -> bn1 -> relu ----------------
    p1, (n_, do, ho, wo) = _im2col_3x3x3(x, stride)
    m = n_ * do * ho * wo
    tile_m = min(TILE_M, _round_up(m, 16))
    m_pad = _round_up(m, tile_m)
    p1 = _pad_rows(p1, m_pad)                        # zero rows: no stat impact
    w1m = _pad_cols(params["w1"].reshape(27 * cin, cout), cp).astype(jnp.bfloat16)

    y1, s1, q1 = _matmul_stats(p1, w1m, tile_m)
    sc1, sh1 = _bn_scale_shift(s1, q1, float(m),
                               _pad_cols(params["g1"], cp),
                               _pad_cols(params["b1"], cp))
    h1 = _bn_apply(bn_relu_kernel, y1, sc1, sh1, cp, jnp.bfloat16, tile_m)

    # --- stage 2: conv2 (3x3x3) -> bn2, fused with 1x1x1 shortcut -> bn ----
    h1_nd = h1[:m, :cout].reshape(n_, do, ho, wo, cout)      # bf16 intermediate
    p2, _ = _im2col_3x3x3(h1_nd, (1, 1, 1))
    sd, sh_, sw = stride
    xs = x[:, ::sd, ::sh_, ::sw, :].reshape(m, cin)          # 1x1x1 shortcut taps
    p_cat = _pad_rows(jnp.concatenate([p2, xs], axis=1), m_pad)

    k2 = 27 * cout
    w2m = _pad_cols(params["w2"].reshape(k2, cout), cp)
    wscm = _pad_cols(params["wsc"], cp)
    # Block-diagonal weights: cols [0,cp) = conv2, cols [cp,2cp) = shortcut.
    w_cat = jnp.concatenate([
        jnp.concatenate([w2m, jnp.zeros((k2, cp), jnp.float32)], axis=1),
        jnp.concatenate([jnp.zeros((cin, cp), jnp.float32), wscm], axis=1),
    ], axis=0).astype(jnp.bfloat16)

    y2, s2, q2 = _matmul_stats(p_cat, w_cat, tile_m)
    g_cat = jnp.concatenate([_pad_cols(params["g2"], cp),
                             _pad_cols(params["gsc"], cp)], axis=1)
    b_cat = jnp.concatenate([_pad_cols(params["b2"], cp),
                             _pad_cols(params["bsc"], cp)], axis=1)
    sc2, sh2 = _bn_scale_shift(s2, q2, float(m), g_cat, b_cat)
    out = _bn_apply(bn_add_relu_kernel, y2, sc2, sh2, cp, jnp.float32, tile_m)

    out = out[:m, :cout].reshape(n_, do, ho, wo, cout)
    return jnp.transpose(out, (0, 4, 1, 2, 3))       # -> NCDHW (PyTorch layout)


# ---------------------------- pure-JAX reference ----------------------------

def residual_block3d_ref(x_ncdhw, params, stride=(1, 1, 1)):
    x = jnp.transpose(x_ncdhw, (0, 2, 3, 4, 1)).astype(jnp.float32)
    dn = ("NDHWC", "DHWIO", "NDHWC")

    def bn(y, g, b):
        mean = jnp.mean(y, axis=(0, 1, 2, 3), keepdims=True)
        var = jnp.mean(jnp.square(y - mean), axis=(0, 1, 2, 3), keepdims=True)
        return ((y - mean) / jnp.sqrt(var + EPS)
                * g.reshape(1, 1, 1, 1, -1) + b.reshape(1, 1, 1, 1, -1))

    h = jax.lax.conv_general_dilated(x, params["w1"], stride, [(1, 1)] * 3,
                                     dimension_numbers=dn)
    h = jax.nn.relu(bn(h, params["g1"], params["b1"]))
    h = jax.lax.conv_general_dilated(h, params["w2"], (1, 1, 1), [(1, 1)] * 3,
                                     dimension_numbers=dn)
    h = bn(h, params["g2"], params["b2"])
    wsc = params["wsc"].reshape(1, 1, 1, *params["wsc"].shape)
    sc = jax.lax.conv_general_dilated(x, wsc, stride, [(0, 0)] * 3,
                                      dimension_numbers=dn)
    sc = bn(sc, params["gsc"], params["bsc"])
    out = jax.nn.relu(h + sc)
    return jnp.transpose(out, (0, 4, 1, 2, 3))


# ----------------------------------- main -----------------------------------

if __name__ == "__main__":
    key = jax.random.PRNGKey(0)
    kx, kp = jax.random.split(key)

    # Matches ResidualBlock3D(in_channels=4, out_channels=8, stride=(1,1,1));
    # in_channels != out_channels so the conv+bn shortcut branch is exercised.
    N, Cin, Cout, D, H, W = 2, 4, 8, 8, 8, 8
    x = jax.random.normal(kx, (N, Cin, D, H, W), jnp.float32)  # PyTorch NCDHW
    params = init_params(kp, Cin, Cout)

    fwd = jax.jit(residual_block3d_pallas)
    out = jax.block_until_ready(fwd(x, params))
    ref = jax.block_until_ready(residual_block3d_ref(x, params))

    assert out.shape == (N, Cout, D, H, W), out.shape
    # Tolerance accounts for bf16 MXU inputs / bf16 h1 intermediate vs f32 ref.
    max_err = float(jnp.max(jnp.abs(out - ref)))
    assert max_err < 1e-1, f"mismatch vs reference: max abs err = {max_err}"
    print("KERNEL_OK")
</pallas_src>

<mosaic_0001>
module attributes {stable_mosaic.version = 11 : i64} {
  func.func @matmul_stats_kernel(%arg0: i32, %arg1: memref<512x108xbf16, #tpu.memory_space<vmem>>, %arg2: memref<108x128xbf16, #tpu.memory_space<vmem>>, %arg3: memref<512x128xf32, #tpu.memory_space<vmem>>, %arg4: memref<1x128xf32, #tpu.memory_space<vmem>>, %arg5: memref<1x128xf32, #tpu.memory_space<vmem>>) attributes {dimension_semantics = [#tpu.dimension_semantics<arbitrary>], iteration_bounds = array<i64: 2>, scalar_prefetch = 0 : i64, scratch_operands = 0 : i64, tpu.core_type = #tpu.core_type<tc>, window_params = [{transform_indices = @transform_0, window_bounds = array<i64: 512, 108>}, {pipeline_mode = #tpu.pipeline_mode<synchronous>, transform_indices = @transform_1, window_bounds = array<i64: 108, 128>}, {transform_indices = @transform_2, window_bounds = array<i64: 512, 128>}, {pipeline_mode = #tpu.pipeline_mode<synchronous>, transform_indices = @transform_3, window_bounds = array<i64: 1, 128>}, {pipeline_mode = #tpu.pipeline_mode<synchronous>, transform_indices = @transform_4, window_bounds = array<i64: 1, 128>}]} {
    %c0_i32 = arith.constant 0 : i32
    %0 = arith.cmpi eq, %arg0, %c0_i32 : i32
    %1 = arith.extui %0 : i1 to i32
    %c0_i32_0 = arith.constant 0 : i32
    %2 = arith.cmpi ne, %1, %c0_i32_0 : i32
    scf.if %2 {
      %cst_16 = arith.constant 0.000000e+00 : f32
      %18 = vector.broadcast %cst_16 : f32 to vector<1x128xf32>
      %c0_17 = arith.constant 0 : index
      %c0_18 = arith.constant 0 : index
      %19 = vector.load %arg4[%c0_17, %c0_18] : memref<1x128xf32, #tpu.memory_space<vmem>>, vector<1x128xf32>
      tpu.vector_store %arg4[%c0_17, %c0_18], %18 {strides = array<i32>} : memref<1x128xf32, #tpu.memory_space<vmem>>, vector<1x128xf32>,
      %cst_19 = arith.constant 0.000000e+00 : f32
      %20 = vector.broadcast %cst_19 : f32 to vector<1x128xf32>
      %c0_20 = arith.constant 0 : index
      %c0_21 = arith.constant 0 : index
      %21 = vector.load %arg5[%c0_20, %c0_21] : memref<1x128xf32, #tpu.memory_space<vmem>>, vector<1x128xf32>
      tpu.vector_store %arg5[%c0_20, %c0_21], %20 {strides = array<i32>} : memref<1x128xf32, #tpu.memory_space<vmem>>, vector<1x128xf32>,
    } else {
    }
    %c0 = arith.constant 0 : index
    %c0_1 = arith.constant 0 : index
    %3 = vector.load %arg1[%c0, %c0_1] : memref<512x108xbf16, #tpu.memory_space<vmem>>, vector<512x108xbf16>
    %c0_2 = arith.constant 0 : index
    %c0_3 = arith.constant 0 : index
    %4 = vector.load %arg2[%c0_2, %c0_3] : memref<108x128xbf16, #tpu.memory_space<vmem>>, vector<108x128xbf16>
    %cst = arith.constant dense<0.000000e+00> : vector<512x128xf32>
    %5 = tpu.matmul %3, %4, %cst {dimension_numbers = #tpu.dot_dimension_numbers<[1], [0], [0], [1], [0, 0, 1, 1], [], []>} : vector<512x108xbf16>, vector<108x128xbf16>, vector<512x128xf32> -> vector<512x128xf32>
    %c0_4 = arith.constant 0 : index
    %c0_5 = arith.constant 0 : index
    %6 = vector.load %arg3[%c0_4, %c0_5] : memref<512x128xf32, #tpu.memory_space<vmem>>, vector<512x128xf32>
    tpu.vector_store %arg3[%c0_4, %c0_5], %5 {strides = array<i32>} : memref<512x128xf32, #tpu.memory_space<vmem>>, vector<512x128xf32>,
    %c0_6 = arith.constant 0 : index
    %c0_7 = arith.constant 0 : index
    %7 = vector.load %arg4[%c0_6, %c0_7] : memref<1x128xf32, #tpu.memory_space<vmem>>, vector<1x128xf32>
    %cst_8 = arith.constant dense<0.000000e+00> : vector<128xf32>
    %8 = vector.multi_reduction <add>, %5, %cst_8 [0] : vector<512x128xf32> to vector<128xf32>
    %9 = vector.shape_cast %8 : vector<128xf32> to vector<1x128xf32>
    %10 = arith.addf %7, %9 : vector<1x128xf32>
    %c0_9 = arith.constant 0 : index
    %c0_10 = arith.constant 0 : index
    %11 = vector.load %arg4[%c0_9, %c0_10] : memref<1x128xf32, #tpu.memory_space<vmem>>, vector<1x128xf32>
    tpu.vector_store %arg4[%c0_9, %c0_10], %10 {strides = array<i32>} : memref<1x128xf32, #tpu.memory_space<vmem>>, vector<1x128xf32>,
    %c0_11 = arith.constant 0 : index
    %c0_12 = arith.constant 0 : index
    %12 = vector.load %arg5[%c0_11, %c0_12] : memref<1x128xf32, #tpu.memory_space<vmem>>, vector<1x128xf32>
    %13 = arith.mulf %5, %5 : vector<512x128xf32>
    %cst_13 = arith.constant dense<0.000000e+00> : vector<128xf32>
    %14 = vector.multi_reduction <add>, %13, %cst_13 [0] : vector<512x128xf32> to vector<128xf32>
    %15 = vector.shape_cast %14 : vector<128xf32> to vector<1x128xf32>
    %16 = arith.addf %12, %15 : vector<1x128xf32>
    %c0_14 = arith.constant 0 : index
    %c0_15 = arith.constant 0 : index
    %17 = vector.load %arg5[%c0_14, %c0_15] : memref<1x128xf32, #tpu.memory_space<vmem>>, vector<1x128xf32>
    tpu.vector_store %arg5[%c0_14, %c0_15], %16 {strides = array<i32>} : memref<1x128xf32, #tpu.memory_space<vmem>>, vector<1x128xf32>,
    return
  }
  func.func @transform_0(%arg0: i32) -> (i32, i32) {
    %c0_i32 = arith.constant 0 : i32
    %c0_i32_0 = arith.constant 0 : i32
    return %arg0, %c0_i32 : i32, i32
  }
  func.func @transform_1(%arg0: i32) -> (i32, i32) {
    %c0_i32 = arith.constant 0 : i32
    %c0_i32_0 = arith.constant 0 : i32
    %c0_i32_1 = arith.constant 0 : i32
    return %c0_i32, %c0_i32_0 : i32, i32
  }
  func.func @transform_2(%arg0: i32) -> (i32, i32) {
    %c0_i32 = arith.constant 0 : i32
    %c0_i32_0 = arith.constant 0 : i32
    return %arg0, %c0_i32 : i32, i32
  }
  func.func @transform_3(%arg0: i32) -> (i32, i32) {
    %c0_i32 = arith.constant 0 : i32
    %c0_i32_0 = arith.constant 0 : i32
    %c0_i32_1 = arith.constant 0 : i32
    return %c0_i32, %c0_i32_0 : i32, i32
  }
  func.func @transform_4(%arg0: i32) -> (i32, i32) {
    %c0_i32 = arith.constant 0 : i32
    %c0_i32_0 = arith.constant 0 : i32
    %c0_i32_1 = arith.constant 0 : i32
    return %c0_i32, %c0_i32_0 : i32, i32
  }
}

module attributes {stable_mosaic.version = 11 : i64} {
  func.func @bn_relu_kernel(%arg0: i32, %arg1: memref<512x128xf32, #tpu.memory_space<vmem>>, %arg2: memref<1x128xf32, #tpu.memory_space<vmem>>, %arg3: memref<1x128xf32, #tpu.memory_space<vmem>>, %arg4: memref<512x128xbf16, #tpu.memory_space<vmem>>) attributes {dimension_semantics = [#tpu.dimension_semantics<parallel>], iteration_bounds = array<i64: 2>, scalar_prefetch = 0 : i64, scratch_operands = 0 : i64, tpu.core_type = #tpu.core_type<tc>, window_params = [{transform_indices = @transform_0, window_bounds = array<i64: 512, 128>}, {pipeline_mode = #tpu.pipeline_mode<synchronous>, transform_indices = @transform_1, window_bounds = array<i64: 1, 128>}, {pipeline_mode = #tpu.pipeline_mode<synchronous>, transform_indices = @transform_2, window_bounds = array<i64: 1, 128>}, {transform_indices = @transform_3, window_bounds = array<i64: 512, 128>}]} {
    %c0 = arith.constant 0 : index
    %c0_0 = arith.constant 0 : index
    %0 = vector.load %arg1[%c0, %c0_0] : memref<512x128xf32, #tpu.memory_space<vmem>>, vector<512x128xf32>
    %c0_1 = arith.constant 0 : index
    %c0_2 = arith.constant 0 : index
    %1 = vector.load %arg2[%c0_1, %c0_2] : memref<1x128xf32, #tpu.memory_space<vmem>>, vector<1x128xf32>
    %2 = vector.broadcast %1 : vector<1x128xf32> to vector<512x128xf32>
    %3 = arith.mulf %0, %2 : vector<512x128xf32>
    %c0_3 = arith.constant 0 : index
    %c0_4 = arith.constant 0 : index
    %4 = vector.load %arg3[%c0_3, %c0_4] : memref<1x128xf32, #tpu.memory_space<vmem>>, vector<1x128xf32>
    %5 = vector.broadcast %4 : vector<1x128xf32> to vector<512x128xf32>
    %6 = arith.addf %3, %5 : vector<512x128xf32>
    %cst = arith.constant 0.000000e+00 : f32
    %7 = vector.broadcast %cst : f32 to vector<512x128xf32>
    %8 = arith.maximumf %6, %7 : vector<512x128xf32>
    %9 = arith.truncf %8 : vector<512x128xf32> to vector<512x128xbf16>
    %c0_5 = arith.constant 0 : index
    %c0_6 = arith.constant 0 : index
    %10 = vector.load %arg4[%c0_5, %c0_6] : memref<512x128xbf16, #tpu.memory_space<vmem>>, vector<512x128xbf16>
    tpu.vector_store %arg4[%c0_5, %c0_6], %9 {strides = array<i32>} : memref<512x128xbf16, #tpu.memory_space<vmem>>, vector<512x128xbf16>,
    return
  }
  func.func @transform_0(%arg0: i32) -> (i32, i32) {
    %c0_i32 = arith.constant 0 : i32
    %c0_i32_0 = arith.constant 0 : i32
    return %arg0, %c0_i32 : i32, i32
  }
  func.func @transform_1(%arg0: i32) -> (i32, i32) {
    %c0_i32 = arith.constant 0 : i32
    %c0_i32_0 = arith.constant 0 : i32
    %c0_i32_1 = arith.constant 0 : i32
    return %c0_i32, %c0_i32_0 : i32, i32
  }
  func.func @transform_2(%arg0: i32) -> (i32, i32) {
    %c0_i32 = arith.constant 0 : i32
    %c0_i32_0 = arith.constant 0 : i32
    %c0_i32_1 = arith.constant 0 : i32
    return %c0_i32, %c0_i32_0 : i32, i32
  }
  func.func @transform_3(%arg0: i32) -> (i32, i32) {
    %c0_i32 = arith.constant 0 : i32
    %c0_i32_0 = arith.constant 0 : i32
    return %arg0, %c0_i32 : i32, i32
  }
}

module attributes {stable_mosaic.version = 11 : i64} {
  func.func @matmul_stats_kernel(%arg0: i32, %arg1: memref<512x220xbf16, #tpu.memory_space<vmem>>, %arg2: memref<220x256xbf16, #tpu.memory_space<vmem>>, %arg3: memref<512x256xf32, #tpu.memory_space<vmem>>, %arg4: memref<1x256xf32, #tpu.memory_space<vmem>>, %arg5: memref<1x256xf32, #tpu.memory_space<vmem>>) attributes {dimension_semantics = [#tpu.dimension_semantics<arbitrary>], iteration_bounds = array<i64: 2>, scalar_prefetch = 0 : i64, scratch_operands = 0 : i64, tpu.core_type = #tpu.core_type<tc>, window_params = [{transform_indices = @transform_0, window_bounds = array<i64: 512, 220>}, {pipeline_mode = #tpu.pipeline_mode<synchronous>, transform_indices = @transform_1, window_bounds = array<i64: 220, 256>}, {transform_indices = @transform_2, window_bounds = array<i64: 512, 256>}, {pipeline_mode = #tpu.pipeline_mode<synchronous>, transform_indices = @transform_3, window_bounds = array<i64: 1, 256>}, {pipeline_mode = #tpu.pipeline_mode<synchronous>, transform_indices = @transform_4, window_bounds = array<i64: 1, 256>}]} {
    %c0_i32 = arith.constant 0 : i32
    %0 = arith.cmpi eq, %arg0, %c0_i32 : i32
    %1 = arith.extui %0 : i1 to i32
    %c0_i32_0 = arith.constant 0 : i32
    %2 = arith.cmpi ne, %1, %c0_i32_0 : i32
    scf.if %2 {
      %cst_16 = arith.constant 0.000000e+00 : f32
      %18 = vector.broadcast %cst_16 : f32 to vector<1x256xf32>
      %c0_17 = arith.constant 0 : index
      %c0_18 = arith.constant 0 : index
      %19 = vector.load %arg4[%c0_17, %c0_18] : memref<1x256xf32, #tpu.memory_space<vmem>>, vector<1x256xf32>
      tpu.vector_store %arg4[%c0_17, %c0_18], %18 {strides = array<i32>} : memref<1x256xf32, #tpu.memory_space<vmem>>, vector<1x256xf32>,
      %cst_19 = arith.constant 0.000000e+00 : f32
      %20 = vector.broadcast %cst_19 : f32 to vector<1x256xf32>
      %c0_20 = arith.constant 0 : index
      %c0_21 = arith.constant 0 : index
      %21 = vector.load %arg5[%c0_20, %c0_21] : memref<1x256xf32, #tpu.memory_space<vmem>>, vector<1x256xf32>
      tpu.vector_store %arg5[%c0_20, %c0_21], %20 {strides = array<i32>} : memref<1x256xf32, #tpu.memory_space<vmem>>, vector<1x256xf32>,
    } else {
    }
    %c0 = arith.constant 0 : index
    %c0_1 = arith.constant 0 : index
    %3 = vector.load %arg1[%c0, %c0_1] : memref<512x220xbf16, #tpu.memory_space<vmem>>, vector<512x220xbf16>
    %c0_2 = arith.constant 0 : index
    %c0_3 = arith.constant 0 : index
    %4 = vector.load %arg2[%c0_2, %c0_3] : memref<220x256xbf16, #tpu.memory_space<vmem>>, vector<220x256xbf16>
    %cst = arith.constant dense<0.000000e+00> : vector<512x256xf32>
    %5 = tpu.matmul %3, %4, %cst {dimension_numbers = #tpu.dot_dimension_numbers<[1], [0], [0], [1], [0, 0, 1, 1], [], []>} : vector<512x220xbf16>, vector<220x256xbf16>, vector<512x256xf32> -> vector<512x256xf32>
    %c0_4 = arith.constant 0 : index
    %c0_5 = arith.constant 0 : index
    %6 = vector.load %arg3[%c0_4, %c0_5] : memref<512x256xf32, #tpu.memory_space<vmem>>, vector<512x256xf32>
    tpu.vector_store %arg3[%c0_4, %c0_5], %5 {strides = array<i32>} : memref<512x256xf32, #tpu.memory_space<vmem>>, vector<512x256xf32>,
    %c0_6 = arith.constant 0 : index
    %c0_7 = arith.constant 0 : index
    %7 = vector.load %arg4[%c0_6, %c0_7] : memref<1x256xf32, #tpu.memory_space<vmem>>, vector<1x256xf32>
    %cst_8 = arith.constant dense<0.000000e+00> : vector<256xf32>
    %8 = vector.multi_reduction <add>, %5, %cst_8 [0] : vector<512x256xf32> to vector<256xf32>
    %9 = vector.shape_cast %8 : vector<256xf32> to vector<1x256xf32>
    %10 = arith.addf %7, %9 : vector<1x256xf32>
    %c0_9 = arith.constant 0 : index
    %c0_10 = arith.constant 0 : index
    %11 = vector.load %arg4[%c0_9, %c0_10] : memref<1x256xf32, #tpu.memory_space<vmem>>, vector<1x256xf32>
    tpu.vector_store %arg4[%c0_9, %c0_10], %10 {strides = array<i32>} : memref<1x256xf32, #tpu.memory_space<vmem>>, vector<1x256xf32>,
    %c0_11 = arith.constant 0 : index
    %c0_12 = arith.constant 0 : index
    %12 = vector.load %arg5[%c0_11, %c0_12] : memref<1x256xf32, #tpu.memory_space<vmem>>, vector<1x256xf32>
    %13 = arith.mulf %5, %5 : vector<512x256xf32>
    %cst_13 = arith.constant dense<0.000000e+00> : vector<256xf32>
    %14 = vector.multi_reduction <add>, %13, %cst_13 [0] : vector<512x256xf32> to vector<256xf32>
    %15 = vector.shape_cast %14 : vector<256xf32> to vector<1x256xf32>
    %16 = arith.addf %12, %15 : vector<1x256xf32>
    %c0_14 = arith.constant 0 : index
    %c0_15 = arith.constant 0 : index
    %17 = vector.load %arg5[%c0_14, %c0_15] : memref<1x256xf32, #tpu.memory_space<vmem>>, vector<1x256xf32>
    tpu.vector_store %arg5[%c0_14, %c0_15], %16 {strides = array<i32>} : memref<1x256xf32, #tpu.memory_space<vmem>>, vector<1x256xf32>,
    return
  }
  func.func @transform_0(%arg0: i32) -> (i32, i32) {
    %c0_i32 = arith.constant 0 : i32
    %c0_i32_0 = arith.constant 0 : i32
    return %arg0, %c0_i32 : i32, i32
  }
  func.func @transform_1(%arg0: i32) -> (i32, i32) {
    %c0_i32 = arith.constant 0 : i32
    %c0_i32_0 = arith.constant 0 : i32
    %c0_i32_1 = arith.constant 0 : i32
    return %c0_i32, %c0_i32_0 : i32, i32
  }
  func.func @transform_2(%arg0: i32) -> (i32, i32) {
    %c0_i32 = arith.constant 0 : i32
    %c0_i32_0 = arith.constant 0 : i32
    return %arg0, %c0_i32 : i32, i32
  }
  func.func @transform_3(%arg0: i32) -> (i32, i32) {
    %c0_i32 = arith.constant 0 : i32
    %c0_i32_0 = arith.constant 0 : i32
    %c0_i32_1 = arith.constant 0 : i32
    return %c0_i32, %c0_i32_0 : i32, i32
  }
  func.func @transform_4(%arg0: i32) -> (i32, i32) {
    %c0_i32 = arith.constant 0 : i32
    %c0_i32_0 = arith.constant 0 : i32
    %c0_i32_1 = arith.constant 0 : i32
    return %c0_i32, %c0_i32_0 : i32, i32
  }
}

module attributes {stable_mosaic.version = 11 : i64} {
  func.func @bn_add_relu_kernel(%arg0: i32, %arg1: memref<512x256xf32, #tpu.memory_space<vmem>>, %arg2: memref<1x256xf32, #tpu.memory_space<vmem>>, %arg3: memref<1x256xf32, #tpu.memory_space<vmem>>, %arg4: memref<512x128xf32, #tpu.memory_space<vmem>>) attributes {dimension_semantics = [#tpu.dimension_semantics<parallel>], iteration_bounds = array<i64: 2>, scalar_prefetch = 0 : i64, scratch_operands = 0 : i64, tpu.core_type = #tpu.core_type<tc>, window_params = [{transform_indices = @transform_0, window_bounds = array<i64: 512, 256>}, {pipeline_mode = #tpu.pipeline_mode<synchronous>, transform_indices = @transform_1, window_bounds = array<i64: 1, 256>}, {pipeline_mode = #tpu.pipeline_mode<synchronous>, transform_indices = @transform_2, window_bounds = array<i64: 1, 256>}, {transform_indices = @transform_3, window_bounds = array<i64: 512, 128>}]} {
    %c0 = arith.constant 0 : index
    %c0_0 = arith.constant 0 : index
    %0 = vector.load %arg1[%c0, %c0_0] : memref<512x256xf32, #tpu.memory_space<vmem>>, vector<512x256xf32>
    %c0_1 = arith.constant 0 : index
    %c0_2 = arith.constant 0 : index
    %1 = vector.load %arg2[%c0_1, %c0_2] : memref<1x256xf32, #tpu.memory_space<vmem>>, vector<1x256xf32>
    %2 = vector.broadcast %1 : vector<1x256xf32> to vector<512x256xf32>
    %3 = arith.mulf %0, %2 : vector<512x256xf32>
    %c0_3 = arith.constant 0 : index
    %c0_4 = arith.constant 0 : index
    %4 = vector.load %arg3[%c0_3, %c0_4] : memref<1x256xf32, #tpu.memory_space<vmem>>, vector<1x256xf32>
    %5 = vector.broadcast %4 : vector<1x256xf32> to vector<512x256xf32>
    %6 = arith.addf %3, %5 : vector<512x256xf32>
    %7 = vector.extract_strided_slice %6 {offsets = [0, 0], sizes = [512, 128], strides = [1, 1]} : vector<512x256xf32> to vector<512x128xf32>
    %8 = vector.extract_strided_slice %6 {offsets = [0, 128], sizes = [512, 128], strides = [1, 1]} : vector<512x256xf32> to vector<512x128xf32>
    %9 = arith.addf %7, %8 : vector<512x128xf32>
    %cst = arith.constant 0.000000e+00 : f32
    %10 = vector.broadcast %cst : f32 to vector<512x128xf32>
    %11 = arith.maximumf %9, %10 : vector<512x128xf32>
    %c0_5 = arith.constant 0 : index
    %c0_6 = arith.constant 0 : index
    %12 = vector.load %arg4[%c0_5, %c0_6] : memref<512x128xf32, #tpu.memory_space<vmem>>, vector<512x128xf32>
    tpu.vector_store %arg4[%c0_5, %c0_6], %11 {strides = array<i32>} : memref<512x128xf32, #tpu.memory_space<vmem>>, vector<512x128xf32>,
    return
  }
  func.func @transform_0(%arg0: i32) -> (i32, i32) {
    %c0_i32 = arith.constant 0 : i32
    %c0_i32_0 = arith.constant 0 : i32
    return %arg0, %c0_i32 : i32, i32
  }
  func.func @transform_1(%arg0: i32) -> (i32, i32) {
    %c0_i32 = arith.constant 0 : i32
    %c0_i32_0 = arith.constant 0 : i32
    %c0_i32_1 = arith.constant 0 : i32
    return %c0_i32, %c0_i32_0 : i32, i32
  }
  func.func @transform_2(%arg0: i32) -> (i32, i32) {
    %c0_i32 = arith.constant 0 : i32
    %c0_i32_0 = arith.constant 0 : i32
    %c0_i32_1 = arith.constant 0 : i32
    return %c0_i32, %c0_i32_0 : i32, i32
  }
  func.func @transform_3(%arg0: i32) -> (i32, i32) {
    %c0_i32 = arith.constant 0 : i32
    %c0_i32_0 = arith.constant 0 : i32
    return %arg0, %c0_i32 : i32, i32
  }
}

</mosaic_0001>

<bundles_post_ra>
// kernel: residual_block3d_pallas.5
= control target key start
LH: loop header
LB: loop body
LE: loop exit
PB: predicated region body
PF: predicated region fallthrough
CT: control target
= control target key end

     0   :  { %s1188_s12 = smov 0   ;;  %s1447_s0 = inlined_call_operand.vmem [shape: f32[1024,128], index: 0, kind: input, shape index: {}]   ;;  %s1448_s1 = inlined_call_operand.vmem [shape: f32[1,128], index: 1, kind: input, shape index: {}]   ;;  %s1449_s2 = inlined_call_operand.vmem [shape: f32[1,128], index: 2, kind: input, shape index: {}]   ;;  %s1450_s3 = inlined_call_operand.vmem [shape: bf16[1024,128], index: 3, kind: output, shape index: {}]  }
   0x1 LB: > { %s820_s13 = sadd.s32 4294967295, %s1166_s12   ;;  %p824_p0 = scmp.ge.s32.totalorder %s1166_s12, 1  ;;  %s1166_s12 = sphi %s1188_s12, %s13_s12  }
   0x2   : > { %p138_p1 = scmp.lt.s32.totalorder %s1166_s12, 3 }
   0x4   : > { %p139_p2 = pnand %p824_p0, %p138_p1 }
   0x5   : > { %s825_s14 = sshll.u32 (!%p139_p2), %s820_s13, 6 }
   0x6   : > { %142 = sbr.rel (%p139_p2) target bundleno = 77 (0x4d), region = 32  ;;  %p163_p3 = scmp.lt.s32.totalorder (!%p139_p2), %s825_s14, 127 }
   0xb   : > { %s1452_s14 = smov (!%p163_p3, %s825_s14), 127  ;;  %v1202_v0 = vld [vmem:[%s1448_s1] ss:$0 sm:$0xff] }
   0xc   : > { %s826_s15 = sshll.u32 %s1452_s14, 3  ;;  %v1212_v1 = vld [vmem:[%s1449_s2] ss:$0 sm:$0xff]  ;;  %s828_s23 = sshll.u32 %s1452_s14, 2 }
   0xd   : > { %s1207_s20 = scalar_lea.vmem %s1447_s0, %s826_s15  ;;  %s1244_s26 = scalar_lea.vmem %s1450_s3, %s828_s23 }
   0xe   : > { %v174_v2 = vld [vmem:[%s1207_s20] sm:$0xff]  ;;  %v175_v3 = vld [vmem:[%s1207_s20 + $0x8] sm:$0xff]  ;;  %v176_v4 = vld [vmem:[%s1207_s20 + $0x10] sm:$0xff] }
   0xf   : > { %v245_v5 = vmul.f32 %v1202_v0, %v174_v2  ;;  %v246_v6 = vmul.f32 %v1202_v0, %v175_v3  ;;  %v177_v7 = vld [vmem:[%s1207_s20 + $0x18] sm:$0xff]  ;;  %v247_v8 = vmul.f32 %v1202_v0, %v176_v4  ;;  %v178_v9 = vld [vmem:[%s1207_s20 + $0x20] sm:$0xff]  ;;  %v179_v10 = vld [vmem:[%s1207_s20 + $0x28] sm:$0xff] }
  0x10   : > { %v248_v11 = vmul.f32 %v1202_v0, %v177_v7  ;;  %v249_v12 = vmul.f32 %v1202_v0, %v178_v9  ;;  %v250_v13 = vmul.f32 %v1202_v0, %v179_v10  ;;  %v180_v14 = vld [vmem:[%s1207_s20 + $0x30] sm:$0xff]  ;;  %v181_v15 = vld [vmem:[%s1207_s20 + $0x38] sm:$0xff]  ;;  %v182_v24 = vld [vmem:[%s1207_s20 + $0x40] sm:$0xff] }
  0x11   : > { %v316_v16 = vadd.f32 %v1212_v1, %v245_v5  ;;  %v317_v17 = vadd.f32 %v1212_v1, %v246_v6  ;;  %v318_v18 = vadd.f32 %v1212_v1, %v247_v8  ;;  %v251_v19 = vmul.f32 %v1202_v0, %v180_v14  ;;  %v183_v25 = vld [vmem:[%s1207_s20 + $0x48] sm:$0xff]  ;;  %v184_v30 = vld [vmem:[%s1207_s20 + $0x50] sm:$0xff]  ;;  %v185_v35 = vld [vmem:[%s1207_s20 + $0x58] sm:$0xff] }
  0x12   : > { %v319_v20 = vadd.f32 %v1212_v1, %v248_v11  ;;  %v320_v21 = vadd.f32 %v1212_v1, %v249_v12  ;;  %v321_v22 = vadd.f32 %v1212_v1, %v250_v13  ;;  %v252_v23 = vmul.f32 %v1202_v0, %v181_v15  ;;  %v186_v36 = vld [vmem:[%s1207_s20 + $0x60] sm:$0xff]  ;;  %v187_v41 = vld [vmem:[%s1207_s20 + $0x68] sm:$0xff]  ;;  %v188_v42 = vld [vmem:[%s1207_s20 + $0x70] sm:$0xff] }
  0x13   : > { %v380_v26 = vmax.f32 %v316_v16, 0.0  ;;  %v381_v27 = vmax.f32 %v317_v17, 0.0  ;;  %v382_v28 = vmax.f32 %v318_v18, 0.0  ;;  %v322_v29 = vadd.f32 %v1212_v1, %v251_v19  ;;  %v189_v51 = vld [vmem:[%s1207_s20 + $0x78] sm:$0xff]  ;;  %v190_v56 = vld [vmem:[%s1207_s20 + $0x80] sm:$0xff]  ;;  %v191_v61 = vld [vmem:[%s1207_s20 + $0x88] sm:$0xff] }
  0x14   : > { %v383_v31 = vmax.f32 %v319_v20, 0.0  ;;  %v384_v32 = vmax.f32 %v320_v21, 0.0  ;;  %v385_v33 = vmax.f32 %v321_v22, 0.0  ;;  %v323_v34 = vadd.f32 %v1212_v1, %v252_v23  ;;  %v192_v4 = vld [vmem:[%s1207_s20 + $0x90] sm:$0xff]  ;;  %v193_v5 = vld [vmem:[%s1207_s20 + $0x98] sm:$0xff]  ;;  %v194_v10 = vld [vmem:[%s1207_s20 + $0xa0] sm:$0xff] }
  0x15   : > { %v964_v37 = vpack.c.bf16 %v381_v27, %v380_v26  ;;  %v386_v38 = vmax.f32 %v322_v29, 0.0  ;;  %v253_v39 = vmul.f32 %v1202_v0, %v182_v24  ;;  %v254_v40 = vmul.f32 %v1202_v0, %v183_v25  ;;  %v195_v15 = vld [vmem:[%s1207_s20 + $0xa8] sm:$0xff]  ;;  %v196_v20 = vld [vmem:[%s1207_s20 + $0xb0] sm:$0xff]  ;;  %v197_v25 = vld [vmem:[%s1207_s20 + $0xb8] sm:$0xff] }
  0x16   : > { %v969_v43 = vpack.c.bf16 %v383_v31, %v382_v28  ;;  %v974_v44 = vpack.c.bf16 %v385_v33, %v384_v32  ;;  %v387_v45 = vmax.f32 %v323_v34, 0.0  ;;  %v255_v46 = vmul.f32 %v1202_v0, %v184_v30  ;;  %v198_v30 = vld [vmem:[%s1207_s20 + $0xc0] sm:$0xff] }
  0x17   : > { %965 = vst [vmem:[%s1244_s26] sm:$0xff] %v964_v37   ;;  %v324_v47 = vadd.f32 %v1212_v1, %v253_v39  ;;  %v325_v48 = vadd.f32 %v1212_v1, %v254_v40  ;;  %v256_v49 = vmul.f32 %v1202_v0, %v185_v35  ;;  %v257_v50 = vmul.f32 %v1202_v0, %v186_v36  ;;  %v199_v35 = vld [vmem:[%s1207_s20 + $0xc8] sm:$0xff]  ;;  %v200_v40 = vld [vmem:[%s1207_s20 + $0xd0] sm:$0xff] }
  0x18   : > { %1121 = vst [vmem:[%s1244_s26 + $0x8] sm:$0xff] %v969_v43   ;;  %1122 = vst [vmem:[%s1244_s26 + $0x10] sm:$0xff] %v974_v44   ;;  %v979_v52 = vpack.c.bf16 %v387_v45, %v386_v38  ;;  %v326_v53 = vadd.f32 %v1212_v1, %v255_v46  ;;  %v258_v54 = vmul.f32 %v1202_v0, %v187_v41  ;;  %v201_v41 = vld [vmem:[%s1207_s20 + $0xd8] sm:$0xff]  ;;  %v202_v46 = vld [vmem:[%s1207_s20 + $0xe0] sm:$0xff] }
  0x19   : > { %v259_v55 = vmul.f32 %v1202_v0, %v188_v42  ;;  %v388_v57 = vmax.f32 %v324_v47, 0.0  ;;  %v389_v58 = vmax.f32 %v325_v48, 0.0  ;;  %v327_v59 = vadd.f32 %v1212_v1, %v256_v49 }
  0x1a   : > { %v328_v60 = vadd.f32 %v1212_v1, %v257_v50  ;;  %1123 = vst [vmem:[%s1244_s26 + $0x18] sm:$0xff] %v979_v52   ;;  %v390_v62 = vmax.f32 %v326_v53, 0.0  ;;  %v329_v63 = vadd.f32 %v1212_v1, %v258_v54  ;;  %v260_v2 = vmul.f32 %v1202_v0, %v189_v51  ;;  %v203_v51 = vld [vmem:[%s1207_s20 + $0xe8] sm:$0xff] }
  0x1b   : > { %v330_v3 = vadd.f32 %v1212_v1, %v259_v55  ;;  %v984_v6 = vpack.c.bf16 %v389_v58, %v388_v57  ;;  %v391_v7 = vmax.f32 %v327_v59, 0.0  ;;  %v261_v9 = vmul.f32 %v1202_v0, %v190_v56  ;;  %v204_v56 = vld [vmem:[%s1207_s20 + $0xf0] sm:$0xff] }
  0x1c   : > { %v392_v8 = vmax.f32 %v328_v60, 0.0  ;;  %v393_v11 = vmax.f32 %v329_v63, 0.0  ;;  %v331_v12 = vadd.f32 %v1212_v1, %v260_v2  ;;  %v262_v14 = vmul.f32 %v1202_v0, %v191_v61  ;;  %v205_v61 = vld [vmem:[%s1207_s20 + $0xf8] sm:$0xff] }
  0x1d   : > { %v394_v13 = vmax.f32 %v330_v3, 0.0  ;;  %1124 = vst [vmem:[%s1244_s26 + $0x20] sm:$0xff] %v984_v6   ;;  %v989_v16 = vpack.c.bf16 %v391_v7, %v390_v62  ;;  %v332_v17 = vadd.f32 %v1212_v1, %v261_v9  ;;  %v263_v18 = vmul.f32 %v1202_v0, %v192_v4  ;;  %v206_v4 = vld [vmem:[%s1207_s20 + $0x100] sm:$0xff]  ;;  %v207_v9 = vld [vmem:[%s1207_s20 + $0x108] sm:$0xff] }
  0x1e   : > { %v264_v19 = vmul.f32 %v1202_v0, %v193_v5  ;;  %v994_v21 = vpack.c.bf16 %v393_v11, %v392_v8  ;;  %v395_v22 = vmax.f32 %v331_v12, 0.0  ;;  %v333_v23 = vadd.f32 %v1212_v1, %v262_v14  ;;  %v208_v14 = vld [vmem:[%s1207_s20 + $0x110] sm:$0xff] }
  0x1f   : > { %v265_v24 = vmul.f32 %v1202_v0, %v194_v10  ;;  %1125 = vst [vmem:[%s1244_s26 + $0x28] sm:$0xff] %v989_v16   ;;  %v396_v26 = vmax.f32 %v332_v17, 0.0  ;;  %v334_v27 = vadd.f32 %v1212_v1, %v263_v18  ;;  %v266_v29 = vmul.f32 %v1202_v0, %v195_v15  ;;  %v209_v15 = vld [vmem:[%s1207_s20 + $0x118] sm:$0xff] }
  0x20   : > { %v335_v28 = vadd.f32 %v1212_v1, %v264_v19  ;;  %1126 = vst [vmem:[%s1244_s26 + $0x30] sm:$0xff] %v994_v21   ;;  %v999_v31 = vpack.c.bf16 %v395_v22, %v394_v13  ;;  %v397_v32 = vmax.f32 %v333_v23, 0.0  ;;  %v267_v34 = vmul.f32 %v1202_v0, %v196_v20  ;;  %v210_v20 = vld [vmem:[%s1207_s20 + $0x120] sm:$0xff] }
  0x21   : > { %v336_v33 = vadd.f32 %v1212_v1, %v265_v24  ;;  %v398_v36 = vmax.f32 %v334_v27, 0.0  ;;  %v337_v38 = vadd.f32 %v1212_v1, %v266_v29  ;;  %v268_v39 = vmul.f32 %v1202_v0, %v197_v25  ;;  %v211_v25 = vld [vmem:[%s1207_s20 + $0x128] sm:$0xff] }
  0x22   : > { %v399_v37 = vmax.f32 %v335_v28, 0.0  ;;  %1127 = vst [vmem:[%s1244_s26 + $0x38] sm:$0xff] %v999_v31   ;;  %v1004_v42 = vpack.c.bf16 %v397_v32, %v396_v26  ;;  %v338_v44 = vadd.f32 %v1212_v1, %v267_v34  ;;  %v269_v45 = vmul.f32 %v1202_v0, %v198_v30  ;;  %v212_v30 = vld [vmem:[%s1207_s20 + $0x130] sm:$0xff] }
  0x23   : > { %v400_v43 = vmax.f32 %v336_v33, 0.0  ;;  %v401_v48 = vmax.f32 %v337_v38, 0.0  ;;  %v339_v49 = vadd.f32 %v1212_v1, %v268_v39  ;;  %v270_v50 = vmul.f32 %v1202_v0, %v199_v35  ;;  %v213_v35 = vld [vmem:[%s1207_s20 + $0x138] sm:$0xff] }
  0x24   : > { %v1009_v47 = vpack.c.bf16 %v399_v37, %v398_v36  ;;  %1128 = vst [vmem:[%s1244_s26 + $0x40] sm:$0xff] %v1004_v42   ;;  %v402_v52 = vmax.f32 %v338_v44, 0.0  ;;  %v340_v53 = vadd.f32 %v1212_v1, %v269_v45  ;;  %v271_v54 = vmul.f32 %v1202_v0, %v200_v40  ;;  %v214_v40 = vld [vmem:[%s1207_s20 + $0x140] sm:$0xff]  ;;  %v215_v45 = vld [vmem:[%s1207_s20 + $0x148] sm:$0xff] }
  0x25   : > { %v272_v55 = vmul.f32 %v1202_v0, %v201_v41  ;;  %v1014_v57 = vpack.c.bf16 %v401_v48, %v400_v43  ;;  %v403_v58 = vmax.f32 %v339_v49, 0.0  ;;  %v341_v59 = vadd.f32 %v1212_v1, %v270_v50  ;;  %v216_v50 = vld [vmem:[%s1207_s20 + $0x150] sm:$0xff] }
  0x26   : > { %1129 = vst [vmem:[%s1244_s26 + $0x48] sm:$0xff] %v1009_v47   ;;  %v273_v60 = vmul.f32 %v1202_v0, %v202_v46  ;;  %v404_v62 = vmax.f32 %v340_v53, 0.0  ;;  %v342_v63 = vadd.f32 %v1212_v1, %v271_v54  ;;  %v274_v3 = vmul.f32 %v1202_v0, %v203_v51  ;;  %v217_v51 = vld [vmem:[%s1207_s20 + $0x158] sm:$0xff] }
  0x27   : > { %v343_v2 = vadd.f32 %v1212_v1, %v272_v55  ;;  %1130 = vst [vmem:[%s1244_s26 + $0x50] sm:$0xff] %v1014_v57   ;;  %v1019_v5 = vpack.c.bf16 %v403_v58, %v402_v52  ;;  %v405_v6 = vmax.f32 %v341_v59, 0.0  ;;  %v275_v8 = vmul.f32 %v1202_v0, %v204_v56  ;;  %v218_v56 = vld [vmem:[%s1207_s20 + $0x160] sm:$0xff] }
  0x28   : > { %v344_v7 = vadd.f32 %v1212_v1, %v273_v60  ;;  %v406_v10 = vmax.f32 %v342_v63, 0.0  ;;  %v345_v12 = vadd.f32 %v1212_v1, %v274_v3  ;;  %v276_v13 = vmul.f32 %v1202_v0, %v205_v61  ;;  %v219_v61 = vld [vmem:[%s1207_s20 + $0x168] sm:$0xff] }
  0x29   : > { %v407_v11 = vmax.f32 %v343_v2, 0.0  ;;  %1131 = vst [vmem:[%s1244_s26 + $0x58] sm:$0xff] %v1019_v5   ;;  %v1024_v16 = vpack.c.bf16 %v405_v6, %v404_v62  ;;  %v346_v18 = vadd.f32 %v1212_v1, %v275_v8  ;;  %v277_v19 = vmul.f32 %v1202_v0, %v206_v4  ;;  %v220_v4 = vld [vmem:[%s1207_s20 + $0x170] sm:$0xff] }
  0x2a   : > { %v408_v17 = vmax.f32 %v344_v7, 0.0  ;;  %v409_v22 = vmax.f32 %v345_v12, 0.0  ;;  %v347_v23 = vadd.f32 %v1212_v1, %v276_v13  ;;  %v278_v24 = vmul.f32 %v1202_v0, %v207_v9  ;;  %v221_v9 = vld [vmem:[%s1207_s20 + $0x178] sm:$0xff] }
  0x2b   : > { %v1029_v21 = vpack.c.bf16 %v407_v11, %v406_v10  ;;  %1132 = vst [vmem:[%s1244_s26 + $0x60] sm:$0xff] %v1024_v16   ;;  %v410_v26 = vmax.f32 %v346_v18, 0.0  ;;  %v348_v27 = vadd.f32 %v1212_v1, %v277_v19  ;;  %v279_v28 = vmul.f32 %v1202_v0, %v208_v14  ;;  %v222_v14 = vld [vmem:[%s1207_s20 + $0x180] sm:$0xff]  ;;  %v223_v19 = vld [vmem:[%s1207_s20 + $0x188] sm:$0xff] }
  0x2c   : > { %v280_v29 = vmul.f32 %v1202_v0, %v209_v15  ;;  %v1034_v31 = vpack.c.bf16 %v409_v22, %v408_v17  ;;  %v411_v32 = vmax.f32 %v347_v23, 0.0  ;;  %v349_v33 = vadd.f32 %v1212_v1, %v278_v24  ;;  %v224_v24 = vld [vmem:[%s1207_s20 + $0x190] sm:$0xff] }
  0x2d   : > { %1133 = vst [vmem:[%s1244_s26 + $0x68] sm:$0xff] %v1029_v21   ;;  %v281_v34 = vmul.f32 %v1202_v0, %v210_v20  ;;  %v412_v36 = vmax.f32 %v348_v27, 0.0  ;;  %v350_v37 = vadd.f32 %v1212_v1, %v279_v28  ;;  %v282_v39 = vmul.f32 %v1202_v0, %v211_v25  ;;  %v225_v25 = vld [vmem:[%s1207_s20 + $0x198] sm:$0xff] }
  0x2e   : > { %v351_v38 = vadd.f32 %v1212_v1, %v280_v29  ;;  %1134 = vst [vmem:[%s1244_s26 + $0x70] sm:$0xff] %v1034_v31   ;;  %v1039_v41 = vpack.c.bf16 %v411_v32, %v410_v26  ;;  %v413_v42 = vmax.f32 %v349_v33, 0.0  ;;  %v283_v44 = vmul.f32 %v1202_v0, %v212_v30  ;;  %v226_v30 = vld [vmem:[%s1207_s20 + $0x1a0] sm:$0xff] }
  0x2f   : > { %v352_v43 = vadd.f32 %v1212_v1, %v281_v34  ;;  %v414_v46 = vmax.f32 %v350_v37, 0.0  ;;  %v353_v48 = vadd.f32 %v1212_v1, %v282_v39  ;;  %v284_v49 = vmul.f32 %v1202_v0, %v213_v35  ;;  %v227_v35 = vld [vmem:[%s1207_s20 + $0x1a8] sm:$0xff] }
  0x30   : > { %v415_v47 = vmax.f32 %v351_v38, 0.0  ;;  %1135 = vst [vmem:[%s1244_s26 + $0x78] sm:$0xff] %v1039_v41   ;;  %v1044_v52 = vpack.c.bf16 %v413_v42, %v412_v36  ;;  %v354_v54 = vadd.f32 %v1212_v1, %v283_v44  ;;  %v285_v55 = vmul.f32 %v1202_v0, %v214_v40  ;;  %v228_v40 = vld [vmem:[%s1207_s20 + $0x1b0] sm:$0xff] }
  0x31   : > { %v416_v53 = vmax.f32 %v352_v43, 0.0  ;;  %v417_v58 = vmax.f32 %v353_v48, 0.0  ;;  %v355_v59 = vadd.f32 %v1212_v1, %v284_v49  ;;  %v286_v60 = vmul.f32 %v1202_v0, %v215_v45  ;;  %v229_v45 = vld [vmem:[%s1207_s20 + $0x1b8] sm:$0xff] }
  0x32   : > { %v1049_v57 = vpack.c.bf16 %v415_v47, %v414_v46  ;;  %1136 = vst [vmem:[%s1244_s26 + $0x80] sm:$0xff] %v1044_v52   ;;  %v418_v62 = vmax.f32 %v354_v54, 0.0  ;;  %v356_v63 = vadd.f32 %v1212_v1, %v285_v55  ;;  %v287_v2 = vmul.f32 %v1202_v0, %v216_v50  ;;  %v230_v50 = vld [vmem:[%s1207_s20 + $0x1c0] sm:$0xff]  ;;  %v231_v55 = vld [vmem:[%s1207_s20 + $0x1c8] sm:$0xff] }
  0x33   : > { %v288_v3 = vmul.f32 %v1202_v0, %v217_v51  ;;  %v1054_v5 = vpack.c.bf16 %v417_v58, %v416_v53  ;;  %v419_v6 = vmax.f32 %v355_v59, 0.0  ;;  %v357_v7 = vadd.f32 %v1212_v1, %v286_v60  ;;  %v232_v60 = vld [vmem:[%s1207_s20 + $0x1d0] sm:$0xff] }
  0x34   : > { %1137 = vst [vmem:[%s1244_s26 + $0x88] sm:$0xff] %v1049_v57   ;;  %v289_v8 = vmul.f32 %v1202_v0, %v218_v56  ;;  %v420_v10 = vmax.f32 %v356_v63, 0.0  ;;  %v358_v11 = vadd.f32 %v1212_v1, %v287_v2  ;;  %v290_v13 = vmul.f32 %v1202_v0, %v219_v61  ;;  %v233_v61 = vld [vmem:[%s1207_s20 + $0x1d8] sm:$0xff] }
  0x35   : > { %v359_v12 = vadd.f32 %v1212_v1, %v288_v3  ;;  %1138 = vst [vmem:[%s1244_s26 + $0x90] sm:$0xff] %v1054_v5   ;;  %v1059_v15 = vpack.c.bf16 %v419_v6, %v418_v62  ;;  %v421_v16 = vmax.f32 %v357_v7, 0.0  ;;  %v291_v18 = vmul.f32 %v1202_v0, %v220_v4  ;;  %v234_v4 = vld [vmem:[%s1207_s20 + $0x1e0] sm:$0xff] }
  0x36   : > { %v360_v17 = vadd.f32 %v1212_v1, %v289_v8  ;;  %v422_v20 = vmax.f32 %v358_v11, 0.0  ;;  %v361_v22 = vadd.f32 %v1212_v1, %v290_v13  ;;  %v292_v23 = vmul.f32 %v1202_v0, %v221_v9  ;;  %v235_v9 = vld [vmem:[%s1207_s20 + $0x1e8] sm:$0xff] }
  0x37   : > { %v423_v21 = vmax.f32 %v359_v12, 0.0  ;;  %1139 = vst [vmem:[%s1244_s26 + $0x98] sm:$0xff] %v1059_v15   ;;  %v1064_v26 = vpack.c.bf16 %v421_v16, %v420_v10  ;;  %v362_v28 = vadd.f32 %v1212_v1, %v291_v18  ;;  %v293_v29 = vmul.f32 %v1202_v0, %v222_v14  ;;  %v236_v14 = vld [vmem:[%s1207_s20 + $0x1f0] sm:$0xff] }
  0x38   : > { %v424_v27 = vmax.f32 %v360_v17, 0.0  ;;  %v425_v32 = vmax.f32 %v361_v22, 0.0  ;;  %v363_v33 = vadd.f32 %v1212_v1, %v292_v23  ;;  %v294_v34 = vmul.f32 %v1202_v0, %v223_v19  ;;  %v237_v19 = vld [vmem:[%s1207_s20 + $0x1f8] sm:$0xff] }
  0x39   : > { %v1069_v31 = vpack.c.bf16 %v423_v21, %v422_v20  ;;  %1140 = vst [vmem:[%s1244_s26 + $0xa0] sm:$0xff] %v1064_v26   ;;  %v426_v36 = vmax.f32 %v362_v28, 0.0  ;;  %v364_v37 = vadd.f32 %v1212_v1, %v293_v29  ;;  %v295_v38 = vmul.f32 %v1202_v0, %v224_v24 }
  0x3a   : > { %v296_v39 = vmul.f32 %v1202_v0, %v225_v25  ;;  %v1074_v41 = vpack.c.bf16 %v425_v32, %v424_v27  ;;  %v427_v42 = vmax.f32 %v363_v33, 0.0  ;;  %v365_v43 = vadd.f32 %v1212_v1, %v294_v34 }
  0x3b   : > { %1141 = vst [vmem:[%s1244_s26 + $0xa8] sm:$0xff] %v1069_v31   ;;  %v297_v44 = vmul.f32 %v1202_v0, %v226_v30  ;;  %v428_v46 = vmax.f32 %v364_v37, 0.0  ;;  %v366_v47 = vadd.f32 %v1212_v1, %v295_v38  ;;  %v298_v49 = vmul.f32 %v1202_v0, %v227_v35 }
  0x3c   : > { %v367_v48 = vadd.f32 %v1212_v1, %v296_v39  ;;  %1142 = vst [vmem:[%s1244_s26 + $0xb0] sm:$0xff] %v1074_v41   ;;  %v1079_v51 = vpack.c.bf16 %v427_v42, %v426_v36  ;;  %v429_v52 = vmax.f32 %v365_v43, 0.0  ;;  %v299_v54 = vmul.f32 %v1202_v0, %v228_v40 }
  0x3d   : > { %v368_v53 = vadd.f32 %v1212_v1, %v297_v44  ;;  %v430_v56 = vmax.f32 %v366_v47, 0.0  ;;  %v369_v58 = vadd.f32 %v1212_v1, %v298_v49  ;;  %v300_v59 = vmul.f32 %v1202_v0, %v229_v45 }
  0x3e   : > { %v431_v57 = vmax.f32 %v367_v48, 0.0  ;;  %1143 = vst [vmem:[%s1244_s26 + $0xb8] sm:$0xff] %v1079_v51   ;;  %v1084_v62 = vpack.c.bf16 %v429_v52, %v428_v46  ;;  %v370_v2 = vadd.f32 %v1212_v1, %v299_v54  ;;  %v301_v3 = vmul.f32 %v1202_v0, %v230_v50 }
  0x3f   : > { %v432_v63 = vmax.f32 %v368_v53, 0.0  ;;  %v433_v6 = vmax.f32 %v369_v58, 0.0  ;;  %v371_v7 = vadd.f32 %v1212_v1, %v300_v59  ;;  %v302_v8 = vmul.f32 %v1202_v0, %v231_v55 }
  0x40   : > { %v1089_v5 = vpack.c.bf16 %v431_v57, %v430_v56  ;;  %1144 = vst [vmem:[%s1244_s26 + $0xc0] sm:$0xff] %v1084_v62   ;;  %v434_v10 = vmax.f32 %v370_v2, 0.0  ;;  %v372_v11 = vadd.f32 %v1212_v1, %v301_v3  ;;  %v303_v12 = vmul.f32 %v1202_v0, %v232_v60 }
  0x41   : > { %v304_v13 = vmul.f32 %v1202_v0, %v233_v61  ;;  %v1094_v15 = vpack.c.bf16 %v433_v6, %v432_v63  ;;  %v435_v16 = vmax.f32 %v371_v7, 0.0  ;;  %v373_v17 = vadd.f32 %v1212_v1, %v302_v8 }
  0x42   : > { %1145 = vst [vmem:[%s1244_s26 + $0xc8] sm:$0xff] %v1089_v5   ;;  %v305_v18 = vmul.f32 %v1202_v0, %v234_v4  ;;  %v436_v20 = vmax.f32 %v372_v11, 0.0  ;;  %v374_v21 = vadd.f32 %v1212_v1, %v303_v12  ;;  %v306_v23 = vmul.f32 %v1202_v0, %v235_v9 }
  0x43   : > { %v375_v22 = vadd.f32 %v1212_v1, %v304_v13  ;;  %1146 = vst [vmem:[%s1244_s26 + $0xd0] sm:$0xff] %v1094_v15   ;;  %v1099_v24 = vpack.c.bf16 %v435_v16, %v434_v10  ;;  %v437_v25 = vmax.f32 %v373_v17, 0.0  ;;  %v307_v27 = vmul.f32 %v1202_v0, %v236_v14 }
  0x44   : > { %v376_v26 = vadd.f32 %v1212_v1, %v305_v18  ;;  %v438_v28 = vmax.f32 %v374_v21, 0.0  ;;  %v377_v30 = vadd.f32 %v1212_v1, %v306_v23  ;;  %v308_v31 = vmul.f32 %v1202_v0, %v237_v19 }
  0x45   : > { %v439_v29 = vmax.f32 %v375_v22, 0.0  ;;  %1147 = vst [vmem:[%s1244_s26 + $0xd8] sm:$0xff] %v1099_v24   ;;  %v1104_v32 = vpack.c.bf16 %v437_v25, %v436_v20  ;;  %v378_v34 = vadd.f32 %v1212_v1, %v307_v27 }
  0x46   : > { %v440_v33 = vmax.f32 %v376_v26, 0.0  ;;  %v441_v36 = vmax.f32 %v377_v30, 0.0  ;;  %v379_v37 = vadd.f32 %v1212_v1, %v308_v31 }
  0x47   : > { %v1109_v35 = vpack.c.bf16 %v439_v29, %v438_v28  ;;  %1148 = vst [vmem:[%s1244_s26 + $0xe0] sm:$0xff] %v1104_v32   ;;  %v442_v38 = vmax.f32 %v378_v34, 0.0 }
  0x48   : > { %v1114_v39 = vpack.c.bf16 %v441_v36, %v440_v33  ;;  %v443_v40 = vmax.f32 %v379_v37, 0.0 }
  0x49   : > { %1149 = vst [vmem:[%s1244_s26 + $0xe8] sm:$0xff] %v1109_v35  }
  0x4a   : > { %1150 = vst [vmem:[%s1244_s26 + $0xf0] sm:$0xff] %v1114_v39   ;;  %v1119_v41 = vpack.c.bf16 %v443_v40, %v442_v38 }
  0x4c   : > { %1151 = vst [vmem:[%s1244_s26 + $0xf8] sm:$0xff] %v1119_v41  }
  0x4d PF: > { %s13_s12 = sadd.s32 1, %s1166_s12  }
  0x4e   : > { %p10_p4 = scmp.ge.s32.totalorder %s13_s12, 4  }
  0x50   :  { %12 = sbr.rel (!%p10_p4) target bundleno = 1 (0x1), region = 62 }

// kernel: residual_block3d_pallas.4
= control target key start
LH: loop header
LB: loop body
LE: loop exit
PB: predicated region body
PF: predicated region fallthrough
CT: control target
= control target key end

     0   :  { %s1510_s15 = smov 0   ;;  %s1890_s0 = inlined_call_operand.vmem [shape: bf16[1024,108], index: 0, kind: input, shape index: {}]   ;;  %s1891_s1 = inlined_call_operand.vmem [shape: bf16[108,128], index: 1, kind: input, shape index: {}]   ;;  %s1892_s2 = inlined_call_operand.vmem [shape: f32[1024,128], index: 2, kind: output, shape index: {0}]   ;;  %s1893_s3 = inlined_call_operand.vmem [shape: f32[1,128], index: 3, kind: output, shape index: {1}]   ;;  %s1894_s4 = inlined_call_operand.vmem [shape: f32[1,128], index: 4, kind: output, shape index: {2}]  }
   0x1 LB: > { %s1212_s16 = sadd.s32 4294967295, %s1482_s15   ;;  %p1216_p0 = scmp.ge.s32.totalorder %s1482_s15, 1  ;;  %s1482_s15 = sphi %s1510_s15, %s15_s15  }
   0x2   : > { %p158_p1 = scmp.lt.s32.totalorder %s1482_s15, 3 }
   0x4   : > { %p159_p2 = pnand %p1216_p0, %p158_p1 }
   0x5   : > { %s1217_s17 = sshll.u32 (!%p159_p2), %s1212_s16, 6  ;;  %p1221_p4 = scmp.ne.s32.totalorder (!%p159_p2), %s1212_s16, 0 }
   0x6   : > { %162 = sbr.rel (%p159_p2) target bundleno = 389 (0x185), region = 28  ;;  %p185_p3 = scmp.lt.s32.totalorder (!%p159_p2), %s1217_s17, 127 }
   0xb   : > { %s1896_s17 = smov (!%p185_p3, %s1217_s17), 127  ;;  %200 = sbr.rel (%p1221_p4) target bundleno = 18 (0x12), region = 32 }
   0xc   : > { %s1218_s18 = sshll.u32 %s1896_s17, 2  ;;  %s1220_s19 = sshll.u32 %s1896_s17, 3 }
   0xd   : > { %s1521_s22 = scalar_lea.vmem %s1890_s0, %s1218_s18  ;;  %s1526_s25 = scalar_lea.vmem %s1892_s2, %s1220_s19 }
  0x10   : > { %v1484_v0 = vmov 0.0  }
  0x11   : > { %201 = vst [vmem:[%s1893_s3] sm:$0x1] %v1484_v0  ;;  %202 = vst [vmem:[%s1894_s4] sm:$0x1] %v1484_v0 }
  0x12 PF: > { %v1437_v1 = vld [vmem:[%s1891_s1 + $0x30] sm:$0x3f]   ;;  %vm579_vm0 = vcmask 1045504   ;;  %v1438_v2 = vld [vmem:[%s1891_s1 + $0x28] sm:$0xff]   ;;  %v1439_v4 = vld [vmem:[%s1891_s1 + $0x20] sm:$0xff]   ;;  %vm482_vm1 = vcmask 883712  }
  0x13   : > { %1426 = vmatprep.subr.msk.bf16.mxu0 %vm579_vm0, %v1437_v1  ;;  %v581_v3 = vsel %vm579_vm0, %v1437_v1, 0  ;;  %1427 = vmatprep.subr.msk.bf16.mxu1 %vm579_vm0, %v1437_v1  ;;  %v1444_v5 = vld [vmem:[%s1521_s22] sm:$0xff]   ;;  %v1440_v6 = vld [vmem:[%s1891_s1 + $0x18] sm:$0xff]   ;;  %v1441_v7 = vld [vmem:[%s1891_s1 + $0x10] sm:$0xff]  }
  0x14   : > { %1335 = vmatpush3.bf16.msra.mxu0 %v581_v3  ;;  %1419 = vmatpush3.bf16.msra.mxu1 %v581_v3  ;;  %v1442_v8 = vld [vmem:[%s1891_s1 + $0x8] sm:$0xff]   ;;  %v1443_v9 = vld [vmem:[%s1891_s1] sm:$0xff]   ;;  %v1446_v12 = vld [vmem:[%s1521_s22 + $0x10] sm:$0xff]  }
  0x15   : > { %1336 = vmatprep.subr.bf16.mxu0 %v1438_v2  ;;  %1413 = vmatprep.subr.bf16.mxu1 %v1438_v2  ;;  %v1460_v10 = vld [vmem:[%s1521_s22 + $0x80] sm:$0xff]   ;;  %v1445_v11 = vld [vmem:[%s1521_s22 + $0x8] sm:$0xff]   ;;  %v1462_v14 = vld [vmem:[%s1521_s22 + $0x90] sm:$0xff]  }
  0x16   : > { %1348 = vmatprep.mubr.msk.bf16.mxu0 %vm482_vm1, %v1444_v5  ;;  %1380 = vmatprep.mubr.msk.bf16.mxu1 %vm482_vm1, %v1460_v10  ;;  %v1461_v13 = vld [vmem:[%s1521_s22 + $0x88] sm:$0xff]   ;;  %v1447_v15 = vld [vmem:[%s1521_s22 + $0x18] sm:$0xff]   ;;  %v1448_v16 = vld [vmem:[%s1521_s22 + $0x20] sm:$0xff]  }
  0x17   : > { %v1463_v17 = vld [vmem:[%s1521_s22 + $0x98] sm:$0xff]   ;;  %v1464_v18 = vld [vmem:[%s1521_s22 + $0xa0] sm:$0xff]   ;;  %v1449_v19 = vld [vmem:[%s1521_s22 + $0x28] sm:$0xff]  }
  0x18   : > { %1337 = vmatpush3.bf16.msra.mxu0 %v1438_v2  ;;  %1420 = vmatpush3.bf16.msra.mxu1 %v1438_v2  ;;  %v1465_v20 = vld [vmem:[%s1521_s22 + $0xa8] sm:$0xff]   ;;  %v1450_v21 = vld [vmem:[%s1521_s22 + $0x30] sm:$0xff]   ;;  %v1451_v23 = vld [vmem:[%s1521_s22 + $0x38] sm:$0xff]  }
  0x19   : > { %1338 = vmatprep.subr.bf16.mxu0 %v1439_v4  ;;  %1414 = vmatprep.subr.bf16.mxu1 %v1439_v4  ;;  %v1466_v22 = vld [vmem:[%s1521_s22 + $0xb0] sm:$0xff]   ;;  %v1467_v24 = vld [vmem:[%s1521_s22 + $0xb8] sm:$0xff]   ;;  %v1452_v25 = vld [vmem:[%s1521_s22 + $0x40] sm:$0xff]  }
  0x1a   : > { %v1468_v26 = vld [vmem:[%s1521_s22 + $0xc0] sm:$0xff]   ;;  %v1453_v27 = vld [vmem:[%s1521_s22 + $0x48] sm:$0xff]   ;;  %v1454_v29 = vld [vmem:[%s1521_s22 + $0x50] sm:$0xff]  }
  0x1b   : > { %v1469_v28 = vld [vmem:[%s1521_s22 + $0xc8] sm:$0xff]   ;;  %v1470_v30 = vld [vmem:[%s1521_s22 + $0xd0] sm:$0xff]   ;;  %v1455_v31 = vld [vmem:[%s1521_s22 + $0x58] sm:$0xff]  }
  0x1c   : > { %1339 = vmatpush3.bf16.msra.mxu0 %v1439_v4  ;;  %1421 = vmatpush3.bf16.msra.mxu1 %v1439_v4  ;;  %v1471_v32 = vld [vmem:[%s1521_s22 + $0xd8] sm:$0xff]   ;;  %v1456_v33 = vld [vmem:[%s1521_s22 + $0x60] sm:$0xff]   ;;  %v1457_v35 = vld [vmem:[%s1521_s22 + $0x68] sm:$0xff]  }
  0x1d   : > { %1340 = vmatprep.subr.bf16.mxu0 %v1440_v6  ;;  %1415 = vmatprep.subr.bf16.mxu1 %v1440_v6  ;;  %v1472_v34 = vld [vmem:[%s1521_s22 + $0xe0] sm:$0xff]   ;;  %v1473_v36 = vld [vmem:[%s1521_s22 + $0xe8] sm:$0xff]   ;;  %v1458_v37 = vld [vmem:[%s1521_s22 + $0x70] sm:$0xff]  }
  0x1e   : > { %v1474_v38 = vld [vmem:[%s1521_s22 + $0xf0] sm:$0xff]   ;;  %v1459_v39 = vld [vmem:[%s1521_s22 + $0x78] sm:$0xff]  }
  0x1f   : > { %v1475_v40 = vld [vmem:[%s1521_s22 + $0xf8] sm:$0xff]  }
  0x20   : > { %1341 = vmatpush3.bf16.msra.mxu0 %v1440_v6  ;;  %1422 = vmatpush3.bf16.msra.mxu1 %v1440_v6 }
  0x21   : > { %1342 = vmatprep.subr.bf16.mxu0 %v1441_v7  ;;  %1416 = vmatprep.subr.bf16.mxu1 %v1441_v7 }
  0x24   : > { %1343 = vmatpush3.bf16.msra.mxu0 %v1441_v7  ;;  %1423 = vmatpush3.bf16.msra.mxu1 %v1441_v7 }
  0x25   : > { %1344 = vmatprep.subr.bf16.mxu0 %v1442_v8  ;;  %1417 = vmatprep.subr.bf16.mxu1 %v1442_v8 }
  0x28   : > { %1345 = vmatpush3.bf16.msra.mxu0 %v1442_v8  ;;  %1424 = vmatpush3.bf16.msra.mxu1 %v1442_v8 }
  0x29   : > { %1346 = vmatprep.subr.bf16.mxu0 %v1443_v9  ;;  %1418 = vmatprep.subr.bf16.mxu1 %v1443_v9 }
  0x2c   : > { %1347 = vmatpush3.bf16.msra.mxu0 %v1443_v9  ;;  %1425 = vmatpush3.bf16.msra.mxu1 %v1443_v9 }
  0x2f   : > { %1349 = vmatmul.mubr.msk.bf16.vlgmr.msra.gmra.mxu0 %vm482_vm1, %v1445_v11  ;;  %1381 = vmatmul.mubr.msk.bf16.vlgmr.msra.gmra.mxu1 %vm482_vm1, %v1461_v13 }
  0x30   : > { %1352 = vmatprep.mubr.msk.bf16.mxu0 %vm482_vm1, %v1446_v12  ;;  %1384 = vmatprep.mubr.msk.bf16.mxu1 %vm482_vm1, %v1462_v14 }
  0x37   : > { %1353 = vmatmul.mubr.msk.bf16.gmra.mxu0 %vm482_vm1, %v1447_v15  ;;  %1385 = vmatmul.mubr.msk.bf16.gmra.mxu1 %vm482_vm1, %v1463_v17 }
  0x38   : > { %1356 = vmatprep.mubr.msk.bf16.mxu0 %vm482_vm1, %v1448_v16  ;;  %1388 = vmatprep.mubr.msk.bf16.mxu1 %vm482_vm1, %v1464_v18 }
  0x3f   : > { %1357 = vmatmul.mubr.msk.bf16.gmra.mxu0 %vm482_vm1, %v1449_v19  ;;  %1389 = vmatmul.mubr.msk.bf16.gmra.mxu1 %vm482_vm1, %v1465_v20 }
  0x40   : > { %1360 = vmatprep.mubr.msk.bf16.mxu0 %vm482_vm1, %v1450_v21  ;;  %1392 = vmatprep.mubr.msk.bf16.mxu1 %vm482_vm1, %v1466_v22 }
  0x47   : > { %1361 = vmatmul.mubr.msk.bf16.gmra.mxu0 %vm482_vm1, %v1451_v23  ;;  %1393 = vmatmul.mubr.msk.bf16.gmra.mxu1 %vm482_vm1, %v1467_v24 }
  0x48   : > { %1364 = vmatprep.mubr.msk.bf16.mxu0 %vm482_vm1, %v1452_v25  ;;  %1396 = vmatprep.mubr.msk.bf16.mxu1 %vm482_vm1, %v1468_v26 }
  0x4f   : > { %1365 = vmatmul.mubr.msk.bf16.gmra.mxu0 %vm482_vm1, %v1453_v27  ;;  %1397 = vmatmul.mubr.msk.bf16.gmra.mxu1 %vm482_vm1, %v1469_v28 }
  0x50   : > { %1368 = vmatprep.mubr.msk.bf16.mxu0 %vm482_vm1, %v1454_v29  ;;  %1400 = vmatprep.mubr.msk.bf16.mxu1 %vm482_vm1, %v1470_v30 }
  0x57   : > { %1369 = vmatmul.mubr.msk.bf16.gmra.mxu0 %vm482_vm1, %v1455_v31  ;;  %1401 = vmatmul.mubr.msk.bf16.gmra.mxu1 %vm482_vm1, %v1471_v32 }
  0x58   : > { %1372 = vmatprep.mubr.msk.bf16.mxu0 %vm482_vm1, %v1456_v33  ;;  %1404 = vmatprep.mubr.msk.bf16.mxu1 %vm482_vm1, %v1472_v34 }
  0x5f   : > { %1373 = vmatmul.mubr.msk.bf16.gmra.mxu0 %vm482_vm1, %v1457_v35  ;;  %1405 = vmatmul.mubr.msk.bf16.gmra.mxu1 %vm482_vm1, %v1473_v36 }
  0x60   : > { %1376 = vmatprep.mubr.msk.bf16.mxu0 %vm482_vm1, %v1458_v37  ;;  %1408 = vmatprep.mubr.msk.bf16.mxu1 %vm482_vm1, %v1474_v38 }
  0x67   : > { %1377 = vmatmul.mubr.msk.bf16.gmra.mxu0 %vm482_vm1, %v1459_v39  ;;  %1409 = vmatmul.mubr.msk.bf16.gmra.mxu1 %vm482_vm1, %v1475_v40 }
  0xef   : > { %v1350_v41 = vpop.f32.mrf.mxu0  ;;  %v1619_v42 = vpop.f32.mrf.mxu1 }
  0xf0   : > { %874 = vst [vmem:[%s1526_s25 + $0x10] sm:$0xff] %v1350_v41  ;;  %906 = vst [vmem:[%s1526_s25 + $0x110] sm:$0xff] %v1619_v42  ;;  %v1011_v54 = vmul.f32 %v1350_v41, %v1350_v41 }
  0xf1   : > { %v617_v43 = vpop.f32.mrf.mxu0  ;;  %v1624_v44 = vpop.f32.mrf.mxu1 }
  0xf2   : > { %872 = vst [vmem:[%s1526_s25] sm:$0xff] %v617_v43  ;;  %904 = vst [vmem:[%s1526_s25 + $0x100] sm:$0xff] %v1624_v44  ;;  %v1009_v49 = vmul.f32 %v617_v43, %v617_v43 }
  0xf3   : > { %v1351_v45 = vpop.f32.mrf.mxu0  ;;  %v1629_v46 = vpop.f32.mrf.mxu1 }
  0xf4   : > { %875 = vst [vmem:[%s1526_s25 + $0x18] sm:$0xff] %v1351_v45  ;;  %907 = vst [vmem:[%s1526_s25 + $0x118] sm:$0xff] %v1629_v46  ;;  %v1012_v59 = vmul.f32 %v1351_v45, %v1351_v45 }
  0xf5   : > { %v620_v47 = vpop.f32.mrf.mxu0  ;;  %v1634_v48 = vpop.f32.mrf.mxu1 }
  0xf6   : > { %873 = vst [vmem:[%s1526_s25 + $0x8] sm:$0xff] %v620_v47  ;;  %v937_v50 = vadd.f32 %v620_v47, %v617_v43  ;;  %v1010_v51 = vmul.f32 %v620_v47, %v620_v47  ;;  %905 = vst [vmem:[%s1526_s25 + $0x108] sm:$0xff] %v1634_v48 }
  0xf7   : > { %v1354_v52 = vpop.f32.mrf.mxu0  ;;  %v1639_v53 = vpop.f32.mrf.mxu1 }
  0xf8   : > { %v938_v55 = vadd.f32 %v1350_v41, %v937_v50  ;;  %v1073_v56 = vadd.f32 %v1010_v51, %v1009_v49  ;;  %878 = vst [vmem:[%s1526_s25 + $0x30] sm:$0xff] %v1354_v52  ;;  %910 = vst [vmem:[%s1526_s25 + $0x130] sm:$0xff] %v1639_v53  ;;  %v1015_v10 = vmul.f32 %v1354_v52, %v1354_v52 }
  0xf9   : > { %v633_v57 = vpop.f32.mrf.mxu0  ;;  %v1644_v58 = vpop.f32.mrf.mxu1 }
  0xfa   : > { %v1074_v60 = vadd.f32 %v1073_v56, %v1011_v54  ;;  %876 = vst [vmem:[%s1526_s25 + $0x20] sm:$0xff] %v633_v57  ;;  %v939_v61 = vadd.f32 %v1351_v45, %v938_v55  ;;  %908 = vst [vmem:[%s1526_s25 + $0x120] sm:$0xff] %v1644_v58  ;;  %v1013_v1 = vmul.f32 %v633_v57, %v633_v57 }
  0xfb   : > { %v1355_v62 = vpop.f32.mrf.mxu0  ;;  %v1649_v63 = vpop.f32.mrf.mxu1 }
  0xfc   : > { %v940_v0 = vadd.f32 %v939_v61, %v633_v57  ;;  %v1075_v2 = vadd.f32 %v1074_v60, %v1012_v59  ;;  %879 = vst [vmem:[%s1526_s25 + $0x38] sm:$0xff] %v1355_v62  ;;  %911 = vst [vmem:[%s1526_s25 + $0x138] sm:$0xff] %v1649_v63  ;;  %v1016_v15 = vmul.f32 %v1355_v62, %v1355_v62 }
  0xfd   : > { %v636_v3 = vpop.f32.mrf.mxu0  ;;  %v1654_v4 = vpop.f32.mrf.mxu1 }
  0xfe   : > { %v1076_v5 = vadd.f32 %v1075_v2, %v1013_v1  ;;  %877 = vst [vmem:[%s1526_s25 + $0x28] sm:$0xff] %v636_v3  ;;  %v941_v6 = vadd.f32 %v940_v0, %v636_v3  ;;  %v1014_v7 = vmul.f32 %v636_v3, %v636_v3  ;;  %909 = vst [vmem:[%s1526_s25 + $0x128] sm:$0xff] %v1654_v4 }
  0xff   : > { %v1358_v8 = vpop.f32.mrf.mxu0  ;;  %v1659_v9 = vpop.f32.mrf.mxu1 }
 0x100   : > { %v942_v11 = vadd.f32 %v1354_v52, %v941_v6  ;;  %v1077_v12 = vadd.f32 %v1076_v5, %v1014_v7  ;;  %882 = vst [vmem:[%s1526_s25 + $0x50] sm:$0xff] %v1358_v8  ;;  %914 = vst [vmem:[%s1526_s25 + $0x150] sm:$0xff] %v1659_v9  ;;  %v1019_v30 = vmul.f32 %v1358_v8, %v1358_v8 }
 0x101   : > { %v649_v13 = vpop.f32.mrf.mxu0  ;;  %v1664_v14 = vpop.f32.mrf.mxu1 }
 0x102   : > { %v1078_v16 = vadd.f32 %v1077_v12, %v1015_v10  ;;  %880 = vst [vmem:[%s1526_s25 + $0x40] sm:$0xff] %v649_v13  ;;  %v943_v17 = vadd.f32 %v1355_v62, %v942_v11  ;;  %912 = vst [vmem:[%s1526_s25 + $0x140] sm:$0xff] %v1664_v14  ;;  %v1017_v21 = vmul.f32 %v649_v13, %v649_v13 }
 0x103   : > { %v1359_v18 = vpop.f32.mrf.mxu0  ;;  %v1669_v19 = vpop.f32.mrf.mxu1 }
 0x104   : > { %v944_v20 = vadd.f32 %v943_v17, %v649_v13  ;;  %v1079_v22 = vadd.f32 %v1078_v16, %v1016_v15  ;;  %883 = vst [vmem:[%s1526_s25 + $0x58] sm:$0xff] %v1359_v18  ;;  %915 = vst [vmem:[%s1526_s25 + $0x158] sm:$0xff] %v1669_v19  ;;  %v1020_v35 = vmul.f32 %v1359_v18, %v1359_v18 }
 0x105   : > { %v652_v23 = vpop.f32.mrf.mxu0  ;;  %v1674_v24 = vpop.f32.mrf.mxu1 }
 0x106   : > { %v1080_v25 = vadd.f32 %v1079_v22, %v1017_v21  ;;  %881 = vst [vmem:[%s1526_s25 + $0x48] sm:$0xff] %v652_v23  ;;  %v945_v26 = vadd.f32 %v944_v20, %v652_v23  ;;  %v1018_v27 = vmul.f32 %v652_v23, %v652_v23  ;;  %913 = vst [vmem:[%s1526_s25 + $0x148] sm:$0xff] %v1674_v24 }
 0x107   : > { %v1362_v28 = vpop.f32.mrf.mxu0  ;;  %v1679_v29 = vpop.f32.mrf.mxu1 }
 0x108   : > { %v946_v31 = vadd.f32 %v1358_v8, %v945_v26  ;;  %v1081_v32 = vadd.f32 %v1080_v25, %v1018_v27  ;;  %886 = vst [vmem:[%s1526_s25 + $0x70] sm:$0xff] %v1362_v28  ;;  %918 = vst [vmem:[%s1526_s25 + $0x170] sm:$0xff] %v1679_v29  ;;  %v1023_v55 = vmul.f32 %v1362_v28, %v1362_v28 }
 0x109   : > { %v665_v33 = vpop.f32.mrf.mxu0  ;;  %v1684_v34 = vpop.f32.mrf.mxu1 }
 0x10a   : > { %v1082_v36 = vadd.f32 %v1081_v32, %v1019_v30  ;;  %884 = vst [vmem:[%s1526_s25 + $0x60] sm:$0xff] %v665_v33  ;;  %v947_v37 = vadd.f32 %v1359_v18, %v946_v31  ;;  %916 = vst [vmem:[%s1526_s25 + $0x160] sm:$0xff] %v1684_v34  ;;  %v1021_v41 = vmul.f32 %v665_v33, %v665_v33 }
 0x10b   : > { %v1363_v38 = vpop.f32.mrf.mxu0  ;;  %v1689_v39 = vpop.f32.mrf.mxu1 }
 0x10c   : > { %v948_v40 = vadd.f32 %v947_v37, %v665_v33  ;;  %v1083_v43 = vadd.f32 %v1082_v36, %v1020_v35  ;;  %887 = vst [vmem:[%s1526_s25 + $0x78] sm:$0xff] %v1363_v38  ;;  %919 = vst [vmem:[%s1526_s25 + $0x178] sm:$0xff] %v1689_v39  ;;  %v1024_v61 = vmul.f32 %v1363_v38, %v1363_v38 }
 0x10d   : > { %v668_v45 = vpop.f32.mrf.mxu0  ;;  %v1694_v47 = vpop.f32.mrf.mxu1 }
 0x10e   : > { %v1084_v49 = vadd.f32 %v1083_v43, %v1021_v41  ;;  %885 = vst [vmem:[%s1526_s25 + $0x68] sm:$0xff] %v668_v45  ;;  %v949_v50 = vadd.f32 %v948_v40, %v668_v45  ;;  %v1022_v51 = vmul.f32 %v668_v45, %v668_v45  ;;  %917 = vst [vmem:[%s1526_s25 + $0x168] sm:$0xff] %v1694_v47 }
 0x10f   : > { %v1366_v52 = vpop.f32.mrf.mxu0  ;;  %v1699_v54 = vpop.f32.mrf.mxu1 }
 0x110   : > { %v950_v56 = vadd.f32 %v1362_v28, %v949_v50  ;;  %v1085_v57 = vadd.f32 %v1084_v49, %v1022_v51  ;;  %890 = vst [vmem:[%s1526_s25 + $0x90] sm:$0xff] %v1366_v52  ;;  %922 = vst [vmem:[%s1526_s25 + $0x190] sm:$0xff] %v1699_v54  ;;  %v1027_v16 = vmul.f32 %v1366_v52, %v1366_v52 }
 0x111   : > { %v681_v59 = vpop.f32.mrf.mxu0  ;;  %v1704_v60 = vpop.f32.mrf.mxu1 }
 0x112   : > { %v1086_v62 = vadd.f32 %v1085_v57, %v1023_v55  ;;  %888 = vst [vmem:[%s1526_s25 + $0x80] sm:$0xff] %v681_v59  ;;  %v951_v0 = vadd.f32 %v1363_v38, %v950_v56  ;;  %920 = vst [vmem:[%s1526_s25 + $0x180] sm:$0xff] %v1704_v60  ;;  %v1025_v5 = vmul.f32 %v681_v59, %v681_v59 }
 0x113   : > { %v1367_v1 = vpop.f32.mrf.mxu0  ;;  %v1709_v2 = vpop.f32.mrf.mxu1 }
 0x114   : > { %v952_v3 = vadd.f32 %v951_v0, %v681_v59  ;;  %v1087_v6 = vadd.f32 %v1086_v62, %v1024_v61  ;;  %891 = vst [vmem:[%s1526_s25 + $0x98] sm:$0xff] %v1367_v1  ;;  %923 = vst [vmem:[%s1526_s25 + $0x198] sm:$0xff] %v1709_v2  ;;  %v1028_v22 = vmul.f32 %v1367_v1, %v1367_v1 }
 0x115   : > { %v684_v7 = vpop.f32.mrf.mxu0  ;;  %v1714_v8 = vpop.f32.mrf.mxu1 }
 0x116   : > { %v1088_v10 = vadd.f32 %v1087_v6, %v1025_v5  ;;  %889 = vst [vmem:[%s1526_s25 + $0x88] sm:$0xff] %v684_v7  ;;  %v953_v11 = vadd.f32 %v952_v3, %v684_v7  ;;  %v1026_v12 = vmul.f32 %v684_v7, %v684_v7  ;;  %921 = vst [vmem:[%s1526_s25 + $0x188] sm:$0xff] %v1714_v8 }
 0x117   : > { %v1370_v13 = vpop.f32.mrf.mxu0  ;;  %v1719_v15 = vpop.f32.mrf.mxu1 }
 0x118   : > { %v954_v17 = vadd.f32 %v1366_v52, %v953_v11  ;;  %v1089_v18 = vadd.f32 %v1088_v10, %v1026_v12  ;;  %894 = vst [vmem:[%s1526_s25 + $0xb0] sm:$0xff] %v1370_v13  ;;  %926 = vst [vmem:[%s1526_s25 + $0x1b0] sm:$0xff] %v1719_v15  ;;  %v1031_v41 = vmul.f32 %v1370_v13, %v1370_v13 }
 0x119   : > { %v697_v20 = vpop.f32.mrf.mxu0  ;;  %v1724_v21 = vpop.f32.mrf.mxu1 }
 0x11a   : > { %v1090_v23 = vadd.f32 %v1089_v18, %v1027_v16  ;;  %892 = vst [vmem:[%s1526_s25 + $0xa0] sm:$0xff] %v697_v20  ;;  %v955_v25 = vadd.f32 %v1367_v1, %v954_v17  ;;  %924 = vst [vmem:[%s1526_s25 + $0x1a0] sm:$0xff] %v1724_v21  ;;  %v1029_v30 = vmul.f32 %v697_v20, %v697_v20 }
 0x11b   : > { %v1371_v26 = vpop.f32.mrf.mxu0  ;;  %v1729_v27 = vpop.f32.mrf.mxu1 }
 0x11c   : > { %v956_v28 = vadd.f32 %v955_v25, %v697_v20  ;;  %v1091_v31 = vadd.f32 %v1090_v23, %v1028_v22  ;;  %895 = vst [vmem:[%s1526_s25 + $0xb8] sm:$0xff] %v1371_v26  ;;  %927 = vst [vmem:[%s1526_s25 + $0x1b8] sm:$0xff] %v1729_v27  ;;  %v1032_v51 = vmul.f32 %v1371_v26, %v1371_v26 }
 0x11d   : > { %v700_v32 = vpop.f32.mrf.mxu0  ;;  %v1734_v33 = vpop.f32.mrf.mxu1 }
 0x11e   : > { %v1092_v35 = vadd.f32 %v1091_v31, %v1029_v30  ;;  %893 = vst [vmem:[%s1526_s25 + $0xa8] sm:$0xff] %v700_v32  ;;  %v957_v36 = vadd.f32 %v956_v28, %v700_v32  ;;  %v1030_v37 = vmul.f32 %v700_v32, %v700_v32  ;;  %925 = vst [vmem:[%s1526_s25 + $0x1a8] sm:$0xff] %v1734_v33 }
 0x11f   : > { %v1374_v38 = vpop.f32.mrf.mxu0  ;;  %v1739_v40 = vpop.f32.mrf.mxu1 }
 0x120   : > { %v958_v43 = vadd.f32 %v1370_v13, %v957_v36  ;;  %v1093_v45 = vadd.f32 %v1092_v35, %v1030_v37  ;;  %898 = vst [vmem:[%s1526_s25 + $0xd0] sm:$0xff] %v1374_v38  ;;  %930 = vst [vmem:[%s1526_s25 + $0x1d0] sm:$0xff] %v1739_v40  ;;  %v1035_v11 = vmul.f32 %v1374_v38, %v1374_v38 }
 0x121   : > { %v713_v49 = vpop.f32.mrf.mxu0  ;;  %v1744_v50 = vpop.f32.mrf.mxu1 }
 0x122   : > { %v1094_v52 = vadd.f32 %v1093_v45, %v1031_v41  ;;  %896 = vst [vmem:[%s1526_s25 + $0xc0] sm:$0xff] %v713_v49  ;;  %v959_v55 = vadd.f32 %v1371_v26, %v958_v43  ;;  %928 = vst [vmem:[%s1526_s25 + $0x1c0] sm:$0xff] %v1744_v50  ;;  %v1033_v61 = vmul.f32 %v713_v49, %v713_v49 }
 0x123   : > { %v1375_v56 = vpop.f32.mrf.mxu0  ;;  %v1749_v57 = vpop.f32.mrf.mxu1 }
 0x124   : > { %v960_v59 = vadd.f32 %v959_v55, %v713_v49  ;;  %v1095_v62 = vadd.f32 %v1094_v52, %v1032_v51  ;;  %899 = vst [vmem:[%s1526_s25 + $0xd8] sm:$0xff] %v1375_v56  ;;  %931 = vst [vmem:[%s1526_s25 + $0x1d8] sm:$0xff] %v1749_v57  ;;  %v1036_v18 = vmul.f32 %v1375_v56, %v1375_v56 }
 0x125   : > { %v716_v0 = vpop.f32.mrf.mxu0  ;;  %v1754_v1 = vpop.f32.mrf.mxu1  ;;  %v1041_v52 = vmul.f32 %v1624_v44, %v1624_v44 }
 0x126   : > { %v1096_v3 = vadd.f32 %v1095_v62, %v1033_v61  ;;  %897 = vst [vmem:[%s1526_s25 + $0xc8] sm:$0xff] %v716_v0  ;;  %v961_v5 = vadd.f32 %v960_v59, %v716_v0  ;;  %v1034_v6 = vmul.f32 %v716_v0, %v716_v0  ;;  %929 = vst [vmem:[%s1526_s25 + $0x1c8] sm:$0xff] %v1754_v1 }
 0x127   : > { %v1378_v7 = vpop.f32.mrf.mxu0  ;;  %v1759_v10 = vpop.f32.mrf.mxu1  ;;  %v1042_v61 = vmul.f32 %v1634_v48, %v1634_v48  ;;  %v1043_v0 = vmul.f32 %v1619_v42, %v1619_v42 }
 0x128   : > { %v962_v12 = vadd.f32 %v1374_v38, %v961_v5  ;;  %v1097_v13 = vadd.f32 %v1096_v3, %v1034_v6  ;;  %902 = vst [vmem:[%s1526_s25 + $0xf0] sm:$0xff] %v1378_v7  ;;  %934 = vst [vmem:[%s1526_s25 + $0x1f0] sm:$0xff] %v1759_v10  ;;  %v1039_v38 = vmul.f32 %v1378_v7, %v1378_v7 }
 0x129   : > { %v729_v16 = vpop.f32.mrf.mxu0  ;;  %v1764_v17 = vpop.f32.mrf.mxu1  ;;  %v1044_v6 = vmul.f32 %v1629_v46, %v1629_v46 }
 0x12a   : > { %v1098_v20 = vadd.f32 %v1097_v13, %v1035_v11  ;;  %900 = vst [vmem:[%s1526_s25 + $0xe0] sm:$0xff] %v729_v16  ;;  %v963_v22 = vadd.f32 %v1375_v56, %v962_v12  ;;  %932 = vst [vmem:[%s1526_s25 + $0x1e0] sm:$0xff] %v1764_v17  ;;  %v1037_v28 = vmul.f32 %v729_v16, %v729_v16 }
 0x12b   : > { %v1379_v23 = vpop.f32.mrf.mxu0  ;;  %v1769_v25 = vpop.f32.mrf.mxu1  ;;  %v1045_v12 = vmul.f32 %v1644_v58, %v1644_v58 }
 0x12c   : > { %v964_v26 = vadd.f32 %v963_v22, %v729_v16  ;;  %v1099_v30 = vadd.f32 %v1098_v20, %v1036_v18  ;;  %903 = vst [vmem:[%s1526_s25 + $0xf8] sm:$0xff] %v1379_v23  ;;  %935 = vst [vmem:[%s1526_s25 + $0x1f8] sm:$0xff] %v1769_v25  ;;  %v1040_v45 = vmul.f32 %v1379_v23, %v1379_v23 }
 0x12d   : > { %v732_v31 = vpop.f32.mrf.mxu0  ;;  %v1774_v32 = vpop.f32.mrf.mxu1  ;;  %v1046_v18 = vmul.f32 %v1654_v4, %v1654_v4 }
 0x12e   : > { %v1100_v35 = vadd.f32 %v1099_v30, %v1037_v28  ;;  %901 = vst [vmem:[%s1526_s25 + $0xe8] sm:$0xff] %v732_v31  ;;  %v965_v36 = vadd.f32 %v964_v26, %v732_v31  ;;  %v1038_v37 = vmul.f32 %v732_v31, %v732_v31  ;;  %933 = vst [vmem:[%s1526_s25 + $0x1e8] sm:$0xff] %v1774_v32 }
 0x12f   : > { %v1049_v28 = vmul.f32 %v1664_v14, %v1664_v14 }
 0x130   : > { %v966_v41 = vadd.f32 %v1378_v7, %v965_v36  ;;  %v1101_v43 = vadd.f32 %v1100_v35, %v1038_v37  ;;  %v1050_v35 = vmul.f32 %v1674_v24, %v1674_v24 }
 0x132   : > { %v967_v49 = vadd.f32 %v1379_v23, %v966_v41  ;;  %v1102_v51 = vadd.f32 %v1101_v43, %v1039_v38  ;;  %v1053_v43 = vmul.f32 %v1684_v34, %v1684_v34 }
 0x134   : > { %v1103_v55 = vadd.f32 %v1102_v51, %v1040_v45  ;;  %v968_v56 = vadd.f32 %v967_v49, %v1624_v44  ;;  %v1054_v51 = vmul.f32 %v1694_v47, %v1694_v47 }
 0x136   : > { %v969_v59 = vadd.f32 %v968_v56, %v1634_v48  ;;  %v1104_v62 = vadd.f32 %v1103_v55, %v1041_v52 }
 0x138   : > { %v970_v3 = vadd.f32 %v1619_v42, %v969_v59  ;;  %v1105_v5 = vadd.f32 %v1104_v62, %v1042_v61  ;;  %v1047_v42 = vmul.f32 %v1639_v53, %v1639_v53  ;;  %v1057_v61 = vmul.f32 %v1704_v60, %v1704_v60 }
 0x13a   : > { %v1106_v7 = vadd.f32 %v1105_v5, %v1043_v0  ;;  %v971_v11 = vadd.f32 %v1629_v46, %v970_v3  ;;  %v1048_v46 = vmul.f32 %v1649_v63, %v1649_v63  ;;  %v1058_v3 = vmul.f32 %v1714_v8, %v1714_v8 }
 0x13c   : > { %v972_v44 = vadd.f32 %v971_v11, %v1644_v58  ;;  %v1107_v13 = vadd.f32 %v1106_v7, %v1044_v6 }
 0x13e   : > { %v1108_v48 = vadd.f32 %v1107_v13, %v1045_v12  ;;  %v973_v16 = vadd.f32 %v972_v44, %v1654_v4  ;;  %v1061_v44 = vmul.f32 %v1724_v21, %v1724_v21 }
 0x140   : > { %v974_v20 = vadd.f32 %v1639_v53, %v973_v16  ;;  %v1109_v22 = vadd.f32 %v1108_v48, %v1046_v18  ;;  %v1051_v53 = vmul.f32 %v1659_v9, %v1659_v9  ;;  %v1062_v48 = vmul.f32 %v1734_v33, %v1734_v33 }
 0x142   : > { %v1110_v23 = vadd.f32 %v1109_v22, %v1047_v42  ;;  %v975_v26 = vadd.f32 %v1649_v63, %v974_v20  ;;  %v1052_v63 = vmul.f32 %v1669_v19, %v1669_v19  ;;  %v1065_v22 = vmul.f32 %v1744_v50, %v1744_v50 }
 0x144   : > { %v976_v58 = vadd.f32 %v975_v26, %v1664_v14  ;;  %v1111_v30 = vadd.f32 %v1110_v23, %v1048_v46  ;;  %v1066_v26 = vmul.f32 %v1754_v1, %v1754_v1 }
 0x146   : > { %v1112_v31 = vadd.f32 %v1111_v30, %v1049_v28  ;;  %v977_v4 = vadd.f32 %v976_v58, %v1674_v24 }
 0x148   : > { %v978_v36 = vadd.f32 %v1659_v9, %v977_v4  ;;  %v1113_v37 = vadd.f32 %v1112_v31, %v1050_v35  ;;  %v1055_v9 = vmul.f32 %v1679_v29, %v1679_v29  ;;  %v1069_v4 = vmul.f32 %v1764_v17, %v1764_v17 }
 0x14a   : > { %v1114_v38 = vadd.f32 %v1113_v37, %v1051_v53  ;;  %v979_v41 = vadd.f32 %v1669_v19, %v978_v36  ;;  %v1056_v19 = vmul.f32 %v1689_v39, %v1689_v39  ;;  %v1070_v36 = vmul.f32 %v1774_v32, %v1774_v32 }
 0x14c   : > { %v980_v14 = vadd.f32 %v979_v41, %v1684_v34  ;;  %v1115_v45 = vadd.f32 %v1114_v38, %v1052_v63 }
 0x14e   : > { %v1116_v49 = vadd.f32 %v1115_v45, %v1053_v43  ;;  %v981_v24 = vadd.f32 %v980_v14, %v1694_v47 }
 0x150   : > { %v982_v52 = vadd.f32 %v1679_v29, %v981_v24  ;;  %v1117_v55 = vadd.f32 %v1116_v49, %v1054_v51  ;;  %v1059_v29 = vmul.f32 %v1699_v54, %v1699_v54 }
 0x152   : > { %v1118_v56 = vadd.f32 %v1117_v55, %v1055_v9  ;;  %v983_v59 = vadd.f32 %v1689_v39, %v982_v52  ;;  %v1060_v39 = vmul.f32 %v1709_v2, %v1709_v2 }
 0x154   : > { %v984_v34 = vadd.f32 %v983_v59, %v1704_v60  ;;  %v1119_v62 = vadd.f32 %v1118_v56, %v1056_v19 }
 0x156   : > { %v1120_v0 = vadd.f32 %v1119_v62, %v1057_v61  ;;  %v985_v47 = vadd.f32 %v984_v34, %v1714_v8 }
 0x158   : > { %v986_v5 = vadd.f32 %v1699_v54, %v985_v47  ;;  %v1121_v6 = vadd.f32 %v1120_v0, %v1058_v3  ;;  %v1063_v54 = vmul.f32 %v1719_v15, %v1719_v15 }
 0x15a   : > { %v1122_v7 = vadd.f32 %v1121_v6, %v1059_v29  ;;  %v987_v11 = vadd.f32 %v1709_v2, %v986_v5  ;;  %v1064_v2 = vmul.f32 %v1729_v27, %v1729_v27 }
 0x15c   : > { %v988_v60 = vadd.f32 %v987_v11, %v1724_v21  ;;  %v1123_v12 = vadd.f32 %v1122_v7, %v1060_v39 }
 0x15e   : > { %v1124_v13 = vadd.f32 %v1123_v12, %v1061_v44  ;;  %v989_v8 = vadd.f32 %v988_v60, %v1734_v33 }
 0x160   : > { %v990_v16 = vadd.f32 %v1719_v15, %v989_v8  ;;  %v1125_v18 = vadd.f32 %v1124_v13, %v1062_v48  ;;  %v1067_v15 = vmul.f32 %v1739_v40, %v1739_v40 }
 0x162   : > { %v1126_v42 = vadd.f32 %v1125_v18, %v1063_v54  ;;  %v991_v20 = vadd.f32 %v1729_v27, %v990_v16  ;;  %v1068_v27 = vmul.f32 %v1749_v57, %v1749_v57 }
 0x164   : > { %v992_v21 = vadd.f32 %v991_v20, %v1744_v50  ;;  %v1127_v46 = vadd.f32 %v1126_v42, %v1064_v2 }
 0x166   : > { %v1128_v23 = vadd.f32 %v1127_v46, %v1065_v22  ;;  %v993_v33 = vadd.f32 %v992_v21, %v1754_v1 }
 0x168   : > { %v994_v58 = vadd.f32 %v1739_v40, %v993_v33  ;;  %v1129_v28 = vadd.f32 %v1128_v23, %v1066_v26  ;;  %v1071_v40 = vmul.f32 %v1759_v10, %v1759_v10 }
 0x16a   : > { %v1130_v30 = vadd.f32 %v1129_v28, %v1067_v15  ;;  %v995_v31 = vadd.f32 %v1749_v57, %v994_v58  ;;  %v1072_v57 = vmul.f32 %v1769_v25, %v1769_v25 }
 0x16c   : > { %v996_v50 = vadd.f32 %v995_v31, %v1764_v17  ;;  %v1131_v35 = vadd.f32 %v1130_v30, %v1068_v27 }
 0x16e   : > { %v1132_v53 = vadd.f32 %v1131_v35, %v1069_v4  ;;  %v997_v1 = vadd.f32 %v996_v50, %v1774_v32 }
 0x170   : > { %v998_v37 = vadd.f32 %v1759_v10, %v997_v1  ;;  %v1133_v63 = vadd.f32 %v1132_v53, %v1070_v36  ;;  %v936_v10 = vld [vmem:[%s1893_s3] sm:$0x1] }
 0x172   : > { %v999_v38 = vadd.f32 %v1769_v25, %v998_v37  ;;  %v1134_v41 = vadd.f32 %v1133_v63, %v1071_v40  ;;  %v1008_v25 = vld [vmem:[%s1894_s4] sm:$0x1] }
 0x174   : > { %v1000_v17 = vrot.slane %v999_v38, 4  ;;  %v1135_v14 = vadd.f32 %v1134_v41, %v1072_v57 }
 0x176   : > { %v1001_v43 = vadd.f32 %v1000_v17, %v999_v38  ;;  %v1136_v45 = vrot.slane %v1135_v14, 4 }
 0x178   : > { %v1002_v49 = vrot.slane %v1001_v43, 2  ;;  %v1137_v24 = vadd.f32 %v1136_v45, %v1135_v14 }
 0x17a   : > { %v1003_v51 = vadd.f32 %v1002_v49, %v1001_v43  ;;  %v1138_v32 = vrot.slane %v1137_v24, 2 }
 0x17c   : > { %v1004_v9 = vrot.slane %v1003_v51, 1  ;;  %v1139_v52 = vadd.f32 %v1138_v32, %v1137_v24 }
 0x17e   : > { %v1005_v55 = vadd.f32 %v1004_v9, %v1003_v51  ;;  %v1140_v19 = vrot.slane %v1139_v52, 1 }
 0x180   : > { %v1006_v56 = vadd.f32 %v1005_v55, %v936_v10  ;;  %v1141_v59 = vadd.f32 %v1140_v19, %v1139_v52 }
 0x182   : > { %1007 = vst [vmem:[%s1893_s3] sm:$0x1] %v1006_v56  ;;  %v1142_v34 = vadd.f32 %v1141_v59, %v1008_v25 }
 0x184   : > { %1143 = vst [vmem:[%s1894_s4] sm:$0x1] %v1142_v34 }
 0x185 PF: > { %s15_s15 = sadd.s32 1, %s1482_s15  }
 0x186   : > { %p12_p5 = scmp.ge.s32.totalorder %s15_s15, 4  }
 0x188   :  { %14 = sbr.rel (!%p12_p5) target bundleno = 1 (0x1), region = 78 }

// kernel: residual_block3d_pallas.6
= control target key start
LH: loop header
LB: loop body
LE: loop exit
PB: predicated region body
PF: predicated region fallthrough
CT: control target
= control target key end

     0   :  { %s2187_s15 = smov 0   ;;  %s3230_s0 = inlined_call_operand.vmem [shape: bf16[1024,220], index: 0, kind: input, shape index: {}]   ;;  %s3231_s1 = inlined_call_operand.vmem [shape: bf16[220,256], index: 1, kind: input, shape index: {}]   ;;  %s3232_s2 = inlined_call_operand.vmem [shape: f32[1024,256], index: 2, kind: output, shape index: {0}]   ;;  %s3233_s3 = inlined_call_operand.vmem [shape: f32[1,256], index: 3, kind: output, shape index: {1}]   ;;  %s3234_s4 = inlined_call_operand.vmem [shape: f32[1,256], index: 4, kind: output, shape index: {2}]  }
   0x1 LB: > { %s1835_s16 = sadd.s32 4294967295, %s2158_s15   ;;  %p1839_p0 = scmp.ge.s32.totalorder %s2158_s15, 1  ;;  %s2158_s15 = sphi %s2187_s15, %s15_s15  }
   0x2   : > { %p159_p1 = scmp.lt.s32.totalorder %s2158_s15, 3 }
   0x4   : > { %p160_p2 = pnand %p1839_p0, %p159_p1 }
   0x6   : > { %163 = sbr.rel (%p160_p2) target bundleno = 487 (0x1e7), region = 28 }
   0xb   : > { %s1840_s17 = sshll.u32 %s1835_s16, 6  ;;  %p1846_p4 = scmp.ne.s32.totalorder %s1835_s16, 0 }
   0xc   : > { %p188_p3 = scmp.lt.s32.totalorder %s1840_s17, 127 }
   0xd   : > { %205 = sbr.rel (%p1846_p4) target bundleno = 22 (0x16), region = 32 }
   0xe   : > { %s3320_s17 = smov (!%p188_p3, %s1840_s17), 127 }
   0xf   : > { %s1974_s18 = sshll.u32 %s3320_s17, 3  ;;  %s1975_s19 = sshll.u32 %s3320_s17, 4 }
  0x10   : > { %s2198_s22 = scalar_lea.vmem %s3230_s0, %s1974_s18  ;;  %s2203_s25 = scalar_lea.vmem %s3232_s2, %s1975_s19 }
  0x12   : > { %v206_v0 = vlaneseq  ;;  %v2160_v1 = vmov 0.0  }
  0x14   : > { %vm208_vm0 = vcmp.lt.s32.totalorder %v206_v0, 256 }
  0x15   : > { %210 = vst.msk [vmem:[%s3233_s3] sm:$0x3] %vm208_vm0, %v2160_v1  ;;  %211 = vst.msk [vmem:[%s3234_s4] sm:$0x3] %vm208_vm0, %v2160_v1 }
  0x16 PF: > { %v2014_v2 = vld [vmem:[%s3231_s1 + $0x74] ss:$8 sps:$4 sm:$0xff]   ;;  %v2016_v3 = vld [vmem:[%s3231_s1 + $0x70] ss:$8 sps:$4 sm:$0xff]   ;;  %v2017_v4 = vld [vmem:[%s3231_s1 + $0x64] ss:$8 sps:$4 sm:$0xff]  }
  0x17   : > { %834 = vmatprep.subr.bf16.mxu0 %v2014_v2  ;;  %1976 = vmatprep.subr.bf16.mxu1 %v2014_v2  ;;  %v2019_v5 = vld [vmem:[%s3231_s1 + $0x60] ss:$8 sps:$4 sm:$0xff]   ;;  %v2020_v6 = vld [vmem:[%s3231_s1 + $0x54] ss:$8 sps:$4 sm:$0xff]   ;;  %v2022_v7 = vld [vmem:[%s3231_s1 + $0x50] ss:$8 sps:$4 sm:$0xff]  }
  0x18   : > { %835 = vmatpush1.bf16.msra.mxu0 %v2016_v3  ;;  %1990 = vmatpush1.bf16.msra.mxu1 %v2016_v3  ;;  %v2023_v8 = vld [vmem:[%s3231_s1 + $0x44] ss:$8 sps:$4 sm:$0xff]   ;;  %v2025_v9 = vld [vmem:[%s3231_s1 + $0x40] ss:$8 sps:$4 sm:$0xff]   ;;  %v2026_v10 = vld [vmem:[%s3231_s1 + $0x34] ss:$8 sps:$4 sm:$0xff]  }
  0x19   : > { %836 = vmatprep.subr.bf16.mxu0 %v2017_v4  ;;  %1977 = vmatprep.subr.bf16.mxu1 %v2017_v4  ;;  %v2028_v11 = vld [vmem:[%s3231_s1 + $0x30] ss:$8 sps:$4 sm:$0xff]   ;;  %v2029_v12 = vld [vmem:[%s3231_s1 + $0x24] ss:$8 sps:$4 sm:$0xff]   ;;  %vm730_vm1 = vcmask 752640   ;;  %vm827_vm2 = vcmask 1045504  }
  0x1a   : > { %v2031_v13 = vld [vmem:[%s3231_s1 + $0x20] ss:$8 sps:$4 sm:$0xff]   ;;  %v2058_v14 = vld [vmem:[%s2198_s22 + $0x4] ss:$8 sps:$4 sm:$0xff]   ;;  %v2032_v15 = vld [vmem:[%s3231_s1 + $0x14] ss:$8 sps:$4 sm:$0xff]  }
  0x1b   : > { %1940 = vmatprep.mubr.msk.bf16.mxu0 %vm730_vm1, %v2058_v14  ;;  %v2034_v16 = vld [vmem:[%s3231_s1 + $0x10] ss:$8 sps:$4 sm:$0xff]   ;;  %v2035_v17 = vld [vmem:[%s3231_s1 + $0x4] ss:$8 sps:$4 sm:$0xff]   ;;  %v2037_v18 = vld [vmem:[%s3231_s1] ss:$8 sps:$4 sm:$0xff]  }
  0x1c   : > { %837 = vmatpush1.bf16.msra.mxu0 %v2019_v5  ;;  %1991 = vmatpush1.bf16.msra.mxu1 %v2019_v5  ;;  %v2038_v19 = vld [vmem:[%s3231_s1 + $0xd4] ss:$8 sps:$4 sm:$0x3f]   ;;  %v2040_v20 = vld [vmem:[%s3231_s1 + $0xd0] ss:$8 sps:$4 sm:$0x3f]  }
  0x1d   : > { %838 = vmatprep.subr.bf16.mxu0 %v2020_v6  ;;  %1978 = vmatprep.subr.bf16.mxu1 %v2020_v6  ;;  %v2082_v21 = vld [vmem:[%s2198_s22 + $0x104] ss:$8 sps:$4 sm:$0xff]   ;;  %v829_v22 = vsel %vm827_vm2, %v2040_v20, 0  ;;  %v2043_v24 = vld [vmem:[%s3231_s1 + $0xc0] ss:$8 sps:$4 sm:$0xff]  }
  0x1e   : > { %v2041_v23 = vld [vmem:[%s3231_s1 + $0xc4] ss:$8 sps:$4 sm:$0xff]   ;;  %1956 = vmatprep.mubr.msk.bf16.mxu1 %vm730_vm1, %v2082_v21  ;;  %v2044_v25 = vld [vmem:[%s3231_s1 + $0xb4] ss:$8 sps:$4 sm:$0xff]   ;;  %v2046_v26 = vld [vmem:[%s3231_s1 + $0xb0] ss:$8 sps:$4 sm:$0xff]  }
  0x1f   : > { %v2047_v27 = vld [vmem:[%s3231_s1 + $0xa4] ss:$8 sps:$4 sm:$0xff]   ;;  %v2049_v28 = vld [vmem:[%s3231_s1 + $0xa0] ss:$8 sps:$4 sm:$0xff]   ;;  %v2050_v29 = vld [vmem:[%s3231_s1 + $0x94] ss:$8 sps:$4 sm:$0xff]  }
  0x20   : > { %839 = vmatpush1.bf16.msra.mxu0 %v2022_v7  ;;  %1992 = vmatpush1.bf16.msra.mxu1 %v2022_v7  ;;  %v2052_v30 = vld [vmem:[%s3231_s1 + $0x90] ss:$8 sps:$4 sm:$0xff]   ;;  %v2053_v31 = vld [vmem:[%s3231_s1 + $0x84] ss:$8 sps:$4 sm:$0xff]   ;;  %v2055_v32 = vld [vmem:[%s3231_s1 + $0x80] ss:$8 sps:$4 sm:$0xff]  }
  0x21   : > { %840 = vmatprep.subr.bf16.mxu0 %v2023_v8  ;;  %1979 = vmatprep.subr.bf16.mxu1 %v2023_v8  ;;  %v2056_v33 = vld [vmem:[%s2198_s22] ss:$8 sps:$4 sm:$0xff]   ;;  %v2059_v35 = vld [vmem:[%s2198_s22 + $0x14] ss:$8 sps:$4 sm:$0xff]   ;;  %v2061_v37 = vld [vmem:[%s2198_s22 + $0x10] ss:$8 sps:$4 sm:$0xff]  }
  0x22   : > { %v2080_v34 = vld [vmem:[%s2198_s22 + $0x100] ss:$8 sps:$4 sm:$0xff]   ;;  %v2086_v36 = vld [vmem:[%s2198_s22 + $0x114] ss:$8 sps:$4 sm:$0xff]   ;;  %v2088_v38 = vld [vmem:[%s2198_s22 + $0x110] ss:$8 sps:$4 sm:$0xff]  }
  0x23   : > { %v2062_v39 = vld [vmem:[%s2198_s22 + $0x24] ss:$8 sps:$4 sm:$0xff]   ;;  %v2064_v41 = vld [vmem:[%s2198_s22 + $0x20] ss:$8 sps:$4 sm:$0xff]   ;;  %v2065_v43 = vld [vmem:[%s2198_s22 + $0x34] ss:$8 sps:$4 sm:$0xff]  }
  0x24   : > { %841 = vmatpush1.bf16.msra.mxu0 %v2025_v9  ;;  %1993 = vmatpush1.bf16.msra.mxu1 %v2025_v9  ;;  %v2092_v40 = vld [vmem:[%s2198_s22 + $0x124] ss:$8 sps:$4 sm:$0xff]   ;;  %v2094_v42 = vld [vmem:[%s2198_s22 + $0x120] ss:$8 sps:$4 sm:$0xff]   ;;  %v2098_v44 = vld [vmem:[%s2198_s22 + $0x134] ss:$8 sps:$4 sm:$0xff]  }
  0x25   : > { %842 = vmatprep.subr.bf16.mxu0 %v2026_v10  ;;  %1980 = vmatprep.subr.bf16.mxu1 %v2026_v10  ;;  %v2067_v45 = vld [vmem:[%s2198_s22 + $0x30] ss:$8 sps:$4 sm:$0xff]   ;;  %v2068_v47 = vld [vmem:[%s2198_s22 + $0x44] ss:$8 sps:$4 sm:$0xff]   ;;  %v2070_v49 = vld [vmem:[%s2198_s22 + $0x40] ss:$8 sps:$4 sm:$0xff]  }
  0x26   : > { %v2100_v46 = vld [vmem:[%s2198_s22 + $0x130] ss:$8 sps:$4 sm:$0xff]   ;;  %v2104_v48 = vld [vmem:[%s2198_s22 + $0x144] ss:$8 sps:$4 sm:$0xff]   ;;  %v2106_v50 = vld [vmem:[%s2198_s22 + $0x140] ss:$8 sps:$4 sm:$0xff]  }
  0x27   : > { %v2071_v51 = vld [vmem:[%s2198_s22 + $0x54] ss:$8 sps:$4 sm:$0xff]   ;;  %v2073_v53 = vld [vmem:[%s2198_s22 + $0x50] ss:$8 sps:$4 sm:$0xff]   ;;  %v2074_v55 = vld [vmem:[%s2198_s22 + $0x64] ss:$8 sps:$4 sm:$0xff]  }
  0x28   : > { %843 = vmatpush1.bf16.msra.mxu0 %v2028_v11  ;;  %1994 = vmatpush1.bf16.msra.mxu1 %v2028_v11  ;;  %v2110_v52 = vld [vmem:[%s2198_s22 + $0x154] ss:$8 sps:$4 sm:$0xff]   ;;  %v2112_v54 = vld [vmem:[%s2198_s22 + $0x150] ss:$8 sps:$4 sm:$0xff]   ;;  %v2116_v56 = vld [vmem:[%s2198_s22 + $0x164] ss:$8 sps:$4 sm:$0xff]  }
  0x29   : > { %844 = vmatprep.subr.bf16.mxu0 %v2029_v12  ;;  %1981 = vmatprep.subr.bf16.mxu1 %v2029_v12  ;;  %v2076_v57 = vld [vmem:[%s2198_s22 + $0x60] ss:$8 sps:$4 sm:$0xff]   ;;  %v2077_v59 = vld [vmem:[%s2198_s22 + $0x74] ss:$8 sps:$4 sm:$0xff]   ;;  %v2079_v61 = vld [vmem:[%s2198_s22 + $0x70] ss:$8 sps:$4 sm:$0xff]  }
  0x2a   : > { %v2118_v58 = vld [vmem:[%s2198_s22 + $0x160] ss:$8 sps:$4 sm:$0xff]   ;;  %v2122_v60 = vld [vmem:[%s2198_s22 + $0x174] ss:$8 sps:$4 sm:$0xff]   ;;  %v2124_v62 = vld [vmem:[%s2198_s22 + $0x170] ss:$8 sps:$4 sm:$0xff]  }
  0x2b   : > { %v2083_v63 = vld [vmem:[%s2198_s22 + $0x84] ss:$8 sps:$4 sm:$0xff]   ;;  %v2085_v1 = vld [vmem:[%s2198_s22 + $0x80] ss:$8 sps:$4 sm:$0xff]   ;;  %v2089_v3 = vld [vmem:[%s2198_s22 + $0x94] ss:$8 sps:$4 sm:$0xff]  }
  0x2c   : > { %845 = vmatpush1.bf16.msra.mxu0 %v2031_v13  ;;  %1995 = vmatpush1.bf16.msra.mxu1 %v2031_v13  ;;  %v2128_v0 = vld [vmem:[%s2198_s22 + $0x184] ss:$8 sps:$4 sm:$0xff]   ;;  %v2130_v2 = vld [vmem:[%s2198_s22 + $0x180] ss:$8 sps:$4 sm:$0xff]   ;;  %v2131_v4 = vld [vmem:[%s2198_s22 + $0x194] ss:$8 sps:$4 sm:$0xff]  }
  0x2d   : > { %846 = vmatprep.subr.bf16.mxu0 %v2032_v15  ;;  %1982 = vmatprep.subr.bf16.mxu1 %v2032_v15  ;;  %v2091_v5 = vld [vmem:[%s2198_s22 + $0x90] ss:$8 sps:$4 sm:$0xff]   ;;  %v2095_v7 = vld [vmem:[%s2198_s22 + $0xa4] ss:$8 sps:$4 sm:$0xff]   ;;  %v2097_v9 = vld [vmem:[%s2198_s22 + $0xa0] ss:$8 sps:$4 sm:$0xff]  }
  0x2e   : > { %v2133_v6 = vld [vmem:[%s2198_s22 + $0x190] ss:$8 sps:$4 sm:$0xff]   ;;  %v2134_v8 = vld [vmem:[%s2198_s22 + $0x1a4] ss:$8 sps:$4 sm:$0xff]   ;;  %v2136_v10 = vld [vmem:[%s2198_s22 + $0x1a0] ss:$8 sps:$4 sm:$0xff]  }
  0x2f   : > { %v2101_v11 = vld [vmem:[%s2198_s22 + $0xb4] ss:$8 sps:$4 sm:$0xff]   ;;  %v2103_v13 = vld [vmem:[%s2198_s22 + $0xb0] ss:$8 sps:$4 sm:$0xff]   ;;  %v2107_v15 = vld [vmem:[%s2198_s22 + $0xc4] ss:$8 sps:$4 sm:$0xff]  }
  0x30   : > { %847 = vmatpush1.bf16.msra.mxu0 %v2034_v16  ;;  %1996 = vmatpush1.bf16.msra.mxu1 %v2034_v16  ;;  %v2137_v12 = vld [vmem:[%s2198_s22 + $0x1b4] ss:$8 sps:$4 sm:$0xff]   ;;  %v2139_v14 = vld [vmem:[%s2198_s22 + $0x1b0] ss:$8 sps:$4 sm:$0xff]   ;;  %v2140_v16 = vld [vmem:[%s2198_s22 + $0x1c4] ss:$8 sps:$4 sm:$0xff]  }
  0x31   : > { %848 = vmatprep.subr.bf16.mxu0 %v2035_v17  ;;  %1983 = vmatprep.subr.bf16.mxu1 %v2035_v17  ;;  %v2109_v17 = vld [vmem:[%s2198_s22 + $0xc0] ss:$8 sps:$4 sm:$0xff]   ;;  %v2143_v20 = vld [vmem:[%s2198_s22 + $0x1d4] ss:$8 sps:$4 sm:$0xff]   ;;  %v2115_v21 = vld [vmem:[%s2198_s22 + $0xd0] ss:$8 sps:$4 sm:$0xff]  }
  0x34   : > { %849 = vmatpush1.bf16.msra.mxu0 %v2037_v18  ;;  %1997 = vmatpush1.bf16.msra.mxu1 %v2037_v18  ;;  %v2142_v18 = vld [vmem:[%s2198_s22 + $0x1c0] ss:$8 sps:$4 sm:$0xff]  }
  0x35   : > { %1939 = vmatprep.subr.msk.bf16.mxu0 %vm827_vm2, %v2038_v19  ;;  %1984 = vmatprep.subr.msk.bf16.mxu1 %vm827_vm2, %v2038_v19  ;;  %v2113_v19 = vld [vmem:[%s2198_s22 + $0xd4] ss:$8 sps:$4 sm:$0xff]  }
  0x38   : > { %855 = vmatpush2.bf16.msra.mxu0 %v829_v22  ;;  %1998 = vmatpush2.bf16.msra.mxu1 %v829_v22  ;;  %v2145_v22 = vld [vmem:[%s2198_s22 + $0x1d0] ss:$8 sps:$4 sm:$0xff]  }
  0x39   : > { %856 = vmatprep.subr.bf16.mxu0 %v2041_v23  ;;  %1985 = vmatprep.subr.bf16.mxu1 %v2041_v23  ;;  %v2119_v23 = vld [vmem:[%s2198_s22 + $0xe4] ss:$8 sps:$4 sm:$0xff]  }
  0x3c   : > { %857 = vmatpush2.bf16.msra.mxu0 %v2043_v24  ;;  %1999 = vmatpush2.bf16.msra.mxu1 %v2043_v24  ;;  %v2146_v24 = vld [vmem:[%s2198_s22 + $0x1e4] ss:$8 sps:$4 sm:$0xff]  }
  0x3d   : > { %858 = vmatprep.subr.bf16.mxu0 %v2044_v25  ;;  %1986 = vmatprep.subr.bf16.mxu1 %v2044_v25  ;;  %v2121_v25 = vld [vmem:[%s2198_s22 + $0xe0] ss:$8 sps:$4 sm:$0xff]  }
  0x40   : > { %859 = vmatpush2.bf16.msra.mxu0 %v2046_v26  ;;  %2000 = vmatpush2.bf16.msra.mxu1 %v2046_v26  ;;  %v2148_v26 = vld [vmem:[%s2198_s22 + $0x1e0] ss:$8 sps:$4 sm:$0xff]  }
  0x41   : > { %860 = vmatprep.subr.bf16.mxu0 %v2047_v27  ;;  %1987 = vmatprep.subr.bf16.mxu1 %v2047_v27  ;;  %v2125_v27 = vld [vmem:[%s2198_s22 + $0xf4] ss:$8 sps:$4 sm:$0xff]  }
  0x44   : > { %861 = vmatpush2.bf16.msra.mxu0 %v2049_v28  ;;  %2001 = vmatpush2.bf16.msra.mxu1 %v2049_v28  ;;  %v2149_v28 = vld [vmem:[%s2198_s22 + $0x1f4] ss:$8 sps:$4 sm:$0xff]  }
  0x45   : > { %862 = vmatprep.subr.bf16.mxu0 %v2050_v29  ;;  %1988 = vmatprep.subr.bf16.mxu1 %v2050_v29  ;;  %v2127_v29 = vld [vmem:[%s2198_s22 + $0xf0] ss:$8 sps:$4 sm:$0xff]  }
  0x48   : > { %863 = vmatpush2.bf16.msra.mxu0 %v2052_v30  ;;  %2002 = vmatpush2.bf16.msra.mxu1 %v2052_v30  ;;  %v2151_v30 = vld [vmem:[%s2198_s22 + $0x1f0] ss:$8 sps:$4 sm:$0xff]  }
  0x49   : > { %864 = vmatprep.subr.bf16.mxu0 %v2053_v31  ;;  %1989 = vmatprep.subr.bf16.mxu1 %v2053_v31 }
  0x4c   : > { %865 = vmatpush2.bf16.msra.mxu0 %v2055_v32  ;;  %2003 = vmatpush2.bf16.msra.mxu1 %v2055_v32 }
  0x4f   : > { %867 = vmatmul.mubr.bf16.vlgmr.msra.gmra.mxu0 %v2056_v33  ;;  %1027 = vmatmul.mubr.bf16.vlgmr.msra.gmra.mxu1 %v2080_v34 }
  0x50   : > { %1941 = vmatprep.mubr.msk.bf16.mxu0 %vm730_vm1, %v2059_v35  ;;  %1957 = vmatprep.mubr.msk.bf16.mxu1 %vm730_vm1, %v2086_v36 }
  0x57   : > { %877 = vmatmul.mubr.bf16.gmra.mxu0 %v2061_v37  ;;  %1037 = vmatmul.mubr.bf16.gmra.mxu1 %v2088_v38 }
  0x58   : > { %1942 = vmatprep.mubr.msk.bf16.mxu0 %vm730_vm1, %v2062_v39  ;;  %1958 = vmatprep.mubr.msk.bf16.mxu1 %vm730_vm1, %v2092_v40 }
  0x5f   : > { %887 = vmatmul.mubr.bf16.gmra.mxu0 %v2064_v41  ;;  %1047 = vmatmul.mubr.bf16.gmra.mxu1 %v2094_v42 }
  0x60   : > { %1943 = vmatprep.mubr.msk.bf16.mxu0 %vm730_vm1, %v2065_v43  ;;  %1959 = vmatprep.mubr.msk.bf16.mxu1 %vm730_vm1, %v2098_v44 }
  0x67   : > { %897 = vmatmul.mubr.bf16.gmra.mxu0 %v2067_v45  ;;  %1057 = vmatmul.mubr.bf16.gmra.mxu1 %v2100_v46 }
  0x68   : > { %1944 = vmatprep.mubr.msk.bf16.mxu0 %vm730_vm1, %v2068_v47  ;;  %1960 = vmatprep.mubr.msk.bf16.mxu1 %vm730_vm1, %v2104_v48 }
  0x6f   : > { %907 = vmatmul.mubr.bf16.gmra.mxu0 %v2070_v49  ;;  %1067 = vmatmul.mubr.bf16.gmra.mxu1 %v2106_v50 }
  0x70   : > { %1945 = vmatprep.mubr.msk.bf16.mxu0 %vm730_vm1, %v2071_v51  ;;  %1961 = vmatprep.mubr.msk.bf16.mxu1 %vm730_vm1, %v2110_v52 }
  0x77   : > { %917 = vmatmul.mubr.bf16.gmra.mxu0 %v2073_v53  ;;  %1077 = vmatmul.mubr.bf16.gmra.mxu1 %v2112_v54 }
  0x78   : > { %1946 = vmatprep.mubr.msk.bf16.mxu0 %vm730_vm1, %v2074_v55  ;;  %1962 = vmatprep.mubr.msk.bf16.mxu1 %vm730_vm1, %v2116_v56 }
  0x7f   : > { %927 = vmatmul.mubr.bf16.gmra.mxu0 %v2076_v57  ;;  %1087 = vmatmul.mubr.bf16.gmra.mxu1 %v2118_v58 }
  0x80   : > { %1947 = vmatprep.mubr.msk.bf16.mxu0 %vm730_vm1, %v2077_v59  ;;  %1963 = vmatprep.mubr.msk.bf16.mxu1 %vm730_vm1, %v2122_v60 }
  0x87   : > { %937 = vmatmul.mubr.bf16.gmra.mxu0 %v2079_v61  ;;  %1097 = vmatmul.mubr.bf16.gmra.mxu1 %v2124_v62 }
  0x88   : > { %1948 = vmatprep.mubr.msk.bf16.mxu0 %vm730_vm1, %v2083_v63  ;;  %1964 = vmatprep.mubr.msk.bf16.mxu1 %vm730_vm1, %v2128_v0 }
  0x8f   : > { %947 = vmatmul.mubr.bf16.gmra.mxu0 %v2085_v1  ;;  %1107 = vmatmul.mubr.bf16.gmra.mxu1 %v2130_v2 }
  0x90   : > { %1949 = vmatprep.mubr.msk.bf16.mxu0 %vm730_vm1, %v2089_v3  ;;  %1965 = vmatprep.mubr.msk.bf16.mxu1 %vm730_vm1, %v2131_v4 }
  0x97   : > { %957 = vmatmul.mubr.bf16.gmra.mxu0 %v2091_v5  ;;  %1117 = vmatmul.mubr.bf16.gmra.mxu1 %v2133_v6 }
  0x98   : > { %1950 = vmatprep.mubr.msk.bf16.mxu0 %vm730_vm1, %v2095_v7  ;;  %1966 = vmatprep.mubr.msk.bf16.mxu1 %vm730_vm1, %v2134_v8 }
  0x9f   : > { %967 = vmatmul.mubr.bf16.gmra.mxu0 %v2097_v9  ;;  %1127 = vmatmul.mubr.bf16.gmra.mxu1 %v2136_v10 }
  0xa0   : > { %1951 = vmatprep.mubr.msk.bf16.mxu0 %vm730_vm1, %v2101_v11  ;;  %1967 = vmatprep.mubr.msk.bf16.mxu1 %vm730_vm1, %v2137_v12 }
  0xa7   : > { %977 = vmatmul.mubr.bf16.gmra.mxu0 %v2103_v13  ;;  %1137 = vmatmul.mubr.bf16.gmra.mxu1 %v2139_v14 }
  0xa8   : > { %1952 = vmatprep.mubr.msk.bf16.mxu0 %vm730_vm1, %v2107_v15  ;;  %1968 = vmatprep.mubr.msk.bf16.mxu1 %vm730_vm1, %v2140_v16 }
  0xaf   : > { %987 = vmatmul.mubr.bf16.gmra.mxu0 %v2109_v17  ;;  %1147 = vmatmul.mubr.bf16.gmra.mxu1 %v2142_v18 }
  0xb0   : > { %1953 = vmatprep.mubr.msk.bf16.mxu0 %vm730_vm1, %v2113_v19  ;;  %1969 = vmatprep.mubr.msk.bf16.mxu1 %vm730_vm1, %v2143_v20 }
  0xb7   : > { %997 = vmatmul.mubr.bf16.gmra.mxu0 %v2115_v21  ;;  %1157 = vmatmul.mubr.bf16.gmra.mxu1 %v2145_v22 }
  0xb8   : > { %1954 = vmatprep.mubr.msk.bf16.mxu0 %vm730_vm1, %v2119_v23  ;;  %1970 = vmatprep.mubr.msk.bf16.mxu1 %vm730_vm1, %v2146_v24 }
  0xbf   : > { %1007 = vmatmul.mubr.bf16.gmra.mxu0 %v2121_v25  ;;  %1167 = vmatmul.mubr.bf16.gmra.mxu1 %v2148_v26 }
  0xc0   : > { %1955 = vmatprep.mubr.msk.bf16.mxu0 %vm730_vm1, %v2125_v27  ;;  %1971 = vmatprep.mubr.msk.bf16.mxu1 %vm730_vm1, %v2149_v28 }
  0xc7   : > { %1017 = vmatmul.mubr.bf16.gmra.mxu0 %v2127_v29  ;;  %1177 = vmatmul.mubr.bf16.gmra.mxu1 %v2151_v30 }
 0x10f   : > { %v2391_v31 = vpop.f32.mrf.mxu0  ;;  %v2393_v32 = vpop.f32.mrf.mxu1 }
 0x110   : > { %1187 = vst [vmem:[%s2203_s25] sm:$0xff] %v2391_v31  ;;  %1251 = vst [vmem:[%s2203_s25 + $0x200] sm:$0xff] %v2393_v32 }
 0x111   : > { %v2399_v33 = vpop.f32.mrf.mxu0  ;;  %v2401_v34 = vpop.f32.mrf.mxu1 }
 0x112   : > { %1188 = vst [vmem:[%s2203_s25 + $0x8] sm:$0xff] %v2399_v33  ;;  %1252 = vst [vmem:[%s2203_s25 + $0x208] sm:$0xff] %v2401_v34 }
 0x113   : > { %v2407_v35 = vpop.f32.mrf.mxu0  ;;  %v2409_v36 = vpop.f32.mrf.mxu1 }
 0x114   : > { %1189 = vst [vmem:[%s2203_s25 + $0x10] sm:$0xff] %v2407_v35  ;;  %1253 = vst [vmem:[%s2203_s25 + $0x210] sm:$0xff] %v2409_v36 }
 0x115   : > { %v2415_v37 = vpop.f32.mrf.mxu0  ;;  %v2417_v38 = vpop.f32.mrf.mxu1 }
 0x116   : > { %1190 = vst [vmem:[%s2203_s25 + $0x18] sm:$0xff] %v2415_v37  ;;  %1254 = vst [vmem:[%s2203_s25 + $0x218] sm:$0xff] %v2417_v38 }
 0x117   : > { %v2423_v39 = vpop.f32.mrf.mxu0  ;;  %v2425_v40 = vpop.f32.mrf.mxu1 }
 0x118   : > { %1191 = vst [vmem:[%s2203_s25 + $0x20] sm:$0xff] %v2423_v39  ;;  %1255 = vst [vmem:[%s2203_s25 + $0x220] sm:$0xff] %v2425_v40 }
 0x119   : > { %v2431_v41 = vpop.f32.mrf.mxu0  ;;  %v2433_v42 = vpop.f32.mrf.mxu1 }
 0x11a   : > { %1192 = vst [vmem:[%s2203_s25 + $0x28] sm:$0xff] %v2431_v41  ;;  %1256 = vst [vmem:[%s2203_s25 + $0x228] sm:$0xff] %v2433_v42 }
 0x11b   : > { %v2439_v43 = vpop.f32.mrf.mxu0  ;;  %v2441_v44 = vpop.f32.mrf.mxu1 }
 0x11c   : > { %1193 = vst [vmem:[%s2203_s25 + $0x30] sm:$0xff] %v2439_v43  ;;  %1257 = vst [vmem:[%s2203_s25 + $0x230] sm:$0xff] %v2441_v44 }
 0x11d   : > { %v2447_v45 = vpop.f32.mrf.mxu0  ;;  %v2449_v46 = vpop.f32.mrf.mxu1 }
 0x11e   : > { %1194 = vst [vmem:[%s2203_s25 + $0x38] sm:$0xff] %v2447_v45  ;;  %1258 = vst [vmem:[%s2203_s25 + $0x238] sm:$0xff] %v2449_v46 }
 0x11f   : > { %v2455_v47 = vpop.f32.mrf.mxu0  ;;  %v2457_v48 = vpop.f32.mrf.mxu1 }
 0x120   : > { %1195 = vst [vmem:[%s2203_s25 + $0x40] sm:$0xff] %v2455_v47  ;;  %1259 = vst [vmem:[%s2203_s25 + $0x240] sm:$0xff] %v2457_v48 }
 0x121   : > { %v2463_v49 = vpop.f32.mrf.mxu0  ;;  %v2465_v50 = vpop.f32.mrf.mxu1 }
 0x122   : > { %1196 = vst [vmem:[%s2203_s25 + $0x48] sm:$0xff] %v2463_v49  ;;  %1260 = vst [vmem:[%s2203_s25 + $0x248] sm:$0xff] %v2465_v50 }
 0x123   : > { %v2471_v51 = vpop.f32.mrf.mxu0  ;;  %v2473_v52 = vpop.f32.mrf.mxu1 }
 0x124   : > { %1197 = vst [vmem:[%s2203_s25 + $0x50] sm:$0xff] %v2471_v51  ;;  %1261 = vst [vmem:[%s2203_s25 + $0x250] sm:$0xff] %v2473_v52 }
 0x125   : > { %v2479_v53 = vpop.f32.mrf.mxu0  ;;  %v2481_v54 = vpop.f32.mrf.mxu1 }
 0x126   : > { %1198 = vst [vmem:[%s2203_s25 + $0x58] sm:$0xff] %v2479_v53  ;;  %1262 = vst [vmem:[%s2203_s25 + $0x258] sm:$0xff] %v2481_v54 }
 0x127   : > { %v2487_v55 = vpop.f32.mrf.mxu0  ;;  %v2489_v56 = vpop.f32.mrf.mxu1 }
 0x128   : > { %1199 = vst [vmem:[%s2203_s25 + $0x60] sm:$0xff] %v2487_v55  ;;  %1263 = vst [vmem:[%s2203_s25 + $0x260] sm:$0xff] %v2489_v56 }
 0x129   : > { %v2495_v57 = vpop.f32.mrf.mxu0  ;;  %v2497_v58 = vpop.f32.mrf.mxu1 }
 0x12a   : > { %1200 = vst [vmem:[%s2203_s25 + $0x68] sm:$0xff] %v2495_v57  ;;  %1264 = vst [vmem:[%s2203_s25 + $0x268] sm:$0xff] %v2497_v58 }
 0x12b   : > { %v2503_v59 = vpop.f32.mrf.mxu0  ;;  %v2505_v60 = vpop.f32.mrf.mxu1 }
 0x12c   : > { %1201 = vst [vmem:[%s2203_s25 + $0x70] sm:$0xff] %v2503_v59  ;;  %1265 = vst [vmem:[%s2203_s25 + $0x270] sm:$0xff] %v2505_v60 }
 0x12d   : > { %v2511_v61 = vpop.f32.mrf.mxu0  ;;  %v2513_v62 = vpop.f32.mrf.mxu1 }
 0x12e   : > { %1202 = vst [vmem:[%s2203_s25 + $0x78] sm:$0xff] %v2511_v61  ;;  %1266 = vst [vmem:[%s2203_s25 + $0x278] sm:$0xff] %v2513_v62 }
 0x12f   : > { %v2519_v63 = vpop.f32.mrf.mxu0  ;;  %v2521_v0 = vpop.f32.mrf.mxu1 }
 0x130   : > { %1203 = vst [vmem:[%s2203_s25 + $0x80] sm:$0xff] %v2519_v63  ;;  %1267 = vst [vmem:[%s2203_s25 + $0x280] sm:$0xff] %v2521_v0 }
 0x131   : > { %v2527_v1 = vpop.f32.mrf.mxu0  ;;  %v2529_v2 = vpop.f32.mrf.mxu1 }
 0x132   : > { %3277 = vst [vmem:[#allocation2_spill] sm:$0xff] %v2529_v2  ;;  %1204 = vst [vmem:[%s2203_s25 + $0x88] sm:$0xff] %v2527_v1 }
 0x133   : > { %1268 = vst [vmem:[%s2203_s25 + $0x288] sm:$0xff] %v2529_v2  ;;  %v2535_v3 = vpop.f32.mrf.mxu0  ;;  %v2537_v4 = vpop.f32.mrf.mxu1 }
 0x134   : > { %3278 = vst [vmem:[#allocation3_spill] sm:$0xff] %v2537_v4  ;;  %1205 = vst [vmem:[%s2203_s25 + $0x90] sm:$0xff] %v2535_v3 }
 0x135   : > { %1269 = vst [vmem:[%s2203_s25 + $0x290] sm:$0xff] %v2537_v4  ;;  %v2543_v5 = vpop.f32.mrf.mxu0  ;;  %v2545_v6 = vpop.f32.mrf.mxu1  ;;  %v1486_v4 = vmul.f32 %v2447_v45, %v2447_v45 }
 0x136   : > { %3279 = vst [vmem:[#allocation4_spill] sm:$0xff] %v2545_v6  ;;  %1206 = vst [vmem:[%s2203_s25 + $0x98] sm:$0xff] %v2543_v5 }
 0x137   : > { %1270 = vst [vmem:[%s2203_s25 + $0x298] sm:$0xff] %v2545_v6  ;;  %v2551_v7 = vpop.f32.mrf.mxu0  ;;  %v2553_v8 = vpop.f32.mrf.mxu1 }
 0x138   : > { %3280 = vst [vmem:[#allocation5_spill] sm:$0xff] %v2553_v8  ;;  %1207 = vst [vmem:[%s2203_s25 + $0xa0] sm:$0xff] %v2551_v7 }
 0x139   : > { %1271 = vst [vmem:[%s2203_s25 + $0x2a0] sm:$0xff] %v2553_v8  ;;  %v2559_v9 = vpop.f32.mrf.mxu0  ;;  %v2561_v10 = vpop.f32.mrf.mxu1 }
 0x13a   : > { %3281 = vst [vmem:[#allocation6_spill] sm:$0xff] %v2561_v10  ;;  %1208 = vst [vmem:[%s2203_s25 + $0xa8] sm:$0xff] %v2559_v9 }
 0x13b   : > { %1272 = vst [vmem:[%s2203_s25 + $0x2a8] sm:$0xff] %v2561_v10  ;;  %v2567_v11 = vpop.f32.mrf.mxu0  ;;  %v2569_v12 = vpop.f32.mrf.mxu1 }
 0x13c   : > { %3282 = vst [vmem:[#allocation7_spill] sm:$0xff] %v2569_v12  ;;  %1209 = vst [vmem:[%s2203_s25 + $0xb0] sm:$0xff] %v2567_v11 }
 0x13d   : > { %1273 = vst [vmem:[%s2203_s25 + $0x2b0] sm:$0xff] %v2569_v12  ;;  %v2575_v13 = vpop.f32.mrf.mxu0  ;;  %v2577_v14 = vpop.f32.mrf.mxu1 }
 0x13e   : > { %3283 = vst [vmem:[#allocation8_spill] sm:$0xff] %v2577_v14  ;;  %1210 = vst [vmem:[%s2203_s25 + $0xb8] sm:$0xff] %v2575_v13 }
 0x13f   : > { %1274 = vst [vmem:[%s2203_s25 + $0x2b8] sm:$0xff] %v2577_v14  ;;  %v2583_v15 = vpop.f32.mrf.mxu0  ;;  %v2585_v16 = vpop.f32.mrf.mxu1  ;;  %v1484_v14 = vmul.f32 %v2431_v41, %v2431_v41 }
 0x140   : > { %3284 = vst [vmem:[#allocation9_spill] sm:$0xff] %v2585_v16  ;;  %1211 = vst [vmem:[%s2203_s25 + $0xc0] sm:$0xff] %v2583_v15 }
 0x141   : > { %1275 = vst [vmem:[%s2203_s25 + $0x2c0] sm:$0xff] %v2585_v16  ;;  %v2591_v17 = vpop.f32.mrf.mxu0  ;;  %v2593_v18 = vpop.f32.mrf.mxu1  ;;  %v1483_v16 = vmul.f32 %v2423_v39, %v2423_v39 }
 0x142   : > { %3285 = vst [vmem:[#allocation10_spill] sm:$0xff] %v2593_v18  ;;  %1212 = vst [vmem:[%s2203_s25 + $0xc8] sm:$0xff] %v2591_v17 }
 0x143   : > { %1276 = vst [vmem:[%s2203_s25 + $0x2c8] sm:$0xff] %v2593_v18  ;;  %v2599_v19 = vpop.f32.mrf.mxu0  ;;  %v2601_v20 = vpop.f32.mrf.mxu1  ;;  %v1316_v18 = vadd.f32 %v2407_v35, %v2391_v31 }
 0x144   : > { %3286 = vst [vmem:[#allocation11_spill] sm:$0xff] %v2601_v20  ;;  %1213 = vst [vmem:[%s2203_s25 + $0xd0] sm:$0xff] %v2599_v19 }
 0x145   : > { %1277 = vst [vmem:[%s2203_s25 + $0x2d0] sm:$0xff] %v2601_v20  ;;  %v2607_v21 = vpop.f32.mrf.mxu0  ;;  %v2609_v22 = vpop.f32.mrf.mxu1  ;;  %v1317_v8 = vadd.f32 %v1316_v18, %v2423_v39  ;;  %v1487_v18 = vmul.f32 %v2455_v47, %v2455_v47 }
 0x146   : > { %3287 = vst [vmem:[#allocation12_spill] sm:$0xff] %v2609_v22  ;;  %1214 = vst [vmem:[%s2203_s25 + $0xd8] sm:$0xff] %v2607_v21 }
 0x147   : > { %1278 = vst [vmem:[%s2203_s25 + $0x2d8] sm:$0xff] %v2609_v22  ;;  %v2615_v23 = vpop.f32.mrf.mxu0  ;;  %v2617_v24 = vpop.f32.mrf.mxu1  ;;  %v1318_v39 = vadd.f32 %v1317_v8, %v2439_v43 }
 0x148   : > { %3288 = vst [vmem:[#allocation13_spill] sm:$0xff] %v2617_v24  ;;  %1215 = vst [vmem:[%s2203_s25 + $0xe0] sm:$0xff] %v2615_v23 }
 0x149   : > { %1279 = vst [vmem:[%s2203_s25 + $0x2e0] sm:$0xff] %v2617_v24  ;;  %v2623_v25 = vpop.f32.mrf.mxu0  ;;  %v2625_v26 = vpop.f32.mrf.mxu1  ;;  %v1481_v24 = vmul.f32 %v2407_v35, %v2407_v35  ;;  %v1385_v35 = vadd.f32 %v2415_v37, %v2399_v33  ;;  %v1319_v8 = vadd.f32 %v1318_v39, %v2455_v47 }
 0x14a   : > { %3289 = vst [vmem:[#allocation14_spill] sm:$0xff] %v2625_v26  ;;  %1216 = vst [vmem:[%s2203_s25 + $0xe8] sm:$0xff] %v2623_v25 }
 0x14b   : > { %1280 = vst [vmem:[%s2203_s25 + $0x2e8] sm:$0xff] %v2625_v26  ;;  %v2631_v27 = vpop.f32.mrf.mxu0  ;;  %v2633_v28 = vpop.f32.mrf.mxu1  ;;  %v1482_v26 = vmul.f32 %v2415_v37, %v2415_v37  ;;  %v1386_v37 = vadd.f32 %v1385_v35, %v2431_v41 }
 0x14c   : > { %3290 = vst [vmem:[#allocation15_spill] sm:$0xff] %v2633_v28  ;;  %1217 = vst [vmem:[%s2203_s25 + $0xf0] sm:$0xff] %v2631_v27 }
 0x14d   : > { %1281 = vst [vmem:[%s2203_s25 + $0x2f0] sm:$0xff] %v2633_v28  ;;  %v2639_v29 = vpop.f32.mrf.mxu0  ;;  %v2641_v30 = vpop.f32.mrf.mxu1  ;;  %v1479_v28 = vmul.f32 %v2391_v31, %v2391_v31 }
 0x14e   : > { %3291 = vst [vmem:[#allocation16_spill] sm:$0xff] %v2641_v30  ;;  %1218 = vst [vmem:[%s2203_s25 + $0xf8] sm:$0xff] %v2639_v29 }
 0x14f   : > { %1282 = vst [vmem:[%s2203_s25 + $0x2f8] sm:$0xff] %v2641_v30  ;;  %v2651_v22 = vpop.f32.mrf.mxu0  ;;  %v2653_v20 = vpop.f32.mrf.mxu1  ;;  %v1480_v30 = vmul.f32 %v2399_v33, %v2399_v33  ;;  %v1607_v31 = vadd.f32 %v1481_v24, %v1479_v28  ;;  %v1488_v28 = vmul.f32 %v2463_v49, %v2463_v49 }
 0x150   : > { %3292 = vst [vmem:[#allocation17_spill] sm:$0xff] %v2653_v20  ;;  %1219 = vst [vmem:[%s2203_s25 + $0x100] sm:$0xff] %v2651_v22 }
 0x151   : > { %1283 = vst [vmem:[%s2203_s25 + $0x300] sm:$0xff] %v2653_v20  ;;  %v2669_v12 = vpop.f32.mrf.mxu0  ;;  %v2671_v10 = vpop.f32.mrf.mxu1  ;;  %v1485_v20 = vmul.f32 %v2439_v43, %v2439_v43  ;;  %v1676_v6 = vadd.f32 %v1482_v26, %v1480_v30  ;;  %v1608_v33 = vadd.f32 %v1607_v31, %v1483_v16  ;;  %v1387_v43 = vadd.f32 %v1386_v37, %v2447_v45 }
 0x152   : > { %3293 = vst [vmem:[#allocation18_spill] sm:$0xff] %v2671_v10  ;;  %1220 = vst [vmem:[%s2203_s25 + $0x108] sm:$0xff] %v2669_v12  ;;  %v1489_v16 = vmul.f32 %v2471_v51, %v2471_v51  ;;  %v1492_v37 = vmul.f32 %v2495_v57, %v2495_v57 }
 0x153   : > { %1284 = vst [vmem:[%s2203_s25 + $0x308] sm:$0xff] %v2671_v10  ;;  %v2684_v2 = vpop.f32.mrf.mxu0  ;;  %v2686_v24 = vpop.f32.mrf.mxu1  ;;  %v1677_v26 = vadd.f32 %v1676_v6, %v1484_v14  ;;  %v1609_v41 = vadd.f32 %v1608_v33, %v1485_v20  ;;  %v1490_v14 = vmul.f32 %v2479_v53, %v2479_v53  ;;  %v1388_v47 = vadd.f32 %v1387_v43, %v2463_v49 }
 0x154   : > { %1221 = vst [vmem:[%s2203_s25 + $0x110] sm:$0xff] %v2684_v2  ;;  %1285 = vst [vmem:[%s2203_s25 + $0x310] sm:$0xff] %v2686_v24  ;;  %v1320_v20 = vadd.f32 %v1319_v8, %v2471_v51  ;;  %v1491_v33 = vmul.f32 %v2487_v55, %v2487_v55  ;;  %v1494_v43 = vmul.f32 %v2511_v61, %v2511_v61 }
 0x155   : > { %v2698_v30 = vpop.f32.mrf.mxu0  ;;  %v2700_v10 = vpop.f32.mrf.mxu1  ;;  %v1678_v6 = vadd.f32 %v1677_v26, %v1486_v4  ;;  %v1610_v45 = vadd.f32 %v1609_v41, %v1487_v18  ;;  %v1389_v51 = vadd.f32 %v1388_v47, %v2479_v53  ;;  %v1493_v41 = vmul.f32 %v2503_v59, %v2503_v59 }
 0x156   : > { %1222 = vst [vmem:[%s2203_s25 + $0x118] sm:$0xff] %v2698_v30  ;;  %1286 = vst [vmem:[%s2203_s25 + $0x318] sm:$0xff] %v2700_v10  ;;  %v1321_v18 = vadd.f32 %v1320_v20, %v2487_v55  ;;  %v1496_v47 = vmul.f32 %v2527_v1, %v2527_v1 }
 0x157   : > { %v2712_v31 = vpop.f32.mrf.mxu0  ;;  %v2714_v35 = vpop.f32.mrf.mxu1  ;;  %v1679_v4 = vadd.f32 %v1678_v6, %v1488_v28  ;;  %v1611_v49 = vadd.f32 %v1610_v45, %v1489_v16  ;;  %v1390_v55 = vadd.f32 %v1389_v51, %v2495_v57  ;;  %v1495_v45 = vmul.f32 %v2519_v63, %v2519_v63 }
 0x158   : > { %1223 = vst [vmem:[%s2203_s25 + $0x120] sm:$0xff] %v2712_v31  ;;  %1287 = vst [vmem:[%s2203_s25 + $0x320] sm:$0xff] %v2714_v35  ;;  %v1322_v16 = vadd.f32 %v1321_v18, %v2503_v59  ;;  %v1498_v51 = vmul.f32 %v2543_v5, %v2543_v5 }
 0x159   : > { %v2726_v39 = vpop.f32.mrf.mxu0  ;;  %v2728_v26 = vpop.f32.mrf.mxu1  ;;  %v1680_v28 = vadd.f32 %v1679_v4, %v1490_v14  ;;  %v1612_v53 = vadd.f32 %v1611_v49, %v1491_v33  ;;  %v1391_v59 = vadd.f32 %v1390_v55, %v2511_v61  ;;  %v1497_v49 = vmul.f32 %v2535_v3, %v2535_v3 }
 0x15a   : > { %1224 = vst [vmem:[%s2203_s25 + $0x128] sm:$0xff] %v2726_v39  ;;  %1288 = vst [vmem:[%s2203_s25 + $0x328] sm:$0xff] %v2728_v26  ;;  %v1323_v33 = vadd.f32 %v1322_v16, %v2519_v63  ;;  %v1500_v55 = vmul.f32 %v2559_v9, %v2559_v9 }
 0x15b   : > { %v2740_v8 = vpop.f32.mrf.mxu0  ;;  %v2742_v6 = vpop.f32.mrf.mxu1  ;;  %v1681_v14 = vadd.f32 %v1680_v28, %v1492_v37  ;;  %v1613_v57 = vadd.f32 %v1612_v53, %v1493_v41  ;;  %v1392_v63 = vadd.f32 %v1391_v59, %v2527_v1  ;;  %v1499_v53 = vmul.f32 %v2551_v7, %v2551_v7 }
 0x15c   : > { %1225 = vst [vmem:[%s2203_s25 + $0x130] sm:$0xff] %v2740_v8  ;;  %1289 = vst [vmem:[%s2203_s25 + $0x330] sm:$0xff] %v2742_v6  ;;  %v1324_v41 = vadd.f32 %v1323_v33, %v2535_v3  ;;  %v1502_v59 = vmul.f32 %v2575_v13, %v2575_v13 }
 0x15d   : > { %v2754_v20 = vpop.f32.mrf.mxu0  ;;  %v2756_v4 = vpop.f32.mrf.mxu1  ;;  %v1682_v37 = vadd.f32 %v1681_v14, %v1494_v43  ;;  %v1614_v61 = vadd.f32 %v1613_v57, %v1495_v45  ;;  %v1393_v3 = vadd.f32 %v1392_v63, %v2543_v5  ;;  %v1501_v57 = vmul.f32 %v2567_v11, %v2567_v11 }
 0x15e   : > { %1226 = vst [vmem:[%s2203_s25 + $0x138] sm:$0xff] %v2754_v20  ;;  %1290 = vst [vmem:[%s2203_s25 + $0x338] sm:$0xff] %v2756_v4  ;;  %v1325_v45 = vadd.f32 %v1324_v41, %v2551_v7  ;;  %v1504_v63 = vmul.f32 %v2591_v17, %v2591_v17 }
 0x15f   : > { %v2768_v18 = vpop.f32.mrf.mxu0  ;;  %v2770_v28 = vpop.f32.mrf.mxu1  ;;  %v1683_v43 = vadd.f32 %v1682_v37, %v1496_v47  ;;  %v1615_v1 = vadd.f32 %v1614_v61, %v1497_v49  ;;  %v1394_v7 = vadd.f32 %v1393_v3, %v2559_v9  ;;  %v1503_v61 = vmul.f32 %v2583_v15, %v2583_v15 }
 0x160   : > { %1227 = vst [vmem:[%s2203_s25 + $0x140] sm:$0xff] %v2768_v18  ;;  %1291 = vst [vmem:[%s2203_s25 + $0x340] sm:$0xff] %v2770_v28  ;;  %v1326_v49 = vadd.f32 %v1325_v45, %v2567_v11  ;;  %v1506_v3 = vmul.f32 %v2607_v21, %v2607_v21 }
 0x161   : > { %v2782_v16 = vpop.f32.mrf.mxu0  ;;  %v2784_v14 = vpop.f32.mrf.mxu1  ;;  %v1684_v47 = vadd.f32 %v1683_v43, %v1498_v51  ;;  %v1616_v5 = vadd.f32 %v1615_v1, %v1499_v53  ;;  %v1395_v11 = vadd.f32 %v1394_v7, %v2575_v13  ;;  %v1505_v1 = vmul.f32 %v2599_v19, %v2599_v19 }
 0x162   : > { %1228 = vst [vmem:[%s2203_s25 + $0x148] sm:$0xff] %v2782_v16  ;;  %1292 = vst [vmem:[%s2203_s25 + $0x348] sm:$0xff] %v2784_v14  ;;  %v1327_v53 = vadd.f32 %v1326_v49, %v2583_v15  ;;  %v1508_v7 = vmul.f32 %v2623_v25, %v2623_v25 }
 0x163   : > { %v2796_v33 = vpop.f32.mrf.mxu0  ;;  %v2798_v37 = vpop.f32.mrf.mxu1  ;;  %v1685_v51 = vadd.f32 %v1684_v47, %v1500_v55  ;;  %v1617_v9 = vadd.f32 %v1616_v5, %v1501_v57  ;;  %v1396_v15 = vadd.f32 %v1395_v11, %v2591_v17  ;;  %v1507_v5 = vmul.f32 %v2615_v23, %v2615_v23 }
 0x164   : > { %1229 = vst [vmem:[%s2203_s25 + $0x150] sm:$0xff] %v2796_v33  ;;  %1293 = vst [vmem:[%s2203_s25 + $0x350] sm:$0xff] %v2798_v37  ;;  %v1328_v57 = vadd.f32 %v1327_v53, %v2599_v19  ;;  %v1510_v11 = vmul.f32 %v2639_v29, %v2639_v29 }
 0x165   : > { %v2810_v41 = vpop.f32.mrf.mxu0  ;;  %v2812_v43 = vpop.f32.mrf.mxu1  ;;  %v1686_v55 = vadd.f32 %v1685_v51, %v1502_v59  ;;  %v1618_v13 = vadd.f32 %v1617_v9, %v1503_v61  ;;  %v1397_v19 = vadd.f32 %v1396_v15, %v2607_v21  ;;  %v1509_v9 = vmul.f32 %v2631_v27, %v2631_v27 }
 0x166   : > { %1230 = vst [vmem:[%s2203_s25 + $0x158] sm:$0xff] %v2810_v41  ;;  %1294 = vst [vmem:[%s2203_s25 + $0x358] sm:$0xff] %v2812_v43  ;;  %v1329_v61 = vadd.f32 %v1328_v57, %v2615_v23  ;;  %v1512_v15 = vmul.f32 %v2669_v12, %v2669_v12 }
 0x167   : > { %v2824_v45 = vpop.f32.mrf.mxu0  ;;  %v2826_v47 = vpop.f32.mrf.mxu1  ;;  %v1687_v59 = vadd.f32 %v1686_v55, %v1504_v63  ;;  %v1619_v17 = vadd.f32 %v1618_v13, %v1505_v1  ;;  %v1398_v23 = vadd.f32 %v1397_v19, %v2623_v25  ;;  %v1511_v13 = vmul.f32 %v2651_v22, %v2651_v22 }
 0x168   : > { %1231 = vst [vmem:[%s2203_s25 + $0x160] sm:$0xff] %v2824_v45  ;;  %1295 = vst [vmem:[%s2203_s25 + $0x360] sm:$0xff] %v2826_v47  ;;  %v1330_v1 = vadd.f32 %v1329_v61, %v2631_v27  ;;  %v1514_v19 = vmul.f32 %v2698_v30, %v2698_v30 }
 0x169   : > { %v2838_v49 = vpop.f32.mrf.mxu0  ;;  %v2840_v51 = vpop.f32.mrf.mxu1  ;;  %v1688_v63 = vadd.f32 %v1687_v59, %v1506_v3  ;;  %v1620_v21 = vadd.f32 %v1619_v17, %v1507_v5  ;;  %v1399_v27 = vadd.f32 %v1398_v23, %v2639_v29  ;;  %v1513_v17 = vmul.f32 %v2684_v2, %v2684_v2 }
 0x16a   : > { %1232 = vst [vmem:[%s2203_s25 + $0x168] sm:$0xff] %v2838_v49  ;;  %1296 = vst [vmem:[%s2203_s25 + $0x368] sm:$0xff] %v2840_v51  ;;  %v1331_v5 = vadd.f32 %v1330_v1, %v2651_v22  ;;  %v1516_v23 = vmul.f32 %v2726_v39, %v2726_v39 }
 0x16b   : > { %v2852_v53 = vpop.f32.mrf.mxu0  ;;  %v2854_v55 = vpop.f32.mrf.mxu1  ;;  %v1689_v3 = vadd.f32 %v1688_v63, %v1508_v7  ;;  %v1621_v25 = vadd.f32 %v1620_v21, %v1509_v9  ;;  %v1400_v22 = vadd.f32 %v1399_v27, %v2669_v12  ;;  %v1515_v21 = vmul.f32 %v2712_v31, %v2712_v31 }
 0x16c   : > { %1233 = vst [vmem:[%s2203_s25 + $0x170] sm:$0xff] %v2852_v53  ;;  %1297 = vst [vmem:[%s2203_s25 + $0x370] sm:$0xff] %v2854_v55  ;;  %v1332_v9 = vadd.f32 %v1331_v5, %v2684_v2  ;;  %v1518_v27 = vmul.f32 %v2754_v20, %v2754_v20 }
 0x16d   : > { %v2866_v57 = vpop.f32.mrf.mxu0  ;;  %v2868_v59 = vpop.f32.mrf.mxu1  ;;  %v1690_v7 = vadd.f32 %v1689_v3, %v1510_v11  ;;  %v1622_v29 = vadd.f32 %v1621_v25, %v1511_v13  ;;  %v1401_v2 = vadd.f32 %v1400_v22, %v2698_v30  ;;  %v1517_v25 = vmul.f32 %v2740_v8, %v2740_v8 }
 0x16e   : > { %1234 = vst [vmem:[%s2203_s25 + $0x178] sm:$0xff] %v2866_v57  ;;  %1298 = vst [vmem:[%s2203_s25 + $0x378] sm:$0xff] %v2868_v59  ;;  %v1333_v13 = vadd.f32 %v1332_v9, %v2712_v31  ;;  %v1520_v22 = vmul.f32 %v2782_v16, %v2782_v16 }
 0x16f   : > { %v2880_v61 = vpop.f32.mrf.mxu0  ;;  %v2882_v63 = vpop.f32.mrf.mxu1  ;;  %v1691_v11 = vadd.f32 %v1690_v7, %v1512_v15  ;;  %v1623_v12 = vadd.f32 %v1622_v29, %v1513_v17  ;;  %v1402_v31 = vadd.f32 %v1401_v2, %v2726_v39  ;;  %v1519_v29 = vmul.f32 %v2768_v18, %v2768_v18 }
 0x170   : > { %1235 = vst [vmem:[%s2203_s25 + $0x180] sm:$0xff] %v2880_v61  ;;  %1299 = vst [vmem:[%s2203_s25 + $0x380] sm:$0xff] %v2882_v63  ;;  %v1334_v17 = vadd.f32 %v1333_v13, %v2740_v8  ;;  %v1522_v2 = vmul.f32 %v2810_v41, %v2810_v41 }
 0x171   : > { %v2894_v1 = vpop.f32.mrf.mxu0  ;;  %v2896_v3 = vpop.f32.mrf.mxu1  ;;  %v1692_v15 = vadd.f32 %v1691_v11, %v1514_v19  ;;  %v1624_v30 = vadd.f32 %v1623_v12, %v1515_v21  ;;  %v1403_v8 = vadd.f32 %v1402_v31, %v2754_v20  ;;  %v1521_v12 = vmul.f32 %v2796_v33, %v2796_v33 }
 0x172   : > { %1236 = vst [vmem:[%s2203_s25 + $0x188] sm:$0xff] %v2894_v1  ;;  %1300 = vst [vmem:[%s2203_s25 + $0x388] sm:$0xff] %v2896_v3  ;;  %v1335_v21 = vadd.f32 %v1334_v17, %v2768_v18  ;;  %v1524_v31 = vmul.f32 %v2838_v49, %v2838_v49 }
 0x173   : > { %v2908_v5 = vpop.f32.mrf.mxu0  ;;  %v2910_v7 = vpop.f32.mrf.mxu1  ;;  %v1693_v19 = vadd.f32 %v1692_v15, %v1516_v23  ;;  %v1625_v39 = vadd.f32 %v1624_v30, %v1517_v25  ;;  %v1404_v20 = vadd.f32 %v1403_v8, %v2782_v16  ;;  %v1523_v30 = vmul.f32 %v2824_v45, %v2824_v45 }
 0x174   : > { %1237 = vst [vmem:[%s2203_s25 + $0x190] sm:$0xff] %v2908_v5  ;;  %1301 = vst [vmem:[%s2203_s25 + $0x390] sm:$0xff] %v2910_v7  ;;  %v1336_v18 = vadd.f32 %v1335_v21, %v2796_v33  ;;  %v1526_v8 = vmul.f32 %v2866_v57, %v2866_v57 }
 0x175   : > { %v2922_v9 = vpop.f32.mrf.mxu0  ;;  %v2924_v11 = vpop.f32.mrf.mxu1  ;;  %v1694_v23 = vadd.f32 %v1693_v19, %v1518_v27  ;;  %v1626_v25 = vadd.f32 %v1625_v39, %v1519_v29  ;;  %v1405_v16 = vadd.f32 %v1404_v20, %v2810_v41  ;;  %v1525_v39 = vmul.f32 %v2852_v53, %v2852_v53 }
 0x176   : > { %1238 = vst [vmem:[%s2203_s25 + $0x198] sm:$0xff] %v2922_v9  ;;  %1302 = vst [vmem:[%s2203_s25 + $0x398] sm:$0xff] %v2924_v11  ;;  %v1337_v33 = vadd.f32 %v1336_v18, %v2824_v45  ;;  %v1528_v20 = vmul.f32 %v2894_v1, %v2894_v1 }
 0x177   : > { %v998_v13 = vpop.f32.mrf.mxu0  ;;  %v2936_v15 = vpop.f32.mrf.mxu1  ;;  %v1695_v27 = vadd.f32 %v1694_v23, %v1520_v22  ;;  %v1627_v29 = vadd.f32 %v1626_v25, %v1521_v12  ;;  %v1406_v41 = vadd.f32 %v1405_v16, %v2838_v49  ;;  %v1527_v25 = vmul.f32 %v2880_v61, %v2880_v61 }
 0x178   : > { %1239 = vst [vmem:[%s2203_s25 + $0x1a0] sm:$0xff] %v998_v13  ;;  %1303 = vst [vmem:[%s2203_s25 + $0x3a0] sm:$0xff] %v2936_v15  ;;  %v1338_v45 = vadd.f32 %v1337_v33, %v2852_v53  ;;  %v1530_v16 = vmul.f32 %v2922_v9, %v2922_v9 }
 0x179   : > { %v1000_v17 = vpop.f32.mrf.mxu0  ;;  %v2947_v19 = vpop.f32.mrf.mxu1  ;;  %v1696_v22 = vadd.f32 %v1695_v27, %v1522_v2  ;;  %v1628_v12 = vadd.f32 %v1627_v29, %v1523_v30  ;;  %v1407_v49 = vadd.f32 %v1406_v41, %v2866_v57  ;;  %v1529_v29 = vmul.f32 %v2908_v5, %v2908_v5 }
 0x17a   : > { %3294 = vst [vmem:[#allocation19_spill] sm:$0xff] %v2947_v19  ;;  %1240 = vst [vmem:[%s2203_s25 + $0x1a8] sm:$0xff] %v1000_v17  ;;  %v1339_v53 = vadd.f32 %v1338_v45, %v2880_v61  ;;  %v1532_v45 = vmul.f32 %v1000_v17, %v1000_v17 }
 0x17b   : > { %1304 = vst [vmem:[%s2203_s25 + $0x3a8] sm:$0xff] %v2947_v19  ;;  %v1002_v21 = vpop.f32.mrf.mxu0  ;;  %v2958_v23 = vpop.f32.mrf.mxu1  ;;  %v1697_v2 = vadd.f32 %v1696_v22, %v1524_v31  ;;  %v1629_v30 = vadd.f32 %v1628_v12, %v1525_v39  ;;  %v1408_v57 = vadd.f32 %v1407_v49, %v2894_v1  ;;  %v1531_v12 = vmul.f32 %v998_v13, %v998_v13 }
 0x17c   : > { %3295 = vst [vmem:[#allocation20_spill] sm:$0xff] %v2958_v23  ;;  %1241 = vst [vmem:[%s2203_s25 + $0x1b0] sm:$0xff] %v1002_v21  ;;  %v1340_v61 = vadd.f32 %v1339_v53, %v2908_v5 }
 0x17d   : > { %1305 = vst [vmem:[%s2203_s25 + $0x3b0] sm:$0xff] %v2958_v23  ;;  %v1004_v18 = vpop.f32.mrf.mxu0  ;;  %v2969_v27 = vpop.f32.mrf.mxu1  ;;  %v1698_v31 = vadd.f32 %v1697_v2, %v1526_v8  ;;  %v1630_v39 = vadd.f32 %v1629_v30, %v1527_v25  ;;  %v1409_v23 = vadd.f32 %v1408_v57, %v2922_v9  ;;  %v1533_v25 = vmul.f32 %v1002_v21, %v1002_v21 }
 0x17e   : > { %3296 = vst [vmem:[#allocation21_spill] sm:$0xff] %v2969_v27  ;;  %1242 = vst [vmem:[%s2203_s25 + $0x1b8] sm:$0xff] %v1004_v18  ;;  %v1341_v19 = vadd.f32 %v1340_v61, %v998_v13  ;;  %v1534_v5 = vmul.f32 %v1004_v18, %v1004_v18 }
 0x17f   : > { %1306 = vst [vmem:[%s2203_s25 + $0x3b8] sm:$0xff] %v2969_v27  ;;  %v1008_v33 = vpop.f32.mrf.mxu0  ;;  %v2980_v22 = vpop.f32.mrf.mxu1  ;;  %v1699_v41 = vadd.f32 %v1698_v31, %v1528_v20  ;;  %v1631_v27 = vadd.f32 %v1630_v39, %v1529_v29  ;;  %v1410_v53 = vadd.f32 %v1409_v23, %v1000_v17 }
 0x180   : > { %3297 = vst [vmem:[#allocation22_spill] sm:$0xff] %v2980_v22  ;;  %1243 = vst [vmem:[%s2203_s25 + $0x1c0] sm:$0xff] %v1008_v33  ;;  %v1342_v31 = vadd.f32 %v1341_v19, %v1002_v21 }
 0x181   : > { %1307 = vst [vmem:[%s2203_s25 + $0x3c0] sm:$0xff] %v2980_v22  ;;  %v1010_v8 = vpop.f32.mrf.mxu0  ;;  %v2987_v2 = vpop.f32.mrf.mxu1  ;;  %v1700_v1 = vadd.f32 %v1699_v41, %v1530_v16  ;;  %v1632_v20 = vadd.f32 %v1631_v27, %v1531_v12  ;;  %v1535_v22 = vmul.f32 %v1008_v33, %v1008_v33  ;;  %v1411_v57 = vadd.f32 %v1410_v53, %v1004_v18 }
 0x182   : > { %1244 = vst [vmem:[%s2203_s25 + $0x1c8] sm:$0xff] %v1010_v8  ;;  %1308 = vst [vmem:[%s2203_s25 + $0x3c8] sm:$0xff] %v2987_v2  ;;  %v1536_v13 = vmul.f32 %v1010_v8, %v1010_v8  ;;  %v1343_v61 = vadd.f32 %v1342_v31, %v1008_v33 }
 0x183   : > { %v1012_v30 = vpop.f32.mrf.mxu0  ;;  %v2993_v49 = vpop.f32.mrf.mxu1  ;;  %v1701_v9 = vadd.f32 %v1700_v1, %v1532_v45  ;;  %v1633_v16 = vadd.f32 %v1632_v20, %v1533_v25  ;;  %v1412_v12 = vadd.f32 %v1411_v57, %v1010_v8 }
 0x184   : > { %1245 = vst [vmem:[%s2203_s25 + $0x1d0] sm:$0xff] %v1012_v30  ;;  %1309 = vst [vmem:[%s2203_s25 + $0x3d0] sm:$0xff] %v2993_v49  ;;  %v1537_v41 = vmul.f32 %v1012_v30, %v1012_v30  ;;  %v1344_v45 = vadd.f32 %v1343_v61, %v1012_v30 }
 0x185   : > { %v1014_v29 = vpop.f32.mrf.mxu0  ;;  %v2998_v39 = vpop.f32.mrf.mxu1  ;;  %v1702_v17 = vadd.f32 %v1701_v9, %v1534_v5  ;;  %v1634_v27 = vadd.f32 %v1633_v16, %v1535_v22 }
 0x186   : > { %1246 = vst [vmem:[%s2203_s25 + $0x1d8] sm:$0xff] %v1014_v29  ;;  %1310 = vst [vmem:[%s2203_s25 + $0x3d8] sm:$0xff] %v2998_v39  ;;  %v1538_v19 = vmul.f32 %v1014_v29, %v1014_v29  ;;  %v1413_v20 = vadd.f32 %v1412_v12, %v1014_v29  ;;  %v1543_v29 = vmul.f32 %v2393_v32, %v2393_v32 }
 0x187   : > { %v1018_v21 = vpop.f32.mrf.mxu0  ;;  %v3003_v23 = vpop.f32.mrf.mxu1  ;;  %v1703_v18 = vadd.f32 %v1702_v17, %v1536_v13  ;;  %v1635_v5 = vadd.f32 %v1634_v27, %v1537_v41 }
 0x188   : > { %1247 = vst [vmem:[%s2203_s25 + $0x1e0] sm:$0xff] %v1018_v21  ;;  %v1539_v1 = vmul.f32 %v1018_v21, %v1018_v21  ;;  %1311 = vst [vmem:[%s2203_s25 + $0x3e0] sm:$0xff] %v3003_v23  ;;  %v1345_v53 = vadd.f32 %v1344_v45, %v1018_v21  ;;  %v1544_v45 = vmul.f32 %v2401_v34, %v2401_v34 }
 0x189   : > { %v1020_v33 = vpop.f32.mrf.mxu0  ;;  %v3008_v25 = vpop.f32.mrf.mxu1  ;;  %v1704_v22 = vadd.f32 %v1703_v18, %v1538_v19 }
 0x18a   : > { %1248 = vst [vmem:[%s2203_s25 + $0x1e8] sm:$0xff] %v1020_v33  ;;  %v1540_v31 = vmul.f32 %v1020_v33, %v1020_v33  ;;  %1312 = vst [vmem:[%s2203_s25 + $0x3e8] sm:$0xff] %v3008_v25  ;;  %v1636_v9 = vadd.f32 %v1635_v5, %v1539_v1  ;;  %v1414_v16 = vadd.f32 %v1413_v20, %v1020_v33 }
 0x18b   : > { %v1022_v8 = vpop.f32.mrf.mxu0  ;;  %v3013_v30 = vpop.f32.mrf.mxu1  ;;  %v1545_v1 = vmul.f32 %v2409_v36, %v2409_v36 }
 0x18c   : > { %1249 = vst [vmem:[%s2203_s25 + $0x1f0] sm:$0xff] %v1022_v8  ;;  %v1346_v13 = vadd.f32 %v1345_v53, %v1022_v8  ;;  %v1541_v57 = vmul.f32 %v1022_v8, %v1022_v8  ;;  %1313 = vst [vmem:[%s2203_s25 + $0x3f0] sm:$0xff] %v3013_v30  ;;  %v1705_v61 = vadd.f32 %v1704_v22, %v1540_v31 }
 0x18d   : > { %v1024_v41 = vpop.f32.mrf.mxu0  ;;  %v3020_v17 = vpop.f32.mrf.mxu1  ;;  %v1547_v53 = vmul.f32 %v2425_v40, %v2425_v40 }
 0x18e   : > { %v1347_v19 = vadd.f32 %v1346_v13, %v2393_v32  ;;  %v1637_v21 = vadd.f32 %v1636_v9, %v1541_v57  ;;  %1250 = vst [vmem:[%s2203_s25 + $0x1f8] sm:$0xff] %v1024_v41  ;;  %v1415_v27 = vadd.f32 %v1414_v16, %v1024_v41  ;;  %v1542_v12 = vmul.f32 %v1024_v41, %v1024_v41 }
 0x18f   : > { %1314 = vst [vmem:[%s2203_s25 + $0x3f8] sm:$0xff] %v3020_v17  ;;  %v1546_v32 = vmul.f32 %v2417_v38, %v2417_v38  ;;  %v1548_v16 = vmul.f32 %v2433_v42, %v2433_v42 }
 0x190   : > { %v1348_v18 = vadd.f32 %v1347_v19, %v2409_v36  ;;  %v1638_v33 = vadd.f32 %v1637_v21, %v1543_v29  ;;  %v1416_v5 = vadd.f32 %v1415_v27, %v2401_v34  ;;  %v1706_v20 = vadd.f32 %v1705_v61, %v1542_v12 }
 0x191   : > { %v1549_v36 = vmul.f32 %v2441_v44, %v2441_v44  ;;  %v1550_v61 = vmul.f32 %v2449_v46, %v2449_v46  ;;  %v1552_v27 = vmul.f32 %v2465_v50, %v2465_v50 }
 0x192   : > { %v1349_v31 = vadd.f32 %v1348_v18, %v2425_v40  ;;  %v1639_v22 = vadd.f32 %v1638_v33, %v1545_v1  ;;  %v1417_v8 = vadd.f32 %v1416_v5, %v2417_v38  ;;  %v1707_v9 = vadd.f32 %v1706_v20, %v1544_v45 }
 0x193   : > { %v1551_v40 = vmul.f32 %v2457_v48, %v2457_v48  ;;  %v1554_v18 = vmul.f32 %v2481_v54, %v2481_v54 }
 0x194   : > { %v1350_v34 = vadd.f32 %v1349_v31, %v2441_v44  ;;  %v1640_v13 = vadd.f32 %v1639_v22, %v1547_v53  ;;  %v1418_v57 = vadd.f32 %v1417_v8, %v2433_v42  ;;  %v1708_v29 = vadd.f32 %v1707_v9, %v1546_v32 }
 0x195   : > { %v1553_v44 = vmul.f32 %v2473_v52, %v2473_v52  ;;  %v1556_v32 = vmul.f32 %v2497_v58, %v2497_v58  ;;  %v1558_v8 = vmul.f32 %v2513_v62, %v2513_v62 }
 0x196   : > { %v1351_v38 = vadd.f32 %v1350_v34, %v2457_v48  ;;  %v1641_v41 = vadd.f32 %v1640_v13, %v1549_v36  ;;  %v1419_v19 = vadd.f32 %v1418_v57, %v2449_v46  ;;  %v1709_v21 = vadd.f32 %v1708_v29, %v1548_v16  ;;  %v3298_v34 = vld [vmem:[#allocation2_spill] sm:$0xff] }
 0x197   : > { %v1555_v48 = vmul.f32 %v2489_v56, %v2489_v56  ;;  %v1560_v13 = vmul.f32 %v3298_v34, %v3298_v34 }
 0x198   : > { %v1352_v42 = vadd.f32 %v1351_v38, %v2473_v52  ;;  %v1642_v12 = vadd.f32 %v1641_v41, %v1551_v40  ;;  %v1420_v45 = vadd.f32 %v1419_v19, %v2465_v50  ;;  %v1710_v1 = vadd.f32 %v1709_v21, %v1550_v61  ;;  %v3300_v38 = vld [vmem:[#allocation4_spill] sm:$0xff]  ;;  %v3301_v19 = vld [vmem:[#allocation5_spill] sm:$0xff] }
 0x199   : > { %v1557_v52 = vmul.f32 %v2505_v60, %v2505_v60  ;;  %v1562_v41 = vmul.f32 %v3300_v38, %v3300_v38 }
 0x19a   : > { %v1353_v46 = vadd.f32 %v1352_v42, %v2489_v56  ;;  %v1643_v33 = vadd.f32 %v1642_v12, %v1553_v44  ;;  %v1421_v5 = vadd.f32 %v1420_v45, %v2481_v54  ;;  %v1711_v20 = vadd.f32 %v1710_v1, %v1552_v27  ;;  %v3302_v42 = vld [vmem:[#allocation6_spill] sm:$0xff]  ;;  %v3303_v45 = vld [vmem:[#allocation7_spill] sm:$0xff] }
 0x19b   : > { %v1559_v56 = vmul.f32 %v2521_v0, %v2521_v0  ;;  %v1564_v12 = vmul.f32 %v3302_v42, %v3302_v42  ;;  %v1565_v1 = vmul.f32 %v3303_v45, %v3303_v45 }
 0x19c   : > { %v1354_v50 = vadd.f32 %v1353_v46, %v2505_v60  ;;  %v1644_v53 = vadd.f32 %v1643_v33, %v1555_v48  ;;  %v1422_v31 = vadd.f32 %v1421_v5, %v2497_v58  ;;  %v1712_v22 = vadd.f32 %v1711_v20, %v1554_v18  ;;  %v3299_v60 = vld [vmem:[#allocation3_spill] sm:$0xff]  ;;  %v3304_v5 = vld [vmem:[#allocation8_spill] sm:$0xff] }
 0x19d   : > { %v1561_v57 = vmul.f32 %v3299_v60, %v3299_v60  ;;  %v1566_v20 = vmul.f32 %v3304_v5, %v3304_v5 }
 0x19e   : > { %v1645_v54 = vadd.f32 %v1644_v53, %v1557_v52  ;;  %v1423_v9 = vadd.f32 %v1422_v31, %v2513_v62  ;;  %v1713_v16 = vadd.f32 %v1712_v22, %v1556_v32  ;;  %v1355_v36 = vadd.f32 %v1354_v50, %v2521_v0  ;;  %v3305_v32 = vld [vmem:[#allocation9_spill] sm:$0xff] }
 0x19f   : > { %v1563_v62 = vmul.f32 %v3301_v19, %v3301_v19  ;;  %v1567_v52 = vmul.f32 %v3305_v32, %v3305_v32 }
 0x1a0   : > { %v1424_v58 = vadd.f32 %v1423_v9, %v3298_v34  ;;  %v1714_v29 = vadd.f32 %v1713_v16, %v1558_v8  ;;  %v1356_v61 = vadd.f32 %v1355_v36, %v3299_v60  ;;  %v1646_v40 = vadd.f32 %v1645_v54, %v1559_v56  ;;  %v3306_v8 = vld [vmem:[#allocation10_spill] sm:$0xff]  ;;  %v3307_v54 = vld [vmem:[#allocation11_spill] sm:$0xff]  ;;  %v3308_v60 = vld [vmem:[#allocation12_spill] sm:$0xff] }
 0x1a1   : > { %v1568_v56 = vmul.f32 %v3306_v8, %v3306_v8  ;;  %v1569_v9 = vmul.f32 %v3307_v54, %v3307_v54 }
 0x1a2   : > { %v1715_v21 = vadd.f32 %v1714_v29, %v1560_v13  ;;  %v1357_v0 = vadd.f32 %v1356_v61, %v3301_v19  ;;  %v1647_v27 = vadd.f32 %v1646_v40, %v1561_v57  ;;  %v1425_v44 = vadd.f32 %v1424_v58, %v3300_v38  ;;  %v3309_v58 = vld [vmem:[#allocation13_spill] sm:$0xff]  ;;  %v3310_v19 = vld [vmem:[#allocation14_spill] sm:$0xff] }
 0x1a3   : > { %v1570_v57 = vmul.f32 %v3308_v60, %v3308_v60  ;;  %v1571_v29 = vmul.f32 %v3309_v58, %v3309_v58 }
 0x1a4   : > { %v1358_v18 = vadd.f32 %v1357_v0, %v3303_v45  ;;  %v1648_v48 = vadd.f32 %v1647_v27, %v1563_v62  ;;  %v1426_v46 = vadd.f32 %v1425_v44, %v3302_v42  ;;  %v1716_v33 = vadd.f32 %v1715_v21, %v1562_v41  ;;  %v3311_v21 = vld [vmem:[#allocation15_spill] sm:$0xff]  ;;  %v3312_v45 = vld [vmem:[#allocation16_spill] sm:$0xff] }
 0x1a5   : > { %v1572_v62 = vmul.f32 %v3310_v19, %v3310_v19  ;;  %v1573_v0 = vmul.f32 %v3311_v21, %v3311_v21 }
 0x1a6   : > { %v1359_v50 = vadd.f32 %v1358_v18, %v3305_v32  ;;  %v1649_v53 = vadd.f32 %v1648_v48, %v1565_v1  ;;  %v1427_v31 = vadd.f32 %v1426_v46, %v3304_v5  ;;  %v1717_v22 = vadd.f32 %v1716_v33, %v1564_v12  ;;  %v3313_v18 = vld [vmem:[#allocation17_spill] sm:$0xff]  ;;  %v3314_v32 = vld [vmem:[#allocation18_spill] sm:$0xff] }
 0x1a7   : > { %v1574_v1 = vmul.f32 %v3312_v45, %v3312_v45  ;;  %v1575_v48 = vmul.f32 %v3313_v18, %v3313_v18 }
 0x1a8   : > { %v1360_v16 = vadd.f32 %v1359_v50, %v3307_v54  ;;  %v1650_v36 = vadd.f32 %v1649_v53, %v1567_v52  ;;  %v1428_v34 = vadd.f32 %v1427_v31, %v3306_v8  ;;  %v1718_v13 = vadd.f32 %v1717_v22, %v1566_v20 }
 0x1a9   : > { %v1576_v52 = vmul.f32 %v3314_v32, %v3314_v32  ;;  %v1577_v50 = vmul.f32 %v2686_v24, %v2686_v24  ;;  %v1579_v54 = vmul.f32 %v2714_v35, %v2714_v35 }
 0x1aa   : > { %v1361_v61 = vadd.f32 %v1360_v16, %v3309_v58  ;;  %v1651_v40 = vadd.f32 %v1650_v36, %v1569_v9  ;;  %v1429_v38 = vadd.f32 %v1428_v34, %v3308_v60  ;;  %v1719_v41 = vadd.f32 %v1718_v13, %v1568_v56 }
 0x1ab   : > { %v1578_v56 = vmul.f32 %v2700_v10, %v2700_v10  ;;  %v1580_v13 = vmul.f32 %v2728_v26, %v2728_v26 }
 0x1ac   : > { %v1362_v27 = vadd.f32 %v1361_v61, %v3311_v21  ;;  %v1652_v44 = vadd.f32 %v1651_v40, %v1571_v29  ;;  %v1430_v42 = vadd.f32 %v1429_v38, %v3310_v19  ;;  %v1720_v12 = vadd.f32 %v1719_v41, %v1570_v57 }
 0x1ad   : > { %v1582_v61 = vmul.f32 %v2756_v4, %v2756_v4  ;;  %v1584_v19 = vmul.f32 %v2784_v14, %v2784_v14 }
 0x1ae   : > { %v1363_v46 = vadd.f32 %v1362_v27, %v3313_v18  ;;  %v1653_v33 = vadd.f32 %v1652_v44, %v1573_v0  ;;  %v1431_v5 = vadd.f32 %v1430_v42, %v3312_v45  ;;  %v1721_v20 = vadd.f32 %v1720_v12, %v1572_v62 }
 0x1af   : > { %v1586_v27 = vmul.f32 %v2812_v43, %v2812_v43  ;;  %v1588_v45 = vmul.f32 %v2840_v51, %v2840_v51 }
 0x1b0   : > { %v1364_v53 = vadd.f32 %v1363_v46, %v2686_v24  ;;  %v1654_v31 = vadd.f32 %v1653_v33, %v1575_v48  ;;  %v1432_v22 = vadd.f32 %v1431_v5, %v3314_v32  ;;  %v1722_v8 = vadd.f32 %v1721_v20, %v1574_v1 }
 0x1b1   : > { %v1581_v24 = vmul.f32 %v2742_v6, %v2742_v6  ;;  %v1590_v46 = vmul.f32 %v2868_v59, %v2868_v59  ;;  %v1592_v32 = vmul.f32 %v2896_v3, %v2896_v3 }
 0x1b2   : > { %v1655_v9 = vadd.f32 %v1654_v31, %v1577_v50  ;;  %v1433_v16 = vadd.f32 %v1432_v22, %v2700_v10  ;;  %v1723_v36 = vadd.f32 %v1722_v8, %v1576_v52  ;;  %v1365_v34 = vadd.f32 %v1364_v53, %v2714_v35 }
 0x1b3   : > { %v1583_v10 = vmul.f32 %v2770_v28, %v2770_v28  ;;  %v1594_v31 = vmul.f32 %v2924_v11, %v2924_v11 }
 0x1b4   : > { %v1724_v60 = vadd.f32 %v1723_v36, %v1578_v56  ;;  %v1656_v57 = vadd.f32 %v1655_v9, %v1579_v54  ;;  %v1434_v58 = vadd.f32 %v1433_v16, %v2728_v26  ;;  %v1366_v29 = vadd.f32 %v1365_v34, %v2742_v6  ;;  %v3315_v54 = vld [vmem:[#allocation19_spill] sm:$0xff]  ;;  %v3316_v16 = vld [vmem:[#allocation20_spill] sm:$0xff] }
 0x1b5   : > { %v1585_v26 = vmul.f32 %v2798_v37, %v2798_v37  ;;  %v1596_v9 = vmul.f32 %v3315_v54, %v3315_v54 }
 0x1b6   : > { %v1725_v40 = vadd.f32 %v1724_v60, %v1580_v13  ;;  %v1657_v35 = vadd.f32 %v1656_v57, %v1581_v24  ;;  %v1435_v38 = vadd.f32 %v1434_v58, %v2756_v4  ;;  %v1367_v41 = vadd.f32 %v1366_v29, %v2770_v28  ;;  %v3317_v24 = vld [vmem:[#allocation21_spill] sm:$0xff]  ;;  %v3318_v57 = vld [vmem:[#allocation22_spill] sm:$0xff] }
 0x1b7   : > { %v1587_v4 = vmul.f32 %v2826_v47, %v2826_v47  ;;  %v1598_v60 = vmul.f32 %v3317_v24, %v3317_v24 }
 0x1b8   : > { %v1726_v62 = vadd.f32 %v1725_v40, %v1582_v61  ;;  %v1658_v6 = vadd.f32 %v1657_v35, %v1583_v10  ;;  %v1436_v21 = vadd.f32 %v1435_v38, %v2784_v14  ;;  %v1368_v0 = vadd.f32 %v1367_v41, %v2798_v37 }
 0x1b9   : > { %v1589_v14 = vmul.f32 %v2854_v55, %v2854_v55  ;;  %v1600_v10 = vmul.f32 %v2987_v2, %v2987_v2  ;;  %v1601_v40 = vmul.f32 %v2993_v49, %v2993_v49 }
 0x1ba   : > { %v1727_v44 = vadd.f32 %v1726_v62, %v1584_v19  ;;  %v1659_v28 = vadd.f32 %v1658_v6, %v1585_v26  ;;  %v1437_v42 = vadd.f32 %v1436_v21, %v2812_v43  ;;  %v1369_v12 = vadd.f32 %v1368_v0, %v2826_v47 }
 0x1bb   : > { %v1591_v43 = vmul.f32 %v2882_v63, %v2882_v63  ;;  %v1602_v26 = vmul.f32 %v2998_v39, %v2998_v39  ;;  %v1603_v62 = vmul.f32 %v3003_v23, %v3003_v23 }
 0x1bc   : > { %v1728_v1 = vadd.f32 %v1727_v44, %v1586_v27  ;;  %v1660_v37 = vadd.f32 %v1659_v28, %v1587_v4  ;;  %v1438_v18 = vadd.f32 %v1437_v42, %v2840_v51  ;;  %v1370_v48 = vadd.f32 %v1369_v12, %v2854_v55 }
 0x1bd   : > { %v1593_v51 = vmul.f32 %v2910_v7, %v2910_v7  ;;  %v1604_v4 = vmul.f32 %v3008_v25, %v3008_v25  ;;  %v1606_v12 = vmul.f32 %v3020_v17, %v3020_v17 }
 0x1be   : > { %v1729_v33 = vadd.f32 %v1728_v1, %v1588_v45  ;;  %v1661_v47 = vadd.f32 %v1660_v37, %v1589_v14  ;;  %v1439_v5 = vadd.f32 %v1438_v18, %v2868_v59  ;;  %v1371_v20 = vadd.f32 %v1370_v48, %v2882_v63 }
 0x1bf   : > { %v1595_v59 = vmul.f32 %v2936_v15, %v2936_v15 }
 0x1c0   : > { %v1730_v52 = vadd.f32 %v1729_v33, %v1590_v46  ;;  %v1662_v55 = vadd.f32 %v1661_v47, %v1591_v43  ;;  %v1440_v50 = vadd.f32 %v1439_v5, %v2896_v3  ;;  %v1372_v53 = vadd.f32 %v1371_v20, %v2910_v7 }
 0x1c1   : > { %v1597_v3 = vmul.f32 %v3316_v16, %v3316_v16  ;;  %v2161_v46 = vmov 1966171168   ;;  %v1460_v33 = vlaneseq }
 0x1c2   : > { %v1731_v22 = vadd.f32 %v1730_v52, %v1592_v32  ;;  %v1663_v63 = vadd.f32 %v1662_v55, %v1593_v51  ;;  %v1441_v8 = vadd.f32 %v1440_v50, %v2924_v11  ;;  %v1373_v56 = vadd.f32 %v1372_v53, %v2936_v15 }
 0x1c3   : > { %v1599_v11 = vmul.f32 %v3318_v57, %v3318_v57  ;;  %v1458_v43 = vunpack.c.l.s4 %v2161_v46  ;;  %v1461_v50 = vshrl.u32 %v1460_v33, 7  ;;  %vm1475_vm3 = vcmp.lt.s32.totalorder %v1460_v33, 256 }
 0x1c4   : > { %v1732_v36 = vadd.f32 %v1731_v22, %v1594_v31  ;;  %v1664_v7 = vadd.f32 %v1663_v63, %v1595_v59  ;;  %v1442_v34 = vadd.f32 %v1441_v8, %v3315_v54  ;;  %v1374_v13 = vadd.f32 %v1373_v56, %v3316_v16 }
 0x1c5   : > { %v1459_v55 = vunpack.c.0.s8 %v1458_v43 }
 0x1c6   : > { %v1733_v58 = vadd.f32 %v1732_v36, %v1596_v9  ;;  %v1665_v15 = vadd.f32 %v1664_v7, %v1597_v3  ;;  %v1443_v29 = vadd.f32 %v1442_v34, %v3317_v24  ;;  %v1375_v61 = vadd.f32 %v1374_v13, %v3318_v57  ;;  %v1315_v24 = vld [vmem:[%s3233_s3] sm:$0x3] }
 0x1c7   : > { %v1462_v9 = vsub.s32 %v1459_v55, %v1461_v50 }
 0x1c8   : > { %v1734_v35 = vadd.f32 %v1733_v58, %v1598_v60  ;;  %v1666_v38 = vadd.f32 %v1665_v15, %v1599_v11  ;;  %v1444_v41 = vadd.f32 %v1443_v29, %v2987_v2  ;;  %v1376_v19 = vadd.f32 %v1375_v61, %v2993_v49  ;;  %v1478_v11 = vld [vmem:[%s3234_s4] sm:$0x3] }
 0x1c9   : > { %v1605_v2 = vmul.f32 %v3013_v30, %v3013_v30 }
 0x1ca   : > { %v1735_v6 = vadd.f32 %v1734_v35, %v1600_v10  ;;  %v1667_v21 = vadd.f32 %v1666_v38, %v1601_v40  ;;  %v1445_v0 = vadd.f32 %v1444_v41, %v2998_v39  ;;  %v1377_v27 = vadd.f32 %v1376_v19, %v3003_v23 }
 0x1cc   : > { %v1736_v44 = vadd.f32 %v1735_v6, %v1602_v26  ;;  %v1668_v49 = vadd.f32 %v1667_v21, %v1603_v62  ;;  %v1446_v28 = vadd.f32 %v1445_v0, %v3008_v25  ;;  %v1378_v42 = vadd.f32 %v1377_v27, %v3013_v30 }
 0x1ce   : > { %v1737_v45 = vadd.f32 %v1736_v44, %v1604_v4  ;;  %v1379_v14 = vrot.slane %v1378_v42, 4  ;;  %v1669_v39 = vadd.f32 %v1668_v49, %v1605_v2  ;;  %v1447_v23 = vadd.f32 %v1446_v28, %v3020_v17 }
 0x1d0   : > { %v1380_v1 = vadd.f32 %v1379_v14, %v1378_v42  ;;  %v1670_v37 = vrot.slane %v1669_v39, 4  ;;  %v1448_v18 = vrot.slane %v1447_v23, 4  ;;  %v1738_v48 = vadd.f32 %v1737_v45, %v1606_v12 }
 0x1d2   : > { %v1381_v47 = vrot.slane %v1380_v1, 2  ;;  %v1671_v5 = vadd.f32 %v1670_v37, %v1669_v39  ;;  %v1449_v25 = vadd.f32 %v1448_v18, %v1447_v23  ;;  %v1739_v20 = vrot.slane %v1738_v48, 4 }
 0x1d4   : > { %v1382_v30 = vadd.f32 %v1381_v47, %v1380_v1  ;;  %v1672_v32 = vrot.slane %v1671_v5, 2  ;;  %v1450_v51 = vrot.slane %v1449_v25, 2  ;;  %v1740_v52 = vadd.f32 %v1739_v20, %v1738_v48 }
 0x1d6   : > { %v1383_v53 = vrot.slane %v1382_v30, 1  ;;  %v1673_v31 = vadd.f32 %v1672_v32, %v1671_v5  ;;  %v1451_v17 = vadd.f32 %v1450_v51, %v1449_v25  ;;  %v1741_v59 = vrot.slane %v1740_v52, 2 }
 0x1d8   : > { %v1674_v22 = vrot.slane %v1673_v31, 1  ;;  %v1452_v63 = vrot.slane %v1451_v17, 1  ;;  %v1742_v8 = vadd.f32 %v1741_v59, %v1740_v52  ;;  %v1384_v56 = vadd.f32 %v1383_v53, %v1382_v30 }
 0x1da   : > { %v1453_v54 = vadd.f32 %v1452_v63, %v1451_v17  ;;  %v1743_v16 = vrot.slane %v1742_v8, 1  ;;  %v1675_v3 = vadd.f32 %v1674_v22, %v1673_v31 }
 0x1dc   : > { %v1456_v36 = vcombine.low %v1384_v56, %v1453_v54  ;;  %v1744_v7 = vadd.f32 %v1743_v16, %v1742_v8 }
 0x1de   : > { %v1463_v34 = vrot.slane %v1456_v36, %v1462_v9  ;;  %v1747_v13 = vcombine.low %v1675_v3, %v1744_v7 }
 0x1e0   : > { %v1470_v60 = vrot.slane %v1463_v34, %v1462_v9  ;;  %v1754_v57 = vrot.slane %v1747_v13, %v1462_v9 }
 0x1e2   : > { %v1472_v58 = vadd.f32 %v1470_v60, %v1315_v24  ;;  %v1761_v15 = vrot.slane %v1754_v57, %v1462_v9 }
 0x1e4   : > { %1477 = vst.msk [vmem:[%s3233_s3] sm:$0x3] %vm1475_vm3, %v1472_v58  ;;  %v1763_v29 = vadd.f32 %v1761_v15, %v1478_v11 }
 0x1e6   : > { %1764 = vst.msk [vmem:[%s3234_s4] sm:$0x3] %vm1475_vm3, %v1763_v29 }
 0x1e7 PF: > { %s15_s15 = sadd.s32 1, %s2158_s15  }
 0x1e8   : > { %p12_p5 = scmp.ge.s32.totalorder %s15_s15, 4  }
 0x1ea   :  { %14 = sbr.rel (!%p12_p5) target bundleno = 1 (0x1), region = 78 }

// kernel: residual_block3d_pallas.7
= control target key start
LH: loop header
LB: loop body
LE: loop exit
PB: predicated region body
PF: predicated region fallthrough
CT: control target
= control target key end

     0   :  { %s882_s12 = smov 0   ;;  %s1369_s0 = inlined_call_operand.vmem [shape: f32[1024,256], index: 0, kind: input, shape index: {}]   ;;  %s1370_s1 = inlined_call_operand.vmem [shape: f32[1,256], index: 1, kind: input, shape index: {}]   ;;  %s1371_s2 = inlined_call_operand.vmem [shape: f32[1,256], index: 2, kind: input, shape index: {}]   ;;  %s1372_s3 = inlined_call_operand.vmem [shape: f32[1024,128], index: 3, kind: output, shape index: {}]  }
   0x1 LB: > { %s833_s13 = sadd.s32 4294967295, %s860_s12   ;;  %p837_p0 = scmp.ge.s32.totalorder %s860_s12, 1  ;;  %s860_s12 = sphi %s882_s12, %s13_s12  }
   0x2   : > { %p139_p1 = scmp.lt.s32.totalorder %s860_s12, 3 }
   0x4   : > { %p140_p2 = pnand %p837_p0, %p139_p1 }
   0x5   : > { %s838_s14 = sshll.u32 (!%p140_p2), %s833_s13, 6 }
   0x6   : > { %143 = sbr.rel (%p140_p2) target bundleno = 121 (0x79), region = 32  ;;  %p165_p3 = scmp.lt.s32.totalorder (!%p140_p2), %s838_s14, 127 }
   0xb   : > { %v307_v0 = vlaneseq  ;;  %s1374_s14 = smov (!%p165_p3, %s838_s14), 127  ;;  %v305_v2 = vld [vmem:[%s1370_s1] sm:$0x3] }
   0xc   : > { %v445_v3 = vld [vmem:[%s1371_s2] sm:$0x3]  ;;  %s845_s19 = sshll.u32 %s1374_s14, 4  ;;  %s842_s23 = sshll.u32 %s1374_s14, 3 }
   0xd   : > { %v308_v1 = vshrl.u32 %v307_v0, 7  ;;  %s902_s22 = scalar_lea.vmem %s1369_s0, %s845_s19  ;;  %s945_s26 = scalar_lea.vmem %s1372_s3, %s842_s23 }
   0xe   : > { %v177_v10 = vld [vmem:[%s902_s22] sm:$0xff]  ;;  %v178_v11 = vld [vmem:[%s902_s22 + $0x8] sm:$0xff]  ;;  %v179_v12 = vld [vmem:[%s902_s22 + $0x10] sm:$0xff] }
   0xf   : > { %v309_v4 = vsub.s32 0, %v308_v1  ;;  %v313_v5 = vsub.s32 1, %v308_v1  ;;  %v180_v15 = vld [vmem:[%s902_s22 + $0x18] sm:$0xff]  ;;  %v181_v17 = vld [vmem:[%s902_s22 + $0x20] sm:$0xff]  ;;  %v182_v18 = vld [vmem:[%s902_s22 + $0x28] sm:$0xff] }
  0x10   : > { %v183_v22 = vld [vmem:[%s902_s22 + $0x30] sm:$0xff]  ;;  %v184_v23 = vld [vmem:[%s902_s22 + $0x38] sm:$0xff]  ;;  %v185_v24 = vld [vmem:[%s902_s22 + $0x40] sm:$0xff] }
  0x11   : > { %v904_v6 = vrot.slane %v305_v2, %v309_v4  ;;  %v906_v7 = vrot.slane %v305_v2, %v313_v5  ;;  %v908_v8 = vrot.slane %v445_v3, %v309_v4  ;;  %v910_v9 = vrot.slane %v445_v3, %v313_v5  ;;  %v186_v29 = vld [vmem:[%s902_s22 + $0x48] sm:$0xff]  ;;  %v187_v30 = vld [vmem:[%s902_s22 + $0x50] sm:$0xff]  ;;  %v188_v35 = vld [vmem:[%s902_s22 + $0x58] sm:$0xff] }
  0x12   : > { %v189_v44 = vld [vmem:[%s902_s22 + $0x60] sm:$0xff]  ;;  %v190_v45 = vld [vmem:[%s902_s22 + $0x68] sm:$0xff]  ;;  %v191_v50 = vld [vmem:[%s902_s22 + $0x70] sm:$0xff] }
  0x13   : > { %v317_v13 = vmul.f32 %v904_v6, %v177_v10  ;;  %v318_v14 = vmul.f32 %v906_v7, %v178_v11  ;;  %v319_v16 = vmul.f32 %v904_v6, %v179_v12  ;;  %v320_v19 = vmul.f32 %v906_v7, %v180_v15  ;;  %v192_v51 = vld [vmem:[%s902_s22 + $0x78] sm:$0xff]  ;;  %v193_v52 = vld [vmem:[%s902_s22 + $0x80] sm:$0xff]  ;;  %v194_v61 = vld [vmem:[%s902_s22 + $0x88] sm:$0xff] }
  0x14   : > { %v321_v20 = vmul.f32 %v904_v6, %v181_v17  ;;  %v322_v21 = vmul.f32 %v906_v7, %v182_v18  ;;  %v323_v28 = vmul.f32 %v904_v6, %v183_v22  ;;  %v324_v34 = vmul.f32 %v906_v7, %v184_v23  ;;  %v195_v2 = vld [vmem:[%s902_s22 + $0x90] sm:$0xff]  ;;  %v196_v3 = vld [vmem:[%s902_s22 + $0x98] sm:$0xff]  ;;  %v197_v12 = vld [vmem:[%s902_s22 + $0xa0] sm:$0xff] }
  0x15   : > { %v457_v25 = vadd.f32 %v908_v8, %v317_v13  ;;  %v458_v26 = vadd.f32 %v910_v9, %v318_v14  ;;  %v459_v27 = vadd.f32 %v908_v8, %v319_v16  ;;  %v460_v31 = vadd.f32 %v910_v9, %v320_v19  ;;  %v198_v13 = vld [vmem:[%s902_s22 + $0xa8] sm:$0xff]  ;;  %v199_v18 = vld [vmem:[%s902_s22 + $0xb0] sm:$0xff] }
  0x16   : > { %v461_v32 = vadd.f32 %v908_v8, %v321_v20  ;;  %v462_v33 = vadd.f32 %v910_v9, %v322_v21  ;;  %v463_v37 = vadd.f32 %v908_v8, %v323_v28  ;;  %v325_v38 = vmul.f32 %v904_v6, %v185_v24  ;;  %v201_v28 = vld [vmem:[%s902_s22 + $0xc0] sm:$0xff] }
  0x17   : > { %v585_v36 = vadd.f32 %v458_v26, %v457_v25  ;;  %v326_v39 = vmul.f32 %v906_v7, %v186_v29  ;;  %v586_v40 = vadd.f32 %v460_v31, %v459_v27  ;;  %v464_v42 = vadd.f32 %v910_v9, %v324_v34  ;;  %v200_v27 = vld [vmem:[%s902_s22 + $0xb8] sm:$0xff]  ;;  %v203_v34 = vld [vmem:[%s902_s22 + $0xd0] sm:$0xff] }
  0x18   : > { %v587_v41 = vadd.f32 %v462_v33, %v461_v32  ;;  %v327_v43 = vmul.f32 %v904_v6, %v187_v30  ;;  %v465_v47 = vadd.f32 %v908_v8, %v325_v38  ;;  %v328_v49 = vmul.f32 %v906_v7, %v188_v35  ;;  %v202_v33 = vld [vmem:[%s902_s22 + $0xc8] sm:$0xff] }
  0x19   : > { %v649_v46 = vmax.f32 %v585_v36, 0.0  ;;  %v466_v48 = vadd.f32 %v910_v9, %v326_v39  ;;  %v650_v53 = vmax.f32 %v586_v40, 0.0  ;;  %v588_v55 = vadd.f32 %v464_v42, %v463_v37  ;;  %v204_v39 = vld [vmem:[%s902_s22 + $0xd8] sm:$0xff] }
  0x1a   : > { %v651_v54 = vmax.f32 %v587_v41, 0.0  ;;  %v467_v56 = vadd.f32 %v908_v8, %v327_v43  ;;  %v468_v58 = vadd.f32 %v910_v9, %v328_v49  ;;  %v329_v59 = vmul.f32 %v904_v6, %v189_v44  ;;  %v205_v44 = vld [vmem:[%s902_s22 + $0xe0] sm:$0xff]  ;;  %v206_v49 = vld [vmem:[%s902_s22 + $0xe8] sm:$0xff] }
  0x1b   : > { %713 = vst [vmem:[%s945_s26] sm:$0xff] %v649_v46  ;;  %v589_v57 = vadd.f32 %v466_v48, %v465_v47  ;;  %v330_v60 = vmul.f32 %v906_v7, %v190_v45  ;;  %714 = vst [vmem:[%s945_s26 + $0x8] sm:$0xff] %v650_v53  ;;  %v652_v62 = vmax.f32 %v588_v55, 0.0  ;;  %v331_v63 = vmul.f32 %v904_v6, %v191_v50  ;;  %v207_v50 = vld [vmem:[%s902_s22 + $0xf0] sm:$0xff]  ;;  %v208_v55 = vld [vmem:[%s902_s22 + $0xf8] sm:$0xff] }
  0x1c   : > { %715 = vst [vmem:[%s945_s26 + $0x10] sm:$0xff] %v651_v54  ;;  %v332_v0 = vmul.f32 %v906_v7, %v192_v51  ;;  %v333_v1 = vmul.f32 %v904_v6, %v193_v52  ;;  %v590_v5 = vadd.f32 %v468_v58, %v467_v56  ;;  %v469_v10 = vadd.f32 %v908_v8, %v329_v59  ;;  %v209_v56 = vld [vmem:[%s902_s22 + $0x100] sm:$0xff] }
  0x1d   : > { %v653_v4 = vmax.f32 %v589_v57, 0.0  ;;  %v470_v11 = vadd.f32 %v910_v9, %v330_v60  ;;  %716 = vst [vmem:[%s945_s26 + $0x18] sm:$0xff] %v652_v62  ;;  %v471_v14 = vadd.f32 %v908_v8, %v331_v63  ;;  %v334_v16 = vmul.f32 %v906_v7, %v194_v61 }
  0x1e   : > { %v472_v15 = vadd.f32 %v910_v9, %v332_v0  ;;  %v473_v17 = vadd.f32 %v908_v8, %v333_v1  ;;  %v654_v19 = vmax.f32 %v590_v5, 0.0  ;;  %v335_v21 = vmul.f32 %v904_v6, %v195_v2  ;;  %v210_v1 = vld [vmem:[%s902_s22 + $0x108] sm:$0xff] }
  0x1f   : > { %717 = vst [vmem:[%s945_s26 + $0x20] sm:$0xff] %v653_v4  ;;  %v591_v20 = vadd.f32 %v470_v11, %v469_v10  ;;  %v336_v22 = vmul.f32 %v906_v7, %v196_v3  ;;  %v474_v24 = vadd.f32 %v910_v9, %v334_v16  ;;  %v337_v25 = vmul.f32 %v904_v6, %v197_v12  ;;  %v211_v10 = vld [vmem:[%s902_s22 + $0x110] sm:$0xff]  ;;  %v212_v11 = vld [vmem:[%s902_s22 + $0x118] sm:$0xff]  ;;  %v213_v16 = vld [vmem:[%s902_s22 + $0x120] sm:$0xff] }
  0x20   : > { %v592_v23 = vadd.f32 %v472_v15, %v471_v14  ;;  %v338_v26 = vmul.f32 %v906_v7, %v198_v13  ;;  %718 = vst [vmem:[%s945_s26 + $0x28] sm:$0xff] %v654_v19  ;;  %v475_v30 = vadd.f32 %v908_v8, %v335_v21  ;;  %v339_v32 = vmul.f32 %v904_v6, %v199_v18 }
  0x21   : > { %v655_v29 = vmax.f32 %v591_v20, 0.0  ;;  %v476_v31 = vadd.f32 %v910_v9, %v336_v22  ;;  %v593_v36 = vadd.f32 %v474_v24, %v473_v17  ;;  %v477_v37 = vadd.f32 %v908_v8, %v337_v25  ;;  %v214_v17 = vld [vmem:[%s902_s22 + $0x128] sm:$0xff]  ;;  %v215_v22 = vld [vmem:[%s902_s22 + $0x130] sm:$0xff] }
  0x22   : > { %v656_v35 = vmax.f32 %v592_v23, 0.0  ;;  %v478_v38 = vadd.f32 %v910_v9, %v338_v26  ;;  %v340_v41 = vmul.f32 %v906_v7, %v200_v27  ;;  %v479_v42 = vadd.f32 %v908_v8, %v339_v32  ;;  %v217_v32 = vld [vmem:[%s902_s22 + $0x140] sm:$0xff] }
  0x23   : > { %719 = vst [vmem:[%s945_s26 + $0x30] sm:$0xff] %v655_v29  ;;  %v594_v40 = vadd.f32 %v476_v31, %v475_v30  ;;  %v341_v43 = vmul.f32 %v904_v6, %v201_v28  ;;  %v657_v45 = vmax.f32 %v593_v36, 0.0  ;;  %v342_v47 = vmul.f32 %v906_v7, %v202_v33  ;;  %v216_v31 = vld [vmem:[%s902_s22 + $0x138] sm:$0xff] }
  0x24   : > { %720 = vst [vmem:[%s945_s26 + $0x38] sm:$0xff] %v656_v35  ;;  %v595_v46 = vadd.f32 %v478_v38, %v477_v37  ;;  %v343_v48 = vmul.f32 %v904_v6, %v203_v34  ;;  %v480_v52 = vadd.f32 %v910_v9, %v340_v41  ;;  %v344_v54 = vmul.f32 %v906_v7, %v204_v39  ;;  %v218_v37 = vld [vmem:[%s902_s22 + $0x148] sm:$0xff]  ;;  %v219_v38 = vld [vmem:[%s902_s22 + $0x150] sm:$0xff] }
  0x25   : > { %v658_v51 = vmax.f32 %v594_v40, 0.0  ;;  %v481_v53 = vadd.f32 %v908_v8, %v341_v43  ;;  %721 = vst [vmem:[%s945_s26 + $0x40] sm:$0xff] %v657_v45  ;;  %v482_v58 = vadd.f32 %v910_v9, %v342_v47  ;;  %v345_v60 = vmul.f32 %v904_v6, %v205_v44  ;;  %v220_v43 = vld [vmem:[%s902_s22 + $0x158] sm:$0xff] }
  0x26   : > { %v659_v57 = vmax.f32 %v595_v46, 0.0  ;;  %v483_v59 = vadd.f32 %v908_v8, %v343_v48  ;;  %v596_v61 = vadd.f32 %v480_v52, %v479_v42  ;;  %v484_v62 = vadd.f32 %v910_v9, %v344_v54  ;;  %v221_v48 = vld [vmem:[%s902_s22 + $0x160] sm:$0xff]  ;;  %v223_v54 = vld [vmem:[%s902_s22 + $0x170] sm:$0xff] }
  0x27   : > { %722 = vst [vmem:[%s945_s26 + $0x48] sm:$0xff] %v658_v51  ;;  %v346_v63 = vmul.f32 %v906_v7, %v206_v49  ;;  %v347_v0 = vmul.f32 %v904_v6, %v207_v50  ;;  %v597_v2 = vadd.f32 %v482_v58, %v481_v53  ;;  %v485_v3 = vadd.f32 %v908_v8, %v345_v60  ;;  %v222_v53 = vld [vmem:[%s902_s22 + $0x168] sm:$0xff]  ;;  %v225_v60 = vld [vmem:[%s902_s22 + $0x180] sm:$0xff] }
  0x28   : > { %723 = vst [vmem:[%s945_s26 + $0x50] sm:$0xff] %v659_v57  ;;  %v348_v4 = vmul.f32 %v906_v7, %v208_v55  ;;  %v349_v5 = vmul.f32 %v904_v6, %v209_v56  ;;  %v660_v12 = vmax.f32 %v596_v61, 0.0  ;;  %v598_v13 = vadd.f32 %v484_v62, %v483_v59  ;;  %v224_v59 = vld [vmem:[%s902_s22 + $0x178] sm:$0xff] }
  0x29   : > { %v486_v14 = vadd.f32 %v910_v9, %v346_v63  ;;  %v487_v15 = vadd.f32 %v908_v8, %v347_v0  ;;  %v661_v18 = vmax.f32 %v597_v2, 0.0  ;;  %v350_v20 = vmul.f32 %v906_v7, %v210_v1 }
  0x2a   : > { %v488_v19 = vadd.f32 %v910_v9, %v348_v4  ;;  %v489_v21 = vadd.f32 %v908_v8, %v349_v5  ;;  %724 = vst [vmem:[%s945_s26 + $0x58] sm:$0xff] %v660_v12  ;;  %v662_v23 = vmax.f32 %v598_v13, 0.0  ;;  %v351_v25 = vmul.f32 %v904_v6, %v211_v10  ;;  %v226_v5 = vld [vmem:[%s902_s22 + $0x188] sm:$0xff] }
  0x2b   : > { %v599_v24 = vadd.f32 %v486_v14, %v485_v3  ;;  %v352_v26 = vmul.f32 %v906_v7, %v212_v11  ;;  %725 = vst [vmem:[%s945_s26 + $0x60] sm:$0xff] %v661_v18  ;;  %v490_v28 = vadd.f32 %v910_v9, %v350_v20  ;;  %v353_v29 = vmul.f32 %v904_v6, %v213_v16  ;;  %v227_v14 = vld [vmem:[%s902_s22 + $0x190] sm:$0xff]  ;;  %v229_v20 = vld [vmem:[%s902_s22 + $0x1a0] sm:$0xff] }
  0x2c   : > { %v600_v27 = vadd.f32 %v488_v19, %v487_v15  ;;  %v354_v30 = vmul.f32 %v906_v7, %v214_v17  ;;  %726 = vst [vmem:[%s945_s26 + $0x68] sm:$0xff] %v662_v23  ;;  %v491_v34 = vadd.f32 %v908_v8, %v351_v25  ;;  %v355_v36 = vmul.f32 %v904_v6, %v215_v22  ;;  %v228_v15 = vld [vmem:[%s902_s22 + $0x198] sm:$0xff] }
  0x2d   : > { %v663_v33 = vmax.f32 %v599_v24, 0.0  ;;  %v492_v35 = vadd.f32 %v910_v9, %v352_v26  ;;  %v601_v40 = vadd.f32 %v490_v28, %v489_v21  ;;  %v493_v41 = vadd.f32 %v908_v8, %v353_v29  ;;  %v230_v21 = vld [vmem:[%s902_s22 + $0x1a8] sm:$0xff]  ;;  %v231_v26 = vld [vmem:[%s902_s22 + $0x1b0] sm:$0xff] }
  0x2e   : > { %v664_v39 = vmax.f32 %v600_v27, 0.0  ;;  %v494_v42 = vadd.f32 %v910_v9, %v354_v30  ;;  %v356_v45 = vmul.f32 %v906_v7, %v216_v31  ;;  %v495_v46 = vadd.f32 %v908_v8, %v355_v36  ;;  %v233_v36 = vld [vmem:[%s902_s22 + $0x1c0] sm:$0xff] }
  0x2f   : > { %727 = vst [vmem:[%s945_s26 + $0x70] sm:$0xff] %v663_v33  ;;  %v602_v44 = vadd.f32 %v492_v35, %v491_v34  ;;  %v357_v47 = vmul.f32 %v904_v6, %v217_v32  ;;  %v665_v49 = vmax.f32 %v601_v40, 0.0  ;;  %v358_v51 = vmul.f32 %v906_v7, %v218_v37  ;;  %v232_v35 = vld [vmem:[%s902_s22 + $0x1b8] sm:$0xff] }
  0x30   : > { %728 = vst [vmem:[%s945_s26 + $0x78] sm:$0xff] %v664_v39  ;;  %v603_v50 = vadd.f32 %v494_v42, %v493_v41  ;;  %v359_v52 = vmul.f32 %v904_v6, %v219_v38  ;;  %v496_v56 = vadd.f32 %v910_v9, %v356_v45  ;;  %v360_v58 = vmul.f32 %v906_v7, %v220_v43  ;;  %v234_v41 = vld [vmem:[%s902_s22 + $0x1c8] sm:$0xff]  ;;  %v235_v42 = vld [vmem:[%s902_s22 + $0x1d0] sm:$0xff] }
  0x31   : > { %v666_v55 = vmax.f32 %v602_v44, 0.0  ;;  %v497_v57 = vadd.f32 %v908_v8, %v357_v47  ;;  %729 = vst [vmem:[%s945_s26 + $0x80] sm:$0xff] %v665_v49  ;;  %v498_v62 = vadd.f32 %v910_v9, %v358_v51  ;;  %v361_v0 = vmul.f32 %v904_v6, %v221_v48  ;;  %v236_v47 = vld [vmem:[%s902_s22 + $0x1d8] sm:$0xff] }
  0x32   : > { %v667_v61 = vmax.f32 %v603_v50, 0.0  ;;  %v499_v63 = vadd.f32 %v908_v8, %v359_v52  ;;  %v604_v1 = vadd.f32 %v496_v56, %v495_v46  ;;  %v500_v2 = vadd.f32 %v910_v9, %v360_v58  ;;  %v237_v52 = vld [vmem:[%s902_s22 + $0x1e0] sm:$0xff]  ;;  %v239_v58 = vld [vmem:[%s902_s22 + $0x1f0] sm:$0xff] }
  0x33   : > { %730 = vst [vmem:[%s945_s26 + $0x88] sm:$0xff] %v666_v55  ;;  %v362_v3 = vmul.f32 %v906_v7, %v222_v53  ;;  %v363_v4 = vmul.f32 %v904_v6, %v223_v54  ;;  %v605_v10 = vadd.f32 %v498_v62, %v497_v57  ;;  %v501_v11 = vadd.f32 %v908_v8, %v361_v0  ;;  %v238_v57 = vld [vmem:[%s902_s22 + $0x1e8] sm:$0xff]  ;;  %v241_v0 = vld [vmem:[%s902_s22 + $0x200] sm:$0xff] }
  0x34   : > { %731 = vst [vmem:[%s945_s26 + $0x90] sm:$0xff] %v667_v61  ;;  %v364_v12 = vmul.f32 %v906_v7, %v224_v59  ;;  %v365_v13 = vmul.f32 %v904_v6, %v225_v60  ;;  %v668_v16 = vmax.f32 %v604_v1, 0.0  ;;  %v606_v17 = vadd.f32 %v500_v2, %v499_v63  ;;  %v240_v63 = vld [vmem:[%s902_s22 + $0x1f8] sm:$0xff] }
  0x35   : > { %v502_v18 = vadd.f32 %v910_v9, %v362_v3  ;;  %v503_v19 = vadd.f32 %v908_v8, %v363_v4  ;;  %v669_v22 = vmax.f32 %v605_v10, 0.0  ;;  %v366_v24 = vmul.f32 %v906_v7, %v226_v5 }
  0x36   : > { %v504_v23 = vadd.f32 %v910_v9, %v364_v12  ;;  %v505_v25 = vadd.f32 %v908_v8, %v365_v13  ;;  %732 = vst [vmem:[%s945_s26 + $0x98] sm:$0xff] %v668_v16  ;;  %v670_v27 = vmax.f32 %v606_v17, 0.0  ;;  %v367_v29 = vmul.f32 %v904_v6, %v227_v14  ;;  %v242_v13 = vld [vmem:[%s902_s22 + $0x208] sm:$0xff] }
  0x37   : > { %v607_v28 = vadd.f32 %v502_v18, %v501_v11  ;;  %v368_v30 = vmul.f32 %v906_v7, %v228_v15  ;;  %733 = vst [vmem:[%s945_s26 + $0xa0] sm:$0xff] %v669_v22  ;;  %v506_v32 = vadd.f32 %v910_v9, %v366_v24  ;;  %v369_v33 = vmul.f32 %v904_v6, %v229_v20  ;;  %v243_v18 = vld [vmem:[%s902_s22 + $0x210] sm:$0xff]  ;;  %v245_v24 = vld [vmem:[%s902_s22 + $0x220] sm:$0xff] }
  0x38   : > { %v608_v31 = vadd.f32 %v504_v23, %v503_v19  ;;  %v370_v34 = vmul.f32 %v906_v7, %v230_v21  ;;  %734 = vst [vmem:[%s945_s26 + $0xa8] sm:$0xff] %v670_v27  ;;  %v507_v38 = vadd.f32 %v908_v8, %v367_v29  ;;  %v371_v40 = vmul.f32 %v904_v6, %v231_v26  ;;  %v244_v19 = vld [vmem:[%s902_s22 + $0x218] sm:$0xff] }
  0x39   : > { %v671_v37 = vmax.f32 %v607_v28, 0.0  ;;  %v508_v39 = vadd.f32 %v910_v9, %v368_v30  ;;  %v609_v44 = vadd.f32 %v506_v32, %v505_v25  ;;  %v509_v45 = vadd.f32 %v908_v8, %v369_v33  ;;  %v246_v25 = vld [vmem:[%s902_s22 + $0x228] sm:$0xff]  ;;  %v247_v30 = vld [vmem:[%s902_s22 + $0x230] sm:$0xff] }
  0x3a   : > { %v672_v43 = vmax.f32 %v608_v31, 0.0  ;;  %v510_v46 = vadd.f32 %v910_v9, %v370_v34  ;;  %v372_v49 = vmul.f32 %v906_v7, %v232_v35  ;;  %v511_v50 = vadd.f32 %v908_v8, %v371_v40  ;;  %v249_v40 = vld [vmem:[%s902_s22 + $0x240] sm:$0xff] }
  0x3b   : > { %735 = vst [vmem:[%s945_s26 + $0xb0] sm:$0xff] %v671_v37  ;;  %v610_v48 = vadd.f32 %v508_v39, %v507_v38  ;;  %v373_v51 = vmul.f32 %v904_v6, %v233_v36  ;;  %v673_v53 = vmax.f32 %v609_v44, 0.0  ;;  %v374_v55 = vmul.f32 %v906_v7, %v234_v41  ;;  %v248_v39 = vld [vmem:[%s902_s22 + $0x238] sm:$0xff] }
  0x3c   : > { %736 = vst [vmem:[%s945_s26 + $0xb8] sm:$0xff] %v672_v43  ;;  %v611_v54 = vadd.f32 %v510_v46, %v509_v45  ;;  %v375_v56 = vmul.f32 %v904_v6, %v235_v42  ;;  %v512_v60 = vadd.f32 %v910_v9, %v372_v49  ;;  %v376_v62 = vmul.f32 %v906_v7, %v236_v47  ;;  %v250_v45 = vld [vmem:[%s902_s22 + $0x248] sm:$0xff]  ;;  %v251_v46 = vld [vmem:[%s902_s22 + $0x250] sm:$0xff] }
  0x3d   : > { %v674_v59 = vmax.f32 %v610_v48, 0.0  ;;  %v513_v61 = vadd.f32 %v908_v8, %v373_v51  ;;  %737 = vst [vmem:[%s945_s26 + $0xc0] sm:$0xff] %v673_v53  ;;  %v514_v2 = vadd.f32 %v910_v9, %v374_v55  ;;  %v377_v4 = vmul.f32 %v904_v6, %v237_v52  ;;  %v252_v51 = vld [vmem:[%s902_s22 + $0x258] sm:$0xff] }
  0x3e   : > { %v675_v1 = vmax.f32 %v611_v54, 0.0  ;;  %v515_v3 = vadd.f32 %v908_v8, %v375_v56  ;;  %v612_v5 = vadd.f32 %v512_v60, %v511_v50  ;;  %v516_v10 = vadd.f32 %v910_v9, %v376_v62  ;;  %v253_v56 = vld [vmem:[%s902_s22 + $0x260] sm:$0xff]  ;;  %v255_v62 = vld [vmem:[%s902_s22 + $0x270] sm:$0xff] }
  0x3f   : > { %738 = vst [vmem:[%s945_s26 + $0xc8] sm:$0xff] %v674_v59  ;;  %v378_v11 = vmul.f32 %v906_v7, %v238_v57  ;;  %v379_v12 = vmul.f32 %v904_v6, %v239_v58  ;;  %v613_v14 = vadd.f32 %v514_v2, %v513_v61  ;;  %v517_v15 = vadd.f32 %v908_v8, %v377_v4  ;;  %v254_v61 = vld [vmem:[%s902_s22 + $0x268] sm:$0xff]  ;;  %v257_v4 = vld [vmem:[%s902_s22 + $0x280] sm:$0xff] }
  0x40   : > { %739 = vst [vmem:[%s945_s26 + $0xd0] sm:$0xff] %v675_v1  ;;  %v380_v16 = vmul.f32 %v906_v7, %v240_v63  ;;  %v381_v17 = vmul.f32 %v904_v6, %v241_v0  ;;  %v676_v20 = vmax.f32 %v612_v5, 0.0  ;;  %v614_v21 = vadd.f32 %v516_v10, %v515_v3  ;;  %v256_v3 = vld [vmem:[%s902_s22 + $0x278] sm:$0xff] }
  0x41   : > { %v518_v22 = vadd.f32 %v910_v9, %v378_v11  ;;  %v519_v23 = vadd.f32 %v908_v8, %v379_v12  ;;  %v677_v26 = vmax.f32 %v613_v14, 0.0  ;;  %v382_v28 = vmul.f32 %v906_v7, %v242_v13 }
  0x42   : > { %v520_v27 = vadd.f32 %v910_v9, %v380_v16  ;;  %v521_v29 = vadd.f32 %v908_v8, %v381_v17  ;;  %740 = vst [vmem:[%s945_s26 + $0xd8] sm:$0xff] %v676_v20  ;;  %v678_v31 = vmax.f32 %v614_v21, 0.0  ;;  %v383_v33 = vmul.f32 %v904_v6, %v243_v18  ;;  %v258_v17 = vld [vmem:[%s902_s22 + $0x288] sm:$0xff] }
  0x43   : > { %v615_v32 = vadd.f32 %v518_v22, %v517_v15  ;;  %v384_v34 = vmul.f32 %v906_v7, %v244_v19  ;;  %741 = vst [vmem:[%s945_s26 + $0xe0] sm:$0xff] %v677_v26  ;;  %v522_v36 = vadd.f32 %v910_v9, %v382_v28  ;;  %v385_v37 = vmul.f32 %v904_v6, %v245_v24  ;;  %v259_v22 = vld [vmem:[%s902_s22 + $0x290] sm:$0xff]  ;;  %v261_v28 = vld [vmem:[%s902_s22 + $0x2a0] sm:$0xff] }
  0x44   : > { %v616_v35 = vadd.f32 %v520_v27, %v519_v23  ;;  %v386_v38 = vmul.f32 %v906_v7, %v246_v25  ;;  %742 = vst [vmem:[%s945_s26 + $0xe8] sm:$0xff] %v678_v31  ;;  %v523_v42 = vadd.f32 %v908_v8, %v383_v33  ;;  %v387_v44 = vmul.f32 %v904_v6, %v247_v30  ;;  %v260_v23 = vld [vmem:[%s902_s22 + $0x298] sm:$0xff] }
  0x45   : > { %v679_v41 = vmax.f32 %v615_v32, 0.0  ;;  %v524_v43 = vadd.f32 %v910_v9, %v384_v34  ;;  %v617_v48 = vadd.f32 %v522_v36, %v521_v29  ;;  %v525_v49 = vadd.f32 %v908_v8, %v385_v37  ;;  %v262_v29 = vld [vmem:[%s902_s22 + $0x2a8] sm:$0xff]  ;;  %v263_v34 = vld [vmem:[%s902_s22 + $0x2b0] sm:$0xff] }
  0x46   : > { %v680_v47 = vmax.f32 %v616_v35, 0.0  ;;  %v526_v50 = vadd.f32 %v910_v9, %v386_v38  ;;  %v388_v53 = vmul.f32 %v906_v7, %v248_v39  ;;  %v527_v54 = vadd.f32 %v908_v8, %v387_v44  ;;  %v265_v44 = vld [vmem:[%s902_s22 + $0x2c0] sm:$0xff] }
  0x47   : > { %743 = vst [vmem:[%s945_s26 + $0xf0] sm:$0xff] %v679_v41  ;;  %v618_v52 = vadd.f32 %v524_v43, %v523_v42  ;;  %v389_v55 = vmul.f32 %v904_v6, %v249_v40  ;;  %v681_v57 = vmax.f32 %v617_v48, 0.0  ;;  %v390_v59 = vmul.f32 %v906_v7, %v250_v45  ;;  %v264_v43 = vld [vmem:[%s902_s22 + $0x2b8] sm:$0xff] }
  0x48   : > { %744 = vst [vmem:[%s945_s26 + $0xf8] sm:$0xff] %v680_v47  ;;  %v619_v58 = vadd.f32 %v526_v50, %v525_v49  ;;  %v391_v60 = vmul.f32 %v904_v6, %v251_v46  ;;  %v528_v0 = vadd.f32 %v910_v9, %v388_v53  ;;  %v392_v2 = vmul.f32 %v906_v7, %v252_v51  ;;  %v266_v49 = vld [vmem:[%s902_s22 + $0x2c8] sm:$0xff]  ;;  %v267_v50 = vld [vmem:[%s902_s22 + $0x2d0] sm:$0xff] }
  0x49   : > { %v682_v63 = vmax.f32 %v618_v52, 0.0  ;;  %v529_v1 = vadd.f32 %v908_v8, %v389_v55  ;;  %745 = vst [vmem:[%s945_s26 + $0x100] sm:$0xff] %v681_v57  ;;  %v530_v10 = vadd.f32 %v910_v9, %v390_v59  ;;  %v393_v12 = vmul.f32 %v904_v6, %v253_v56  ;;  %v268_v55 = vld [vmem:[%s902_s22 + $0x2d8] sm:$0xff] }
  0x4a   : > { %v683_v5 = vmax.f32 %v619_v58, 0.0  ;;  %v531_v11 = vadd.f32 %v908_v8, %v391_v60  ;;  %v620_v13 = vadd.f32 %v528_v0, %v527_v54  ;;  %v532_v14 = vadd.f32 %v910_v9, %v392_v2  ;;  %v269_v60 = vld [vmem:[%s902_s22 + $0x2e0] sm:$0xff]  ;;  %v271_v2 = vld [vmem:[%s902_s22 + $0x2f0] sm:$0xff] }
  0x4b   : > { %746 = vst [vmem:[%s945_s26 + $0x108] sm:$0xff] %v682_v63  ;;  %v394_v15 = vmul.f32 %v906_v7, %v254_v61  ;;  %v395_v16 = vmul.f32 %v904_v6, %v255_v62  ;;  %v621_v18 = vadd.f32 %v530_v10, %v529_v1  ;;  %v533_v19 = vadd.f32 %v908_v8, %v393_v12  ;;  %v270_v1 = vld [vmem:[%s902_s22 + $0x2e8] sm:$0xff]  ;;  %v273_v12 = vld [vmem:[%s902_s22 + $0x300] sm:$0xff] }
  0x4c   : > { %747 = vst [vmem:[%s945_s26 + $0x110] sm:$0xff] %v683_v5  ;;  %v396_v20 = vmul.f32 %v906_v7, %v256_v3  ;;  %v397_v21 = vmul.f32 %v904_v6, %v257_v4  ;;  %v684_v24 = vmax.f32 %v620_v13, 0.0  ;;  %v622_v25 = vadd.f32 %v532_v14, %v531_v11  ;;  %v272_v11 = vld [vmem:[%s902_s22 + $0x2f8] sm:$0xff] }
  0x4d   : > { %v534_v26 = vadd.f32 %v910_v9, %v394_v15  ;;  %v535_v27 = vadd.f32 %v908_v8, %v395_v16  ;;  %v685_v30 = vmax.f32 %v621_v18, 0.0  ;;  %v398_v32 = vmul.f32 %v906_v7, %v258_v17 }
  0x4e   : > { %v536_v31 = vadd.f32 %v910_v9, %v396_v20  ;;  %v537_v33 = vadd.f32 %v908_v8, %v397_v21  ;;  %748 = vst [vmem:[%s945_s26 + $0x118] sm:$0xff] %v684_v24  ;;  %v686_v35 = vmax.f32 %v622_v25, 0.0  ;;  %v399_v37 = vmul.f32 %v904_v6, %v259_v22  ;;  %v274_v21 = vld [vmem:[%s902_s22 + $0x308] sm:$0xff] }
  0x4f   : > { %v623_v36 = vadd.f32 %v534_v26, %v533_v19  ;;  %v400_v38 = vmul.f32 %v906_v7, %v260_v23  ;;  %749 = vst [vmem:[%s945_s26 + $0x120] sm:$0xff] %v685_v30  ;;  %v538_v40 = vadd.f32 %v910_v9, %v398_v32  ;;  %v401_v41 = vmul.f32 %v904_v6, %v261_v28  ;;  %v275_v26 = vld [vmem:[%s902_s22 + $0x310] sm:$0xff]  ;;  %v277_v32 = vld [vmem:[%s902_s22 + $0x320] sm:$0xff] }
  0x50   : > { %v624_v39 = vadd.f32 %v536_v31, %v535_v27  ;;  %v402_v42 = vmul.f32 %v906_v7, %v262_v29  ;;  %750 = vst [vmem:[%s945_s26 + $0x128] sm:$0xff] %v686_v35  ;;  %v539_v46 = vadd.f32 %v908_v8, %v399_v37  ;;  %v403_v48 = vmul.f32 %v904_v6, %v263_v34  ;;  %v276_v27 = vld [vmem:[%s902_s22 + $0x318] sm:$0xff] }
  0x51   : > { %v687_v45 = vmax.f32 %v623_v36, 0.0  ;;  %v540_v47 = vadd.f32 %v910_v9, %v400_v38  ;;  %v625_v52 = vadd.f32 %v538_v40, %v537_v33  ;;  %v541_v53 = vadd.f32 %v908_v8, %v401_v41  ;;  %v278_v33 = vld [vmem:[%s902_s22 + $0x328] sm:$0xff]  ;;  %v279_v38 = vld [vmem:[%s902_s22 + $0x330] sm:$0xff] }
  0x52   : > { %v688_v51 = vmax.f32 %v624_v39, 0.0  ;;  %v542_v54 = vadd.f32 %v910_v9, %v402_v42  ;;  %v404_v57 = vmul.f32 %v906_v7, %v264_v43  ;;  %v543_v58 = vadd.f32 %v908_v8, %v403_v48  ;;  %v281_v48 = vld [vmem:[%s902_s22 + $0x340] sm:$0xff] }
  0x53   : > { %751 = vst [vmem:[%s945_s26 + $0x130] sm:$0xff] %v687_v45  ;;  %v626_v56 = vadd.f32 %v540_v47, %v539_v46  ;;  %v405_v59 = vmul.f32 %v904_v6, %v265_v44  ;;  %v689_v61 = vmax.f32 %v625_v52, 0.0  ;;  %v406_v63 = vmul.f32 %v906_v7, %v266_v49  ;;  %v280_v47 = vld [vmem:[%s902_s22 + $0x338] sm:$0xff] }
  0x54   : > { %752 = vst [vmem:[%s945_s26 + $0x138] sm:$0xff] %v688_v51  ;;  %v627_v62 = vadd.f32 %v542_v54, %v541_v53  ;;  %v407_v0 = vmul.f32 %v904_v6, %v267_v50  ;;  %v544_v4 = vadd.f32 %v910_v9, %v404_v57  ;;  %v408_v10 = vmul.f32 %v906_v7, %v268_v55  ;;  %v282_v53 = vld [vmem:[%s902_s22 + $0x348] sm:$0xff]  ;;  %v283_v54 = vld [vmem:[%s902_s22 + $0x350] sm:$0xff] }
  0x55   : > { %v690_v3 = vmax.f32 %v626_v56, 0.0  ;;  %v545_v5 = vadd.f32 %v908_v8, %v405_v59  ;;  %753 = vst [vmem:[%s945_s26 + $0x140] sm:$0xff] %v689_v61  ;;  %v546_v14 = vadd.f32 %v910_v9, %v406_v63  ;;  %v409_v16 = vmul.f32 %v904_v6, %v269_v60  ;;  %v284_v59 = vld [vmem:[%s902_s22 + $0x358] sm:$0xff] }
  0x56   : > { %v691_v13 = vmax.f32 %v627_v62, 0.0  ;;  %v547_v15 = vadd.f32 %v908_v8, %v407_v0  ;;  %v628_v17 = vadd.f32 %v544_v4, %v543_v58  ;;  %v548_v18 = vadd.f32 %v910_v9, %v408_v10  ;;  %v285_v0 = vld [vmem:[%s902_s22 + $0x360] sm:$0xff]  ;;  %v287_v10 = vld [vmem:[%s902_s22 + $0x370] sm:$0xff] }
  0x57   : > { %754 = vst [vmem:[%s945_s26 + $0x148] sm:$0xff] %v690_v3  ;;  %v410_v19 = vmul.f32 %v906_v7, %v270_v1  ;;  %v411_v20 = vmul.f32 %v904_v6, %v271_v2  ;;  %v629_v22 = vadd.f32 %v546_v14, %v545_v5  ;;  %v549_v23 = vadd.f32 %v908_v8, %v409_v16  ;;  %v286_v5 = vld [vmem:[%s902_s22 + $0x368] sm:$0xff]  ;;  %v289_v16 = vld [vmem:[%s902_s22 + $0x380] sm:$0xff] }
  0x58   : > { %755 = vst [vmem:[%s945_s26 + $0x150] sm:$0xff] %v691_v13  ;;  %v412_v24 = vmul.f32 %v906_v7, %v272_v11  ;;  %v413_v25 = vmul.f32 %v904_v6, %v273_v12  ;;  %v692_v28 = vmax.f32 %v628_v17, 0.0  ;;  %v630_v29 = vadd.f32 %v548_v18, %v547_v15  ;;  %v288_v15 = vld [vmem:[%s902_s22 + $0x378] sm:$0xff] }
  0x59   : > { %v550_v30 = vadd.f32 %v910_v9, %v410_v19  ;;  %v551_v31 = vadd.f32 %v908_v8, %v411_v20  ;;  %v693_v34 = vmax.f32 %v629_v22, 0.0  ;;  %v414_v36 = vmul.f32 %v906_v7, %v274_v21 }
  0x5a   : > { %v552_v35 = vadd.f32 %v910_v9, %v412_v24  ;;  %v553_v37 = vadd.f32 %v908_v8, %v413_v25  ;;  %756 = vst [vmem:[%s945_s26 + $0x158] sm:$0xff] %v692_v28  ;;  %v694_v39 = vmax.f32 %v630_v29, 0.0  ;;  %v415_v41 = vmul.f32 %v904_v6, %v275_v26  ;;  %v290_v25 = vld [vmem:[%s902_s22 + $0x388] sm:$0xff] }
  0x5b   : > { %v631_v40 = vadd.f32 %v550_v30, %v549_v23  ;;  %v416_v42 = vmul.f32 %v906_v7, %v276_v27  ;;  %757 = vst [vmem:[%s945_s26 + $0x160] sm:$0xff] %v693_v34  ;;  %v554_v44 = vadd.f32 %v910_v9, %v414_v36  ;;  %v417_v45 = vmul.f32 %v904_v6, %v277_v32  ;;  %v291_v30 = vld [vmem:[%s902_s22 + $0x390] sm:$0xff]  ;;  %v293_v36 = vld [vmem:[%s902_s22 + $0x3a0] sm:$0xff] }
  0x5c   : > { %v632_v43 = vadd.f32 %v552_v35, %v551_v31  ;;  %v418_v46 = vmul.f32 %v906_v7, %v278_v33  ;;  %758 = vst [vmem:[%s945_s26 + $0x168] sm:$0xff] %v694_v39  ;;  %v555_v50 = vadd.f32 %v908_v8, %v415_v41  ;;  %v419_v52 = vmul.f32 %v904_v6, %v279_v38  ;;  %v292_v31 = vld [vmem:[%s902_s22 + $0x398] sm:$0xff] }
  0x5d   : > { %v695_v49 = vmax.f32 %v631_v40, 0.0  ;;  %v556_v51 = vadd.f32 %v910_v9, %v416_v42  ;;  %v633_v56 = vadd.f32 %v554_v44, %v553_v37  ;;  %v557_v57 = vadd.f32 %v908_v8, %v417_v45  ;;  %v294_v37 = vld [vmem:[%s902_s22 + $0x3a8] sm:$0xff]  ;;  %v295_v42 = vld [vmem:[%s902_s22 + $0x3b0] sm:$0xff] }
  0x5e   : > { %v696_v55 = vmax.f32 %v632_v43, 0.0  ;;  %v558_v58 = vadd.f32 %v910_v9, %v418_v46  ;;  %v420_v61 = vmul.f32 %v906_v7, %v280_v47  ;;  %v559_v62 = vadd.f32 %v908_v8, %v419_v52  ;;  %v297_v52 = vld [vmem:[%s902_s22 + $0x3c0] sm:$0xff] }
  0x5f   : > { %759 = vst [vmem:[%s945_s26 + $0x170] sm:$0xff] %v695_v49  ;;  %v634_v60 = vadd.f32 %v556_v51, %v555_v50  ;;  %v421_v63 = vmul.f32 %v904_v6, %v281_v48  ;;  %v697_v1 = vmax.f32 %v633_v56, 0.0  ;;  %v422_v3 = vmul.f32 %v906_v7, %v282_v53  ;;  %v296_v51 = vld [vmem:[%s902_s22 + $0x3b8] sm:$0xff] }
  0x60   : > { %760 = vst [vmem:[%s945_s26 + $0x178] sm:$0xff] %v696_v55  ;;  %v635_v2 = vadd.f32 %v558_v58, %v557_v57  ;;  %v423_v4 = vmul.f32 %v904_v6, %v283_v54  ;;  %v560_v12 = vadd.f32 %v910_v9, %v420_v61  ;;  %v424_v14 = vmul.f32 %v906_v7, %v284_v59  ;;  %v298_v57 = vld [vmem:[%s902_s22 + $0x3c8] sm:$0xff]  ;;  %v299_v58 = vld [vmem:[%s902_s22 + $0x3d0] sm:$0xff] }
  0x61   : > { %v698_v11 = vmax.f32 %v634_v60, 0.0  ;;  %v561_v13 = vadd.f32 %v908_v8, %v421_v63  ;;  %761 = vst [vmem:[%s945_s26 + $0x180] sm:$0xff] %v697_v1  ;;  %v562_v18 = vadd.f32 %v910_v9, %v422_v3  ;;  %v425_v20 = vmul.f32 %v904_v6, %v285_v0  ;;  %v300_v63 = vld [vmem:[%s902_s22 + $0x3d8] sm:$0xff] }
  0x62   : > { %v699_v17 = vmax.f32 %v635_v2, 0.0  ;;  %v563_v19 = vadd.f32 %v908_v8, %v423_v4  ;;  %v636_v21 = vadd.f32 %v560_v12, %v559_v62  ;;  %v564_v22 = vadd.f32 %v910_v9, %v424_v14  ;;  %v301_v4 = vld [vmem:[%s902_s22 + $0x3e0] sm:$0xff]  ;;  %v303_v14 = vld [vmem:[%s902_s22 + $0x3f0] sm:$0xff] }
  0x63   : > { %762 = vst [vmem:[%s945_s26 + $0x188] sm:$0xff] %v698_v11  ;;  %v426_v23 = vmul.f32 %v906_v7, %v286_v5  ;;  %v427_v24 = vmul.f32 %v904_v6, %v287_v10  ;;  %v637_v26 = vadd.f32 %v562_v18, %v561_v13  ;;  %v565_v27 = vadd.f32 %v908_v8, %v425_v20  ;;  %v302_v13 = vld [vmem:[%s902_s22 + $0x3e8] sm:$0xff] }
  0x64   : > { %763 = vst [vmem:[%s945_s26 + $0x190] sm:$0xff] %v699_v17  ;;  %v428_v28 = vmul.f32 %v906_v7, %v288_v15  ;;  %v429_v29 = vmul.f32 %v904_v6, %v289_v16  ;;  %v700_v32 = vmax.f32 %v636_v21, 0.0  ;;  %v638_v33 = vadd.f32 %v564_v22, %v563_v19  ;;  %v304_v19 = vld [vmem:[%s902_s22 + $0x3f8] sm:$0xff] }
  0x65   : > { %v566_v34 = vadd.f32 %v910_v9, %v426_v23  ;;  %v567_v35 = vadd.f32 %v908_v8, %v427_v24  ;;  %v701_v38 = vmax.f32 %v637_v26, 0.0  ;;  %v430_v40 = vmul.f32 %v906_v7, %v290_v25 }
  0x66   : > { %v568_v39 = vadd.f32 %v910_v9, %v428_v28  ;;  %v569_v41 = vadd.f32 %v908_v8, %v429_v29  ;;  %764 = vst [vmem:[%s945_s26 + $0x198] sm:$0xff] %v700_v32  ;;  %v702_v43 = vmax.f32 %v638_v33, 0.0  ;;  %v431_v45 = vmul.f32 %v904_v6, %v291_v30 }
  0x67   : > { %v639_v44 = vadd.f32 %v566_v34, %v565_v27  ;;  %v432_v46 = vmul.f32 %v906_v7, %v292_v31  ;;  %765 = vst [vmem:[%s945_s26 + $0x1a0] sm:$0xff] %v701_v38  ;;  %v570_v48 = vadd.f32 %v910_v9, %v430_v40  ;;  %v433_v49 = vmul.f32 %v904_v6, %v293_v36 }
  0x68   : > { %v640_v47 = vadd.f32 %v568_v39, %v567_v35  ;;  %v434_v50 = vmul.f32 %v906_v7, %v294_v37  ;;  %766 = vst [vmem:[%s945_s26 + $0x1a8] sm:$0xff] %v702_v43  ;;  %v571_v54 = vadd.f32 %v908_v8, %v431_v45  ;;  %v435_v56 = vmul.f32 %v904_v6, %v295_v42 }
  0x69   : > { %v703_v53 = vmax.f32 %v639_v44, 0.0  ;;  %v572_v55 = vadd.f32 %v910_v9, %v432_v46  ;;  %v641_v60 = vadd.f32 %v570_v48, %v569_v41  ;;  %v573_v61 = vadd.f32 %v908_v8, %v433_v49 }
  0x6a   : > { %v704_v59 = vmax.f32 %v640_v47, 0.0  ;;  %v574_v62 = vadd.f32 %v910_v9, %v434_v50  ;;  %v436_v1 = vmul.f32 %v906_v7, %v296_v51  ;;  %v575_v2 = vadd.f32 %v908_v8, %v435_v56 }
  0x6b   : > { %767 = vst [vmem:[%s945_s26 + $0x1b0] sm:$0xff] %v703_v53  ;;  %v642_v0 = vadd.f32 %v572_v55, %v571_v54  ;;  %v437_v3 = vmul.f32 %v904_v6, %v297_v52  ;;  %v705_v5 = vmax.f32 %v641_v60, 0.0  ;;  %v438_v11 = vmul.f32 %v906_v7, %v298_v57 }
  0x6c   : > { %768 = vst [vmem:[%s945_s26 + $0x1b8] sm:$0xff] %v704_v59  ;;  %v643_v10 = vadd.f32 %v574_v62, %v573_v61  ;;  %v439_v12 = vmul.f32 %v904_v6, %v299_v58  ;;  %v576_v16 = vadd.f32 %v910_v9, %v436_v1  ;;  %v440_v18 = vmul.f32 %v906_v7, %v300_v63 }
  0x6d   : > { %v706_v15 = vmax.f32 %v642_v0, 0.0  ;;  %v577_v17 = vadd.f32 %v908_v8, %v437_v3  ;;  %769 = vst [vmem:[%s945_s26 + $0x1c0] sm:$0xff] %v705_v5  ;;  %v578_v21 = vadd.f32 %v910_v9, %v438_v11  ;;  %v441_v23 = vmul.f32 %v904_v6, %v301_v4 }
  0x6e   : > { %v707_v20 = vmax.f32 %v643_v10, 0.0  ;;  %v579_v22 = vadd.f32 %v908_v8, %v439_v12  ;;  %v644_v24 = vadd.f32 %v576_v16, %v575_v2  ;;  %v580_v25 = vadd.f32 %v910_v9, %v440_v18 }
  0x6f   : > { %770 = vst [vmem:[%s945_s26 + $0x1c8] sm:$0xff] %v706_v15  ;;  %v442_v26 = vmul.f32 %v906_v7, %v302_v13  ;;  %v443_v27 = vmul.f32 %v904_v6, %v303_v14  ;;  %v645_v28 = vadd.f32 %v578_v21, %v577_v17  ;;  %v581_v29 = vadd.f32 %v908_v8, %v441_v23 }
  0x70   : > { %771 = vst [vmem:[%s945_s26 + $0x1d0] sm:$0xff] %v707_v20  ;;  %v444_v30 = vmul.f32 %v906_v7, %v304_v19  ;;  %v708_v31 = vmax.f32 %v644_v24, 0.0  ;;  %v646_v32 = vadd.f32 %v580_v25, %v579_v22 }
  0x71   : > { %v582_v33 = vadd.f32 %v910_v9, %v442_v26  ;;  %v583_v34 = vadd.f32 %v908_v8, %v443_v27  ;;  %v709_v35 = vmax.f32 %v645_v28, 0.0 }
  0x72   : > { %v584_v36 = vadd.f32 %v910_v9, %v444_v30  ;;  %772 = vst [vmem:[%s945_s26 + $0x1d8] sm:$0xff] %v708_v31  ;;  %v710_v6 = vmax.f32 %v646_v32, 0.0 }
  0x73   : > { %v647_v37 = vadd.f32 %v582_v33, %v581_v29  ;;  %773 = vst [vmem:[%s945_s26 + $0x1e0] sm:$0xff] %v709_v35 }
  0x74   : > { %v648_v38 = vadd.f32 %v584_v36, %v583_v34  ;;  %774 = vst [vmem:[%s945_s26 + $0x1e8] sm:$0xff] %v710_v6 }
  0x75   : > { %v711_v39 = vmax.f32 %v647_v37, 0.0 }
  0x76   : > { %v712_v40 = vmax.f32 %v648_v38, 0.0 }
  0x77   : > { %775 = vst [vmem:[%s945_s26 + $0x1f0] sm:$0xff] %v711_v39 }
  0x78   : > { %776 = vst [vmem:[%s945_s26 + $0x1f8] sm:$0xff] %v712_v40 }
  0x79 PF: > { %s13_s12 = sadd.s32 1, %s860_s12  }
  0x7a   : > { %p10_p4 = scmp.ge.s32.totalorder %s13_s12, 4  }
  0x7c   :  { %12 = sbr.rel (!%p10_p4) target bundleno = 1 (0x1), region = 62 }

</bundles_post_ra>
